<compile_context>
chip_gen: v7x
topology: tpu7x:2x2x1
jax: 0.10.0
libtpu: 0.0.40
codegen_flags: <defaults>
</compile_context>

<pallas_src>
import jax
import jax.numpy as jnp
from jax import lax
from jax.experimental import pallas as pl
from jax.experimental.pallas import tpu as pltpu

CP = 128           # output-channel padding -> lane width (lane-dense stores)
K1 = 128           # layer-1 contraction: 25 taps * 3 ch = 75, padded to 128
K23 = 896          # layer-2/3 contraction: 25 taps * 32 ch = 800, padded to 896


# ---------------------------------------------------------------------------
# Fused  conv-as-matmul + bias + MaxPool2d(2)  kernel
# ---------------------------------------------------------------------------
def _make_conv_pool_kernel(B, H, W):
    """B whole images per block, pre-pool spatial size HxW (H, W even)."""
    Hh, Wh = H // 2, W // 2
    RPI = H * W            # conv rows per image
    OPI = Hh * Wh          # pooled rows per image

    def kernel(p_ref, w_ref, b_ref, o_ref, acc_ref, vmx_ref):
        # p_ref:   [B*RPI, K]   bf16  im2col patches ((kh,kw,cin) packed in K)
        # w_ref:   [K, CP]      bf16  conv weights, cout padded to 128
        # b_ref:   [1, CP]      f32
        # o_ref:   [B*OPI, CP]  bf16  pooled output (lane-dense)
        # acc_ref: [B*RPI, CP]  f32   conv accumulator (written once)
        # vmx_ref: [B*RPI//2, CP] f32 vertical pair-max scratch
        acc_ref[...] = jnp.dot(p_ref[...], w_ref[...],
                               preferred_element_type=jnp.float32)
        bias = b_ref[...]                                    # [1, CP] f32
        for b in range(B):
            base = b * RPI
            vbase = b * (RPI // 2)
            # Vertical 2x2-pool half: max of two contiguous, sublane-aligned
            # [W, CP] slabs (pure VPU, no strided access).
            for h2 in range(Hh):
                src = base + 2 * h2 * W
                vmx_ref[pl.ds(vbase + h2 * W, W), :] = jnp.maximum(
                    acc_ref[pl.ds(src, W), :],
                    acc_ref[pl.ds(src + W, W), :])
            # Horizontal half: rows of vmx are ordered (h2, w) with W even, so
            # a single global stride-2 pair-max yields pooled rows in (h2, w2)
            # order.  Bias is per-channel constant, so max(x)+b == max(x+b).
            o_ref[pl.ds(b * OPI, OPI), :] = (
                jnp.maximum(vmx_ref[pl.ds(vbase, OPI, stride=2), :],
                            vmx_ref[pl.ds(vbase + 1, OPI, stride=2), :])
                + bias).astype(o_ref.dtype)

    return kernel


def _pick_images_per_block(n_imgs, rows_per_img, target_rows=2048):
    """Largest divisor of n_imgs whose block fits target_rows; prefer >=2 grid
    steps so v7x's two TensorCores both get work."""
    divs = [d for d in range(1, n_imgs + 1) if n_imgs % d == 0]
    cands = [d for d in divs
             if d * rows_per_img <= target_rows and n_imgs // d >= 2]
    if not cands:
        cands = [d for d in divs if d * rows_per_img <= target_rows]
    if not cands:
        cands = [1]
    return max(cands)


def conv_pool_layer(patches, w, b, n_imgs, H, W):
    """patches: [n_imgs*H*W, K] bf16 -> [n_imgs*(H//2)*(W//2), CP] bf16."""
    RPI = H * W
    OPI = (H // 2) * (W // 2)
    K = patches.shape[1]
    B = _pick_images_per_block(n_imgs, RPI)
    grid = n_imgs // B
    return pl.pallas_call(
        _make_conv_pool_kernel(B, H, W),
        out_shape=jax.ShapeDtypeStruct((n_imgs * OPI, CP), jnp.bfloat16),
        grid=(grid,),
        in_specs=[
            pl.BlockSpec((B * RPI, K), lambda g: (g, 0)),   # patches (pipelined)
            pl.BlockSpec((K, CP), lambda g: (0, 0)),        # weights (resident)
            pl.BlockSpec((1, CP), lambda g: (0, 0)),        # bias    (resident)
        ],
        out_specs=pl.BlockSpec((B * OPI, CP), lambda g: (g, 0)),
        scratch_shapes=[pltpu.VMEM((B * RPI, CP), jnp.float32),
                        pltpu.VMEM((B * RPI // 2, CP), jnp.float32)],
        compiler_params=pltpu.CompilerParams(
            dimension_semantics=("parallel",)),
    )(patches, w, b)


# ---------------------------------------------------------------------------
# Fused Linear(1024,64) + Linear(64,10) head (output lanes padded to 128)
# ---------------------------------------------------------------------------
def _mlp_kernel(x_ref, w4_ref, b4_ref, w5_ref, b5_ref, o_ref):
    h = jnp.dot(x_ref[...], w4_ref[...],
                preferred_element_type=jnp.float32) + b4_ref[...]
    o_ref[...] = jnp.dot(h.astype(jnp.bfloat16), w5_ref[...],
                         preferred_element_type=jnp.float32) + b5_ref[...]


def _pick_tm(n):
    if n <= 512:
        return n
    for tm in range(512, 0, -8):        # largest multiple-of-8 divisor <= 512
        if n % tm == 0:
            return tm
    return n


def mlp_head(x, w4, b4, w5, b5):
    N, K = x.shape
    tm = _pick_tm(N)
    return pl.pallas_call(
        _mlp_kernel,
        out_shape=jax.ShapeDtypeStruct((N, CP), jnp.float32),
        grid=(N // tm,),
        in_specs=[
            pl.BlockSpec((tm, K), lambda i: (i, 0)),
            pl.BlockSpec((K, CP), lambda i: (0, 0)),
            pl.BlockSpec((1, CP), lambda i: (0, 0)),
            pl.BlockSpec((CP, CP), lambda i: (0, 0)),
            pl.BlockSpec((1, CP), lambda i: (0, 0)),
        ],
        out_specs=pl.BlockSpec((tm, CP), lambda i: (i, 0)),
        compiler_params=pltpu.CompilerParams(
            dimension_semantics=("parallel",)),
    )(x, w4, b4, w5, b5)


# ---------------------------------------------------------------------------
# XLA-side im2col glue (true-K packing; a few hundred KB per image) + forward
# ---------------------------------------------------------------------------
def _im2col_patches(x_nhwc, cin, k_pad):
    """5x5 / padding=2 im2col: [N,H,W,C>=cin] -> [N*H*W, k_pad] bf16,
    lane index = (kh*5 + kw)*cin + c."""
    n, h, w, _ = x_nhwc.shape
    xp = jnp.pad(x_nhwc[..., :cin], ((0, 0), (2, 2), (2, 2), (0, 0)))
    cols = [xp[:, kh:kh + h, kw:kw + w, :] for kh in range(5) for kw in range(5)]
    p = jnp.concatenate(cols, axis=-1)                       # [N,H,W,25*cin]
    k = 25 * cin
    if k_pad > k:
        p = jnp.pad(p, ((0, 0), (0, 0), (0, 0), (0, k_pad - k)))
    return p.reshape(n * h * w, k_pad).astype(jnp.bfloat16)


def tudui_forward(x_nchw, params):
    N = x_nchw.shape[0]
    x = jnp.transpose(x_nchw, (0, 2, 3, 1)).astype(jnp.float32)   # NHWC [N,32,32,3]

    p1 = _im2col_patches(x, 3, K1)                                 # [N*1024, 128]
    y1 = conv_pool_layer(p1, params["w1"], params["b1"], N, 32, 32)  # [N*256,128]
    p2 = _im2col_patches(y1.reshape(N, 16, 16, CP), 32, K23)        # [N*256, 896]
    y2 = conv_pool_layer(p2, params["w2"], params["b2"], N, 16, 16)  # [N*64, 128]
    p3 = _im2col_patches(y2.reshape(N, 8, 8, CP), 32, K23)          # [N*64,  896]
    y3 = conv_pool_layer(p3, params["w3"], params["b3"], N, 8, 8)    # [N*16, 128]

    # Flatten: w4 columns were pre-permuted to the (h, w, c_padded) order of
    # y3, so the PyTorch (C,H,W) flatten is just a free reshape here.
    flat = y3.reshape(N, 16 * CP)                                    # [N, 2048]
    out = mlp_head(flat, params["w4"], params["b4"],
                   params["w5"], params["b5"])                       # [N, 128] f32
    return out[:, :10]


# ---------------------------------------------------------------------------
# Parameters: raw PyTorch-shaped init + one-time Pallas-friendly preparation
# ---------------------------------------------------------------------------
def init_params(key):
    ks = jax.random.split(key, 10)
    s = 0.05
    return {
        "w1": s * jax.random.normal(ks[0], (32, 3, 5, 5), jnp.float32),
        "b1": s * jax.random.normal(ks[1], (32,), jnp.float32),
        "w2": s * jax.random.normal(ks[2], (32, 32, 5, 5), jnp.float32),
        "b2": s * jax.random.normal(ks[3], (32,), jnp.float32),
        "w3": s * jax.random.normal(ks[4], (64, 32, 5, 5), jnp.float32),
        "b3": s * jax.random.normal(ks[5], (64,), jnp.float32),
        "w4": s * jax.random.normal(ks[6], (64, 1024), jnp.float32),   # Linear(1024,64)
        "b4": s * jax.random.normal(ks[7], (64,), jnp.float32),
        "w5": s * jax.random.normal(ks[8], (10, 64), jnp.float32),     # Linear(64,10)
        "b5": s * jax.random.normal(ks[9], (10,), jnp.float32),
    }


def prepare_params(raw):
    """Hoisted one-time relayout: pack conv weights as [(kh,kw,cin), cout_pad],
    permute w4 for the (h,w,c_pad) flatten, pad to 128 lanes, cast bf16."""
    def conv_w(w, k_pad):
        cout, cin, kh, kw = w.shape
        wt = jnp.transpose(w, (2, 3, 1, 0)).reshape(kh * kw * cin, cout)
        wt = jnp.pad(wt, ((0, k_pad - kh * kw * cin), (0, CP - cout)))
        return wt.astype(jnp.bfloat16)                          # [k_pad, CP]

    def vec_b(b):
        return jnp.pad(b, (0, CP - b.shape[0])).reshape(1, CP).astype(jnp.float32)

    # w4: PyTorch flatten order is (c, h, w); kernel activation order is
    # (h, w, c_padded) -> permute + pad so no runtime transpose is needed.
    w4 = raw["w4"].T.reshape(64, 4, 4, 64)          # (c, h, w, o)
    w4 = jnp.transpose(w4, (1, 2, 0, 3))            # (h, w, c, o)
    w4 = jnp.pad(w4, ((0, 0), (0, 0), (0, CP - 64), (0, CP - 64)))
    w4 = w4.reshape(16 * CP, CP).astype(jnp.bfloat16)

    w5 = jnp.pad(raw["w5"].T, ((0, CP - 64), (0, CP - 10))).astype(jnp.bfloat16)

    return {
        "w1": conv_w(raw["w1"], K1), "b1": vec_b(raw["b1"]),
        "w2": conv_w(raw["w2"], K23), "b2": vec_b(raw["b2"]),
        "w3": conv_w(raw["w3"], K23), "b3": vec_b(raw["b3"]),
        "w4": w4, "b4": vec_b(raw["b4"]),
        "w5": w5, "b5": vec_b(raw["b5"]),
    }


# ---------------------------------------------------------------------------
# Pure-XLA f32 reference (correctness check)
# ---------------------------------------------------------------------------
def ref_forward(x, raw):
    def conv(x, w, b):
        y = lax.conv_general_dilated(
            x, w, window_strides=(1, 1), padding=((2, 2), (2, 2)),
            dimension_numbers=("NCHW", "OIHW", "NCHW"),
            precision=lax.Precision.HIGHEST)
        return y + b.reshape(1, -1, 1, 1)

    def pool(x):
        return lax.reduce_window(x, -jnp.inf, lax.max,
                                 (1, 1, 2, 2), (1, 1, 2, 2), "VALID")

    y = pool(conv(x, raw["w1"], raw["b1"]))
    y = pool(conv(y, raw["w2"], raw["b2"]))
    y = pool(conv(y, raw["w3"], raw["b3"]))
    y = y.reshape(x.shape[0], -1)
    y = y @ raw["w4"].T + raw["b4"]
    y = y @ raw["w5"].T + raw["b5"]
    return y


if __name__ == "__main__":
    key = jax.random.PRNGKey(0)
    # CIFAR-10 style input: Flatten needs 64*4*4 = 1024, so spatial must be 32.
    x = jax.random.normal(key, (2, 3, 32, 32), jnp.float32)
    raw = init_params(jax.random.PRNGKey(42))
    params = prepare_params(raw)            # one-time, outside the forward path

    fwd = jax.jit(tudui_forward)
    out = jax.block_until_ready(fwd(x, params))
    assert out.shape == (2, 10), out.shape

    # Correctness vs. pure-XLA f32 reference (bf16 MXU operands -> loose tol).
    ref = jax.jit(ref_forward)(x, raw)
    err = float(jnp.max(jnp.abs(out - ref)))
    assert err < 0.2, f"max abs err {err}"

    print("KERNEL_OK")
</pallas_src>

<mosaic_0001>
module attributes {stable_mosaic.version = 11 : i64} {
  func.func @kernel(%arg0: i32, %arg1: memref<1024x128xbf16, #tpu.memory_space<vmem>>, %arg2: memref<128x128xbf16, #tpu.memory_space<vmem>>, %arg3: memref<1x128xf32, #tpu.memory_space<vmem>>, %arg4: memref<256x128xbf16, #tpu.memory_space<vmem>>, %arg5: memref<1024x128xf32, #tpu.memory_space<vmem>>, %arg6: memref<512x128xf32, #tpu.memory_space<vmem>>) attributes {dimension_semantics = [#tpu.dimension_semantics<parallel>], iteration_bounds = array<i64: 2>, scalar_prefetch = 0 : i64, scratch_operands = 2 : i64, tpu.core_type = #tpu.core_type<tc>, window_params = [{transform_indices = @transform_0, window_bounds = array<i64: 1024, 128>}, {pipeline_mode = #tpu.pipeline_mode<synchronous>, transform_indices = @transform_1, window_bounds = array<i64: 128, 128>}, {pipeline_mode = #tpu.pipeline_mode<synchronous>, transform_indices = @transform_2, window_bounds = array<i64: 1, 128>}, {transform_indices = @transform_3, window_bounds = array<i64: 256, 128>}]} {
    %c0 = arith.constant 0 : index
    %c0_0 = arith.constant 0 : index
    %0 = vector.load %arg1[%c0, %c0_0] : memref<1024x128xbf16, #tpu.memory_space<vmem>>, vector<1024x128xbf16>
    %c0_1 = arith.constant 0 : index
    %c0_2 = arith.constant 0 : index
    %1 = vector.load %arg2[%c0_1, %c0_2] : memref<128x128xbf16, #tpu.memory_space<vmem>>, vector<128x128xbf16>
    %cst = arith.constant dense<0.000000e+00> : vector<1024x128xf32>
    %2 = tpu.matmul %0, %1, %cst {dimension_numbers = #tpu.dot_dimension_numbers<[1], [0], [0], [1], [0, 0, 1, 1], [], []>} : vector<1024x128xbf16>, vector<128x128xbf16>, vector<1024x128xf32> -> vector<1024x128xf32>
    %c0_3 = arith.constant 0 : index
    %c0_4 = arith.constant 0 : index
    %3 = vector.load %arg5[%c0_3, %c0_4] : memref<1024x128xf32, #tpu.memory_space<vmem>>, vector<1024x128xf32>
    tpu.vector_store %arg5[%c0_3, %c0_4], %2 {strides = array<i32>} : memref<1024x128xf32, #tpu.memory_space<vmem>>, vector<1024x128xf32>,
    %c0_5 = arith.constant 0 : index
    %c0_6 = arith.constant 0 : index
    %4 = vector.load %arg3[%c0_5, %c0_6] : memref<1x128xf32, #tpu.memory_space<vmem>>, vector<1x128xf32>
    %c0_7 = arith.constant 0 : index
    %c0_8 = arith.constant 0 : index
    %5 = vector.load %arg5[%c0_7, %c0_8] : memref<1024x128xf32, #tpu.memory_space<vmem>>, vector<32x128xf32>
    %c32 = arith.constant 32 : index
    %c0_9 = arith.constant 0 : index
    %6 = vector.load %arg5[%c32, %c0_9] : memref<1024x128xf32, #tpu.memory_space<vmem>>, vector<32x128xf32>
    %7 = arith.maximumf %5, %6 : vector<32x128xf32>
    %c0_10 = arith.constant 0 : index
    %c0_11 = arith.constant 0 : index
    %8 = vector.load %arg6[%c0_10, %c0_11] : memref<512x128xf32, #tpu.memory_space<vmem>>, vector<32x128xf32>
    tpu.vector_store %arg6[%c0_10, %c0_11], %7 {strides = array<i32>} : memref<512x128xf32, #tpu.memory_space<vmem>>, vector<32x128xf32>,
    %c64 = arith.constant 64 : index
    %c0_12 = arith.constant 0 : index
    %9 = vector.load %arg5[%c64, %c0_12] : memref<1024x128xf32, #tpu.memory_space<vmem>>, vector<32x128xf32>
    %c96 = arith.constant 96 : index
    %c0_13 = arith.constant 0 : index
    %10 = vector.load %arg5[%c96, %c0_13] : memref<1024x128xf32, #tpu.memory_space<vmem>>, vector<32x128xf32>
    %11 = arith.maximumf %9, %10 : vector<32x128xf32>
    %c32_14 = arith.constant 32 : index
    %c0_15 = arith.constant 0 : index
    %12 = vector.load %arg6[%c32_14, %c0_15] : memref<512x128xf32, #tpu.memory_space<vmem>>, vector<32x128xf32>
    tpu.vector_store %arg6[%c32_14, %c0_15], %11 {strides = array<i32>} : memref<512x128xf32, #tpu.memory_space<vmem>>, vector<32x128xf32>,
    %c128 = arith.constant 128 : index
    %c0_16 = arith.constant 0 : index
    %13 = vector.load %arg5[%c128, %c0_16] : memref<1024x128xf32, #tpu.memory_space<vmem>>, vector<32x128xf32>
    %c160 = arith.constant 160 : index
    %c0_17 = arith.constant 0 : index
    %14 = vector.load %arg5[%c160, %c0_17] : memref<1024x128xf32, #tpu.memory_space<vmem>>, vector<32x128xf32>
    %15 = arith.maximumf %13, %14 : vector<32x128xf32>
    %c64_18 = arith.constant 64 : index
    %c0_19 = arith.constant 0 : index
    %16 = vector.load %arg6[%c64_18, %c0_19] : memref<512x128xf32, #tpu.memory_space<vmem>>, vector<32x128xf32>
    tpu.vector_store %arg6[%c64_18, %c0_19], %15 {strides = array<i32>} : memref<512x128xf32, #tpu.memory_space<vmem>>, vector<32x128xf32>,
    %c192 = arith.constant 192 : index
    %c0_20 = arith.constant 0 : index
    %17 = vector.load %arg5[%c192, %c0_20] : memref<1024x128xf32, #tpu.memory_space<vmem>>, vector<32x128xf32>
    %c224 = arith.constant 224 : index
    %c0_21 = arith.constant 0 : index
    %18 = vector.load %arg5[%c224, %c0_21] : memref<1024x128xf32, #tpu.memory_space<vmem>>, vector<32x128xf32>
    %19 = arith.maximumf %17, %18 : vector<32x128xf32>
    %c96_22 = arith.constant 96 : index
    %c0_23 = arith.constant 0 : index
    %20 = vector.load %arg6[%c96_22, %c0_23] : memref<512x128xf32, #tpu.memory_space<vmem>>, vector<32x128xf32>
    tpu.vector_store %arg6[%c96_22, %c0_23], %19 {strides = array<i32>} : memref<512x128xf32, #tpu.memory_space<vmem>>, vector<32x128xf32>,
    %c256 = arith.constant 256 : index
    %c0_24 = arith.constant 0 : index
    %21 = vector.load %arg5[%c256, %c0_24] : memref<1024x128xf32, #tpu.memory_space<vmem>>, vector<32x128xf32>
    %c288 = arith.constant 288 : index
    %c0_25 = arith.constant 0 : index
    %22 = vector.load %arg5[%c288, %c0_25] : memref<1024x128xf32, #tpu.memory_space<vmem>>, vector<32x128xf32>
    %23 = arith.maximumf %21, %22 : vector<32x128xf32>
    %c128_26 = arith.constant 128 : index
    %c0_27 = arith.constant 0 : index
    %24 = vector.load %arg6[%c128_26, %c0_27] : memref<512x128xf32, #tpu.memory_space<vmem>>, vector<32x128xf32>
    tpu.vector_store %arg6[%c128_26, %c0_27], %23 {strides = array<i32>} : memref<512x128xf32, #tpu.memory_space<vmem>>, vector<32x128xf32>,
    %c320 = arith.constant 320 : index
    %c0_28 = arith.constant 0 : index
    %25 = vector.load %arg5[%c320, %c0_28] : memref<1024x128xf32, #tpu.memory_space<vmem>>, vector<32x128xf32>
    %c352 = arith.constant 352 : index
    %c0_29 = arith.constant 0 : index
    %26 = vector.load %arg5[%c352, %c0_29] : memref<1024x128xf32, #tpu.memory_space<vmem>>, vector<32x128xf32>
    %27 = arith.maximumf %25, %26 : vector<32x128xf32>
    %c160_30 = arith.constant 160 : index
    %c0_31 = arith.constant 0 : index
    %28 = vector.load %arg6[%c160_30, %c0_31] : memref<512x128xf32, #tpu.memory_space<vmem>>, vector<32x128xf32>
    tpu.vector_store %arg6[%c160_30, %c0_31], %27 {strides = array<i32>} : memref<512x128xf32, #tpu.memory_space<vmem>>, vector<32x128xf32>,
    %c384 = arith.constant 384 : index
    %c0_32 = arith.constant 0 : index
    %29 = vector.load %arg5[%c384, %c0_32] : memref<1024x128xf32, #tpu.memory_space<vmem>>, vector<32x128xf32>
    %c416 = arith.constant 416 : index
    %c0_33 = arith.constant 0 : index
    %30 = vector.load %arg5[%c416, %c0_33] : memref<1024x128xf32, #tpu.memory_space<vmem>>, vector<32x128xf32>
    %31 = arith.maximumf %29, %30 : vector<32x128xf32>
    %c192_34 = arith.constant 192 : index
    %c0_35 = arith.constant 0 : index
    %32 = vector.load %arg6[%c192_34, %c0_35] : memref<512x128xf32, #tpu.memory_space<vmem>>, vector<32x128xf32>
    tpu.vector_store %arg6[%c192_34, %c0_35], %31 {strides = array<i32>} : memref<512x128xf32, #tpu.memory_space<vmem>>, vector<32x128xf32>,
    %c448 = arith.constant 448 : index
    %c0_36 = arith.constant 0 : index
    %33 = vector.load %arg5[%c448, %c0_36] : memref<1024x128xf32, #tpu.memory_space<vmem>>, vector<32x128xf32>
    %c480 = arith.constant 480 : index
    %c0_37 = arith.constant 0 : index
    %34 = vector.load %arg5[%c480, %c0_37] : memref<1024x128xf32, #tpu.memory_space<vmem>>, vector<32x128xf32>
    %35 = arith.maximumf %33, %34 : vector<32x128xf32>
    %c224_38 = arith.constant 224 : index
    %c0_39 = arith.constant 0 : index
    %36 = vector.load %arg6[%c224_38, %c0_39] : memref<512x128xf32, #tpu.memory_space<vmem>>, vector<32x128xf32>
    tpu.vector_store %arg6[%c224_38, %c0_39], %35 {strides = array<i32>} : memref<512x128xf32, #tpu.memory_space<vmem>>, vector<32x128xf32>,
    %c512 = arith.constant 512 : index
    %c0_40 = arith.constant 0 : index
    %37 = vector.load %arg5[%c512, %c0_40] : memref<1024x128xf32, #tpu.memory_space<vmem>>, vector<32x128xf32>
    %c544 = arith.constant 544 : index
    %c0_41 = arith.constant 0 : index
    %38 = vector.load %arg5[%c544, %c0_41] : memref<1024x128xf32, #tpu.memory_space<vmem>>, vector<32x128xf32>
    %39 = arith.maximumf %37, %38 : vector<32x128xf32>
    %c256_42 = arith.constant 256 : index
    %c0_43 = arith.constant 0 : index
    %40 = vector.load %arg6[%c256_42, %c0_43] : memref<512x128xf32, #tpu.memory_space<vmem>>, vector<32x128xf32>
    tpu.vector_store %arg6[%c256_42, %c0_43], %39 {strides = array<i32>} : memref<512x128xf32, #tpu.memory_space<vmem>>, vector<32x128xf32>,
    %c576 = arith.constant 576 : index
    %c0_44 = arith.constant 0 : index
    %41 = vector.load %arg5[%c576, %c0_44] : memref<1024x128xf32, #tpu.memory_space<vmem>>, vector<32x128xf32>
    %c608 = arith.constant 608 : index
    %c0_45 = arith.constant 0 : index
    %42 = vector.load %arg5[%c608, %c0_45] : memref<1024x128xf32, #tpu.memory_space<vmem>>, vector<32x128xf32>
    %43 = arith.maximumf %41, %42 : vector<32x128xf32>
    %c288_46 = arith.constant 288 : index
    %c0_47 = arith.constant 0 : index
    %44 = vector.load %arg6[%c288_46, %c0_47] : memref<512x128xf32, #tpu.memory_space<vmem>>, vector<32x128xf32>
    tpu.vector_store %arg6[%c288_46, %c0_47], %43 {strides = array<i32>} : memref<512x128xf32, #tpu.memory_space<vmem>>, vector<32x128xf32>,
    %c640 = arith.constant 640 : index
    %c0_48 = arith.constant 0 : index
    %45 = vector.load %arg5[%c640, %c0_48] : memref<1024x128xf32, #tpu.memory_space<vmem>>, vector<32x128xf32>
    %c672 = arith.constant 672 : index
    %c0_49 = arith.constant 0 : index
    %46 = vector.load %arg5[%c672, %c0_49] : memref<1024x128xf32, #tpu.memory_space<vmem>>, vector<32x128xf32>
    %47 = arith.maximumf %45, %46 : vector<32x128xf32>
    %c320_50 = arith.constant 320 : index
    %c0_51 = arith.constant 0 : index
    %48 = vector.load %arg6[%c320_50, %c0_51] : memref<512x128xf32, #tpu.memory_space<vmem>>, vector<32x128xf32>
    tpu.vector_store %arg6[%c320_50, %c0_51], %47 {strides = array<i32>} : memref<512x128xf32, #tpu.memory_space<vmem>>, vector<32x128xf32>,
    %c704 = arith.constant 704 : index
    %c0_52 = arith.constant 0 : index
    %49 = vector.load %arg5[%c704, %c0_52] : memref<1024x128xf32, #tpu.memory_space<vmem>>, vector<32x128xf32>
    %c736 = arith.constant 736 : index
    %c0_53 = arith.constant 0 : index
    %50 = vector.load %arg5[%c736, %c0_53] : memref<1024x128xf32, #tpu.memory_space<vmem>>, vector<32x128xf32>
    %51 = arith.maximumf %49, %50 : vector<32x128xf32>
    %c352_54 = arith.constant 352 : index
    %c0_55 = arith.constant 0 : index
    %52 = vector.load %arg6[%c352_54, %c0_55] : memref<512x128xf32, #tpu.memory_space<vmem>>, vector<32x128xf32>
    tpu.vector_store %arg6[%c352_54, %c0_55], %51 {strides = array<i32>} : memref<512x128xf32, #tpu.memory_space<vmem>>, vector<32x128xf32>,
    %c768 = arith.constant 768 : index
    %c0_56 = arith.constant 0 : index
    %53 = vector.load %arg5[%c768, %c0_56] : memref<1024x128xf32, #tpu.memory_space<vmem>>, vector<32x128xf32>
    %c800 = arith.constant 800 : index
    %c0_57 = arith.constant 0 : index
    %54 = vector.load %arg5[%c800, %c0_57] : memref<1024x128xf32, #tpu.memory_space<vmem>>, vector<32x128xf32>
    %55 = arith.maximumf %53, %54 : vector<32x128xf32>
    %c384_58 = arith.constant 384 : index
    %c0_59 = arith.constant 0 : index
    %56 = vector.load %arg6[%c384_58, %c0_59] : memref<512x128xf32, #tpu.memory_space<vmem>>, vector<32x128xf32>
    tpu.vector_store %arg6[%c384_58, %c0_59], %55 {strides = array<i32>} : memref<512x128xf32, #tpu.memory_space<vmem>>, vector<32x128xf32>,
    %c832 = arith.constant 832 : index
    %c0_60 = arith.constant 0 : index
    %57 = vector.load %arg5[%c832, %c0_60] : memref<1024x128xf32, #tpu.memory_space<vmem>>, vector<32x128xf32>
    %c864 = arith.constant 864 : index
    %c0_61 = arith.constant 0 : index
    %58 = vector.load %arg5[%c864, %c0_61] : memref<1024x128xf32, #tpu.memory_space<vmem>>, vector<32x128xf32>
    %59 = arith.maximumf %57, %58 : vector<32x128xf32>
    %c416_62 = arith.constant 416 : index
    %c0_63 = arith.constant 0 : index
    %60 = vector.load %arg6[%c416_62, %c0_63] : memref<512x128xf32, #tpu.memory_space<vmem>>, vector<32x128xf32>
    tpu.vector_store %arg6[%c416_62, %c0_63], %59 {strides = array<i32>} : memref<512x128xf32, #tpu.memory_space<vmem>>, vector<32x128xf32>,
    %c896 = arith.constant 896 : index
    %c0_64 = arith.constant 0 : index
    %61 = vector.load %arg5[%c896, %c0_64] : memref<1024x128xf32, #tpu.memory_space<vmem>>, vector<32x128xf32>
    %c928 = arith.constant 928 : index
    %c0_65 = arith.constant 0 : index
    %62 = vector.load %arg5[%c928, %c0_65] : memref<1024x128xf32, #tpu.memory_space<vmem>>, vector<32x128xf32>
    %63 = arith.maximumf %61, %62 : vector<32x128xf32>
    %c448_66 = arith.constant 448 : index
    %c0_67 = arith.constant 0 : index
    %64 = vector.load %arg6[%c448_66, %c0_67] : memref<512x128xf32, #tpu.memory_space<vmem>>, vector<32x128xf32>
    tpu.vector_store %arg6[%c448_66, %c0_67], %63 {strides = array<i32>} : memref<512x128xf32, #tpu.memory_space<vmem>>, vector<32x128xf32>,
    %c960 = arith.constant 960 : index
    %c0_68 = arith.constant 0 : index
    %65 = vector.load %arg5[%c960, %c0_68] : memref<1024x128xf32, #tpu.memory_space<vmem>>, vector<32x128xf32>
    %c992 = arith.constant 992 : index
    %c0_69 = arith.constant 0 : index
    %66 = vector.load %arg5[%c992, %c0_69] : memref<1024x128xf32, #tpu.memory_space<vmem>>, vector<32x128xf32>
    %67 = arith.maximumf %65, %66 : vector<32x128xf32>
    %c480_70 = arith.constant 480 : index
    %c0_71 = arith.constant 0 : index
    %68 = vector.load %arg6[%c480_70, %c0_71] : memref<512x128xf32, #tpu.memory_space<vmem>>, vector<32x128xf32>
    tpu.vector_store %arg6[%c480_70, %c0_71], %67 {strides = array<i32>} : memref<512x128xf32, #tpu.memory_space<vmem>>, vector<32x128xf32>,
    %c0_72 = arith.constant 0 : index
    %c0_73 = arith.constant 0 : index
    %69 = tpu.strided_load %arg6[%c0_72, %c0_73] {strides = array<i32: 2, 1>} : memref<512x128xf32, #tpu.memory_space<vmem>>, vector<256x128xf32>
    %c1 = arith.constant 1 : index
    %c0_74 = arith.constant 0 : index
    %70 = tpu.strided_load %arg6[%c1, %c0_74] {strides = array<i32: 2, 1>} : memref<512x128xf32, #tpu.memory_space<vmem>>, vector<256x128xf32>
    %71 = arith.maximumf %69, %70 : vector<256x128xf32>
    %72 = vector.broadcast %4 : vector<1x128xf32> to vector<256x128xf32>
    %73 = arith.addf %71, %72 : vector<256x128xf32>
    %74 = arith.truncf %73 : vector<256x128xf32> to vector<256x128xbf16>
    %c0_75 = arith.constant 0 : index
    %c0_76 = arith.constant 0 : index
    %75 = vector.load %arg4[%c0_75, %c0_76] : memref<256x128xbf16, #tpu.memory_space<vmem>>, vector<256x128xbf16>
    tpu.vector_store %arg4[%c0_75, %c0_76], %74 {strides = array<i32>} : memref<256x128xbf16, #tpu.memory_space<vmem>>, vector<256x128xbf16>,
    return
  }
  func.func @transform_0(%arg0: i32) -> (i32, i32) {
    %c0_i32 = arith.constant 0 : i32
    %c0_i32_0 = arith.constant 0 : i32
    return %arg0, %c0_i32 : i32, i32
  }
  func.func @transform_1(%arg0: i32) -> (i32, i32) {
    %c0_i32 = arith.constant 0 : i32
    %c0_i32_0 = arith.constant 0 : i32
    %c0_i32_1 = arith.constant 0 : i32
    return %c0_i32, %c0_i32_0 : i32, i32
  }
  func.func @transform_2(%arg0: i32) -> (i32, i32) {
    %c0_i32 = arith.constant 0 : i32
    %c0_i32_0 = arith.constant 0 : i32
    %c0_i32_1 = arith.constant 0 : i32
    return %c0_i32, %c0_i32_0 : i32, i32
  }
  func.func @transform_3(%arg0: i32) -> (i32, i32) {
    %c0_i32 = arith.constant 0 : i32
    %c0_i32_0 = arith.constant 0 : i32
    return %arg0, %c0_i32 : i32, i32
  }
}

module attributes {stable_mosaic.version = 11 : i64} {
  func.func @kernel(%arg0: i32, %arg1: memref<256x896xbf16, #tpu.memory_space<vmem>>, %arg2: memref<896x128xbf16, #tpu.memory_space<vmem>>, %arg3: memref<1x128xf32, #tpu.memory_space<vmem>>, %arg4: memref<64x128xbf16, #tpu.memory_space<vmem>>, %arg5: memref<256x128xf32, #tpu.memory_space<vmem>>, %arg6: memref<128x128xf32, #tpu.memory_space<vmem>>) attributes {dimension_semantics = [#tpu.dimension_semantics<parallel>], iteration_bounds = array<i64: 2>, scalar_prefetch = 0 : i64, scratch_operands = 2 : i64, tpu.core_type = #tpu.core_type<tc>, window_params = [{transform_indices = @transform_0, window_bounds = array<i64: 256, 896>}, {pipeline_mode = #tpu.pipeline_mode<synchronous>, transform_indices = @transform_1, window_bounds = array<i64: 896, 128>}, {pipeline_mode = #tpu.pipeline_mode<synchronous>, transform_indices = @transform_2, window_bounds = array<i64: 1, 128>}, {transform_indices = @transform_3, window_bounds = array<i64: 64, 128>}]} {
    %c0 = arith.constant 0 : index
    %c0_0 = arith.constant 0 : index
    %0 = vector.load %arg1[%c0, %c0_0] : memref<256x896xbf16, #tpu.memory_space<vmem>>, vector<256x896xbf16>
    %c0_1 = arith.constant 0 : index
    %c0_2 = arith.constant 0 : index
    %1 = vector.load %arg2[%c0_1, %c0_2] : memref<896x128xbf16, #tpu.memory_space<vmem>>, vector<896x128xbf16>
    %cst = arith.constant dense<0.000000e+00> : vector<256x128xf32>
    %2 = tpu.matmul %0, %1, %cst {dimension_numbers = #tpu.dot_dimension_numbers<[1], [0], [0], [1], [0, 0, 1, 1], [], []>} : vector<256x896xbf16>, vector<896x128xbf16>, vector<256x128xf32> -> vector<256x128xf32>
    %c0_3 = arith.constant 0 : index
    %c0_4 = arith.constant 0 : index
    %3 = vector.load %arg5[%c0_3, %c0_4] : memref<256x128xf32, #tpu.memory_space<vmem>>, vector<256x128xf32>
    tpu.vector_store %arg5[%c0_3, %c0_4], %2 {strides = array<i32>} : memref<256x128xf32, #tpu.memory_space<vmem>>, vector<256x128xf32>,
    %c0_5 = arith.constant 0 : index
    %c0_6 = arith.constant 0 : index
    %4 = vector.load %arg3[%c0_5, %c0_6] : memref<1x128xf32, #tpu.memory_space<vmem>>, vector<1x128xf32>
    %c0_7 = arith.constant 0 : index
    %c0_8 = arith.constant 0 : index
    %5 = vector.load %arg5[%c0_7, %c0_8] : memref<256x128xf32, #tpu.memory_space<vmem>>, vector<16x128xf32>
    %c16 = arith.constant 16 : index
    %c0_9 = arith.constant 0 : index
    %6 = vector.load %arg5[%c16, %c0_9] : memref<256x128xf32, #tpu.memory_space<vmem>>, vector<16x128xf32>
    %7 = arith.maximumf %5, %6 : vector<16x128xf32>
    %c0_10 = arith.constant 0 : index
    %c0_11 = arith.constant 0 : index
    %8 = vector.load %arg6[%c0_10, %c0_11] : memref<128x128xf32, #tpu.memory_space<vmem>>, vector<16x128xf32>
    tpu.vector_store %arg6[%c0_10, %c0_11], %7 {strides = array<i32>} : memref<128x128xf32, #tpu.memory_space<vmem>>, vector<16x128xf32>,
    %c32 = arith.constant 32 : index
    %c0_12 = arith.constant 0 : index
    %9 = vector.load %arg5[%c32, %c0_12] : memref<256x128xf32, #tpu.memory_space<vmem>>, vector<16x128xf32>
    %c48 = arith.constant 48 : index
    %c0_13 = arith.constant 0 : index
    %10 = vector.load %arg5[%c48, %c0_13] : memref<256x128xf32, #tpu.memory_space<vmem>>, vector<16x128xf32>
    %11 = arith.maximumf %9, %10 : vector<16x128xf32>
    %c16_14 = arith.constant 16 : index
    %c0_15 = arith.constant 0 : index
    %12 = vector.load %arg6[%c16_14, %c0_15] : memref<128x128xf32, #tpu.memory_space<vmem>>, vector<16x128xf32>
    tpu.vector_store %arg6[%c16_14, %c0_15], %11 {strides = array<i32>} : memref<128x128xf32, #tpu.memory_space<vmem>>, vector<16x128xf32>,
    %c64 = arith.constant 64 : index
    %c0_16 = arith.constant 0 : index
    %13 = vector.load %arg5[%c64, %c0_16] : memref<256x128xf32, #tpu.memory_space<vmem>>, vector<16x128xf32>
    %c80 = arith.constant 80 : index
    %c0_17 = arith.constant 0 : index
    %14 = vector.load %arg5[%c80, %c0_17] : memref<256x128xf32, #tpu.memory_space<vmem>>, vector<16x128xf32>
    %15 = arith.maximumf %13, %14 : vector<16x128xf32>
    %c32_18 = arith.constant 32 : index
    %c0_19 = arith.constant 0 : index
    %16 = vector.load %arg6[%c32_18, %c0_19] : memref<128x128xf32, #tpu.memory_space<vmem>>, vector<16x128xf32>
    tpu.vector_store %arg6[%c32_18, %c0_19], %15 {strides = array<i32>} : memref<128x128xf32, #tpu.memory_space<vmem>>, vector<16x128xf32>,
    %c96 = arith.constant 96 : index
    %c0_20 = arith.constant 0 : index
    %17 = vector.load %arg5[%c96, %c0_20] : memref<256x128xf32, #tpu.memory_space<vmem>>, vector<16x128xf32>
    %c112 = arith.constant 112 : index
    %c0_21 = arith.constant 0 : index
    %18 = vector.load %arg5[%c112, %c0_21] : memref<256x128xf32, #tpu.memory_space<vmem>>, vector<16x128xf32>
    %19 = arith.maximumf %17, %18 : vector<16x128xf32>
    %c48_22 = arith.constant 48 : index
    %c0_23 = arith.constant 0 : index
    %20 = vector.load %arg6[%c48_22, %c0_23] : memref<128x128xf32, #tpu.memory_space<vmem>>, vector<16x128xf32>
    tpu.vector_store %arg6[%c48_22, %c0_23], %19 {strides = array<i32>} : memref<128x128xf32, #tpu.memory_space<vmem>>, vector<16x128xf32>,
    %c128 = arith.constant 128 : index
    %c0_24 = arith.constant 0 : index
    %21 = vector.load %arg5[%c128, %c0_24] : memref<256x128xf32, #tpu.memory_space<vmem>>, vector<16x128xf32>
    %c144 = arith.constant 144 : index
    %c0_25 = arith.constant 0 : index
    %22 = vector.load %arg5[%c144, %c0_25] : memref<256x128xf32, #tpu.memory_space<vmem>>, vector<16x128xf32>
    %23 = arith.maximumf %21, %22 : vector<16x128xf32>
    %c64_26 = arith.constant 64 : index
    %c0_27 = arith.constant 0 : index
    %24 = vector.load %arg6[%c64_26, %c0_27] : memref<128x128xf32, #tpu.memory_space<vmem>>, vector<16x128xf32>
    tpu.vector_store %arg6[%c64_26, %c0_27], %23 {strides = array<i32>} : memref<128x128xf32, #tpu.memory_space<vmem>>, vector<16x128xf32>,
    %c160 = arith.constant 160 : index
    %c0_28 = arith.constant 0 : index
    %25 = vector.load %arg5[%c160, %c0_28] : memref<256x128xf32, #tpu.memory_space<vmem>>, vector<16x128xf32>
    %c176 = arith.constant 176 : index
    %c0_29 = arith.constant 0 : index
    %26 = vector.load %arg5[%c176, %c0_29] : memref<256x128xf32, #tpu.memory_space<vmem>>, vector<16x128xf32>
    %27 = arith.maximumf %25, %26 : vector<16x128xf32>
    %c80_30 = arith.constant 80 : index
    %c0_31 = arith.constant 0 : index
    %28 = vector.load %arg6[%c80_30, %c0_31] : memref<128x128xf32, #tpu.memory_space<vmem>>, vector<16x128xf32>
    tpu.vector_store %arg6[%c80_30, %c0_31], %27 {strides = array<i32>} : memref<128x128xf32, #tpu.memory_space<vmem>>, vector<16x128xf32>,
    %c192 = arith.constant 192 : index
    %c0_32 = arith.constant 0 : index
    %29 = vector.load %arg5[%c192, %c0_32] : memref<256x128xf32, #tpu.memory_space<vmem>>, vector<16x128xf32>
    %c208 = arith.constant 208 : index
    %c0_33 = arith.constant 0 : index
    %30 = vector.load %arg5[%c208, %c0_33] : memref<256x128xf32, #tpu.memory_space<vmem>>, vector<16x128xf32>
    %31 = arith.maximumf %29, %30 : vector<16x128xf32>
    %c96_34 = arith.constant 96 : index
    %c0_35 = arith.constant 0 : index
    %32 = vector.load %arg6[%c96_34, %c0_35] : memref<128x128xf32, #tpu.memory_space<vmem>>, vector<16x128xf32>
    tpu.vector_store %arg6[%c96_34, %c0_35], %31 {strides = array<i32>} : memref<128x128xf32, #tpu.memory_space<vmem>>, vector<16x128xf32>,
    %c224 = arith.constant 224 : index
    %c0_36 = arith.constant 0 : index
    %33 = vector.load %arg5[%c224, %c0_36] : memref<256x128xf32, #tpu.memory_space<vmem>>, vector<16x128xf32>
    %c240 = arith.constant 240 : index
    %c0_37 = arith.constant 0 : index
    %34 = vector.load %arg5[%c240, %c0_37] : memref<256x128xf32, #tpu.memory_space<vmem>>, vector<16x128xf32>
    %35 = arith.maximumf %33, %34 : vector<16x128xf32>
    %c112_38 = arith.constant 112 : index
    %c0_39 = arith.constant 0 : index
    %36 = vector.load %arg6[%c112_38, %c0_39] : memref<128x128xf32, #tpu.memory_space<vmem>>, vector<16x128xf32>
    tpu.vector_store %arg6[%c112_38, %c0_39], %35 {strides = array<i32>} : memref<128x128xf32, #tpu.memory_space<vmem>>, vector<16x128xf32>,
    %c0_40 = arith.constant 0 : index
    %c0_41 = arith.constant 0 : index
    %37 = tpu.strided_load %arg6[%c0_40, %c0_41] {strides = array<i32: 2, 1>} : memref<128x128xf32, #tpu.memory_space<vmem>>, vector<64x128xf32>
    %c1 = arith.constant 1 : index
    %c0_42 = arith.constant 0 : index
    %38 = tpu.strided_load %arg6[%c1, %c0_42] {strides = array<i32: 2, 1>} : memref<128x128xf32, #tpu.memory_space<vmem>>, vector<64x128xf32>
    %39 = arith.maximumf %37, %38 : vector<64x128xf32>
    %40 = vector.broadcast %4 : vector<1x128xf32> to vector<64x128xf32>
    %41 = arith.addf %39, %40 : vector<64x128xf32>
    %42 = arith.truncf %41 : vector<64x128xf32> to vector<64x128xbf16>
    %c0_43 = arith.constant 0 : index
    %c0_44 = arith.constant 0 : index
    %43 = vector.load %arg4[%c0_43, %c0_44] : memref<64x128xbf16, #tpu.memory_space<vmem>>, vector<64x128xbf16>
    tpu.vector_store %arg4[%c0_43, %c0_44], %42 {strides = array<i32>} : memref<64x128xbf16, #tpu.memory_space<vmem>>, vector<64x128xbf16>,
    return
  }
  func.func @transform_0(%arg0: i32) -> (i32, i32) {
    %c0_i32 = arith.constant 0 : i32
    %c0_i32_0 = arith.constant 0 : i32
    return %arg0, %c0_i32 : i32, i32
  }
  func.func @transform_1(%arg0: i32) -> (i32, i32) {
    %c0_i32 = arith.constant 0 : i32
    %c0_i32_0 = arith.constant 0 : i32
    %c0_i32_1 = arith.constant 0 : i32
    return %c0_i32, %c0_i32_0 : i32, i32
  }
  func.func @transform_2(%arg0: i32) -> (i32, i32) {
    %c0_i32 = arith.constant 0 : i32
    %c0_i32_0 = arith.constant 0 : i32
    %c0_i32_1 = arith.constant 0 : i32
    return %c0_i32, %c0_i32_0 : i32, i32
  }
  func.func @transform_3(%arg0: i32) -> (i32, i32) {
    %c0_i32 = arith.constant 0 : i32
    %c0_i32_0 = arith.constant 0 : i32
    return %arg0, %c0_i32 : i32, i32
  }
}

module attributes {stable_mosaic.version = 11 : i64} {
  func.func @kernel(%arg0: i32, %arg1: memref<64x896xbf16, #tpu.memory_space<vmem>>, %arg2: memref<896x128xbf16, #tpu.memory_space<vmem>>, %arg3: memref<1x128xf32, #tpu.memory_space<vmem>>, %arg4: memref<16x128xbf16, #tpu.memory_space<vmem>>, %arg5: memref<64x128xf32, #tpu.memory_space<vmem>>, %arg6: memref<32x128xf32, #tpu.memory_space<vmem>>) attributes {dimension_semantics = [#tpu.dimension_semantics<parallel>], iteration_bounds = array<i64: 2>, scalar_prefetch = 0 : i64, scratch_operands = 2 : i64, tpu.core_type = #tpu.core_type<tc>, window_params = [{transform_indices = @transform_0, window_bounds = array<i64: 64, 896>}, {pipeline_mode = #tpu.pipeline_mode<synchronous>, transform_indices = @transform_1, window_bounds = array<i64: 896, 128>}, {pipeline_mode = #tpu.pipeline_mode<synchronous>, transform_indices = @transform_2, window_bounds = array<i64: 1, 128>}, {transform_indices = @transform_3, window_bounds = array<i64: 16, 128>}]} {
    %c0 = arith.constant 0 : index
    %c0_0 = arith.constant 0 : index
    %0 = vector.load %arg1[%c0, %c0_0] : memref<64x896xbf16, #tpu.memory_space<vmem>>, vector<64x896xbf16>
    %c0_1 = arith.constant 0 : index
    %c0_2 = arith.constant 0 : index
    %1 = vector.load %arg2[%c0_1, %c0_2] : memref<896x128xbf16, #tpu.memory_space<vmem>>, vector<896x128xbf16>
    %cst = arith.constant dense<0.000000e+00> : vector<64x128xf32>
    %2 = tpu.matmul %0, %1, %cst {dimension_numbers = #tpu.dot_dimension_numbers<[1], [0], [0], [1], [0, 0, 1, 1], [], []>} : vector<64x896xbf16>, vector<896x128xbf16>, vector<64x128xf32> -> vector<64x128xf32>
    %c0_3 = arith.constant 0 : index
    %c0_4 = arith.constant 0 : index
    %3 = vector.load %arg5[%c0_3, %c0_4] : memref<64x128xf32, #tpu.memory_space<vmem>>, vector<64x128xf32>
    tpu.vector_store %arg5[%c0_3, %c0_4], %2 {strides = array<i32>} : memref<64x128xf32, #tpu.memory_space<vmem>>, vector<64x128xf32>,
    %c0_5 = arith.constant 0 : index
    %c0_6 = arith.constant 0 : index
    %4 = vector.load %arg3[%c0_5, %c0_6] : memref<1x128xf32, #tpu.memory_space<vmem>>, vector<1x128xf32>
    %c0_7 = arith.constant 0 : index
    %c0_8 = arith.constant 0 : index
    %5 = vector.load %arg5[%c0_7, %c0_8] : memref<64x128xf32, #tpu.memory_space<vmem>>, vector<8x128xf32>
    %c8 = arith.constant 8 : index
    %c0_9 = arith.constant 0 : index
    %6 = vector.load %arg5[%c8, %c0_9] : memref<64x128xf32, #tpu.memory_space<vmem>>, vector<8x128xf32>
    %7 = arith.maximumf %5, %6 : vector<8x128xf32>
    %c0_10 = arith.constant 0 : index
    %c0_11 = arith.constant 0 : index
    %8 = vector.load %arg6[%c0_10, %c0_11] : memref<32x128xf32, #tpu.memory_space<vmem>>, vector<8x128xf32>
    tpu.vector_store %arg6[%c0_10, %c0_11], %7 {strides = array<i32>} : memref<32x128xf32, #tpu.memory_space<vmem>>, vector<8x128xf32>,
    %c16 = arith.constant 16 : index
    %c0_12 = arith.constant 0 : index
    %9 = vector.load %arg5[%c16, %c0_12] : memref<64x128xf32, #tpu.memory_space<vmem>>, vector<8x128xf32>
    %c24 = arith.constant 24 : index
    %c0_13 = arith.constant 0 : index
    %10 = vector.load %arg5[%c24, %c0_13] : memref<64x128xf32, #tpu.memory_space<vmem>>, vector<8x128xf32>
    %11 = arith.maximumf %9, %10 : vector<8x128xf32>
    %c8_14 = arith.constant 8 : index
    %c0_15 = arith.constant 0 : index
    %12 = vector.load %arg6[%c8_14, %c0_15] : memref<32x128xf32, #tpu.memory_space<vmem>>, vector<8x128xf32>
    tpu.vector_store %arg6[%c8_14, %c0_15], %11 {strides = array<i32>} : memref<32x128xf32, #tpu.memory_space<vmem>>, vector<8x128xf32>,
    %c32 = arith.constant 32 : index
    %c0_16 = arith.constant 0 : index
    %13 = vector.load %arg5[%c32, %c0_16] : memref<64x128xf32, #tpu.memory_space<vmem>>, vector<8x128xf32>
    %c40 = arith.constant 40 : index
    %c0_17 = arith.constant 0 : index
    %14 = vector.load %arg5[%c40, %c0_17] : memref<64x128xf32, #tpu.memory_space<vmem>>, vector<8x128xf32>
    %15 = arith.maximumf %13, %14 : vector<8x128xf32>
    %c16_18 = arith.constant 16 : index
    %c0_19 = arith.constant 0 : index
    %16 = vector.load %arg6[%c16_18, %c0_19] : memref<32x128xf32, #tpu.memory_space<vmem>>, vector<8x128xf32>
    tpu.vector_store %arg6[%c16_18, %c0_19], %15 {strides = array<i32>} : memref<32x128xf32, #tpu.memory_space<vmem>>, vector<8x128xf32>,
    %c48 = arith.constant 48 : index
    %c0_20 = arith.constant 0 : index
    %17 = vector.load %arg5[%c48, %c0_20] : memref<64x128xf32, #tpu.memory_space<vmem>>, vector<8x128xf32>
    %c56 = arith.constant 56 : index
    %c0_21 = arith.constant 0 : index
    %18 = vector.load %arg5[%c56, %c0_21] : memref<64x128xf32, #tpu.memory_space<vmem>>, vector<8x128xf32>
    %19 = arith.maximumf %17, %18 : vector<8x128xf32>
    %c24_22 = arith.constant 24 : index
    %c0_23 = arith.constant 0 : index
    %20 = vector.load %arg6[%c24_22, %c0_23] : memref<32x128xf32, #tpu.memory_space<vmem>>, vector<8x128xf32>
    tpu.vector_store %arg6[%c24_22, %c0_23], %19 {strides = array<i32>} : memref<32x128xf32, #tpu.memory_space<vmem>>, vector<8x128xf32>,
    %c0_24 = arith.constant 0 : index
    %c0_25 = arith.constant 0 : index
    %21 = tpu.strided_load %arg6[%c0_24, %c0_25] {strides = array<i32: 2, 1>} : memref<32x128xf32, #tpu.memory_space<vmem>>, vector<16x128xf32>
    %c1 = arith.constant 1 : index
    %c0_26 = arith.constant 0 : index
    %22 = tpu.strided_load %arg6[%c1, %c0_26] {strides = array<i32: 2, 1>} : memref<32x128xf32, #tpu.memory_space<vmem>>, vector<16x128xf32>
    %23 = arith.maximumf %21, %22 : vector<16x128xf32>
    %24 = vector.broadcast %4 : vector<1x128xf32> to vector<16x128xf32>
    %25 = arith.addf %23, %24 : vector<16x128xf32>
    %26 = arith.truncf %25 : vector<16x128xf32> to vector<16x128xbf16>
    %c0_27 = arith.constant 0 : index
    %c0_28 = arith.constant 0 : index
    %27 = vector.load %arg4[%c0_27, %c0_28] : memref<16x128xbf16, #tpu.memory_space<vmem>>, vector<16x128xbf16>
    tpu.vector_store %arg4[%c0_27, %c0_28], %26 {strides = array<i32>} : memref<16x128xbf16, #tpu.memory_space<vmem>>, vector<16x128xbf16>,
    return
  }
  func.func @transform_0(%arg0: i32) -> (i32, i32) {
    %c0_i32 = arith.constant 0 : i32
    %c0_i32_0 = arith.constant 0 : i32
    return %arg0, %c0_i32 : i32, i32
  }
  func.func @transform_1(%arg0: i32) -> (i32, i32) {
    %c0_i32 = arith.constant 0 : i32
    %c0_i32_0 = arith.constant 0 : i32
    %c0_i32_1 = arith.constant 0 : i32
    return %c0_i32, %c0_i32_0 : i32, i32
  }
  func.func @transform_2(%arg0: i32) -> (i32, i32) {
    %c0_i32 = arith.constant 0 : i32
    %c0_i32_0 = arith.constant 0 : i32
    %c0_i32_1 = arith.constant 0 : i32
    return %c0_i32, %c0_i32_0 : i32, i32
  }
  func.func @transform_3(%arg0: i32) -> (i32, i32) {
    %c0_i32 = arith.constant 0 : i32
    %c0_i32_0 = arith.constant 0 : i32
    return %arg0, %c0_i32 : i32, i32
  }
}

module attributes {stable_mosaic.version = 11 : i64} {
  func.func @_mlp_kernel(%arg0: i32, %arg1: memref<2x2048xbf16, #tpu.memory_space<vmem>>, %arg2: memref<2048x128xbf16, #tpu.memory_space<vmem>>, %arg3: memref<1x128xf32, #tpu.memory_space<vmem>>, %arg4: memref<128x128xbf16, #tpu.memory_space<vmem>>, %arg5: memref<1x128xf32, #tpu.memory_space<vmem>>, %arg6: memref<2x128xf32, #tpu.memory_space<vmem>>) attributes {dimension_semantics = [#tpu.dimension_semantics<parallel>], iteration_bounds = array<i64: 1>, scalar_prefetch = 0 : i64, scratch_operands = 0 : i64, tpu.core_type = #tpu.core_type<tc>, window_params = [{transform_indices = @transform_0, window_bounds = array<i64: 2, 2048>}, {pipeline_mode = #tpu.pipeline_mode<synchronous>, transform_indices = @transform_1, window_bounds = array<i64: 2048, 128>}, {pipeline_mode = #tpu.pipeline_mode<synchronous>, transform_indices = @transform_2, window_bounds = array<i64: 1, 128>}, {pipeline_mode = #tpu.pipeline_mode<synchronous>, transform_indices = @transform_3, window_bounds = array<i64: 128, 128>}, {pipeline_mode = #tpu.pipeline_mode<synchronous>, transform_indices = @transform_4, window_bounds = array<i64: 1, 128>}, {transform_indices = @transform_5, window_bounds = array<i64: 2, 128>}]} {
    %c0 = arith.constant 0 : index
    %c0_0 = arith.constant 0 : index
    %0 = vector.load %arg1[%c0, %c0_0] : memref<2x2048xbf16, #tpu.memory_space<vmem>>, vector<2x2048xbf16>
    %c0_1 = arith.constant 0 : index
    %c0_2 = arith.constant 0 : index
    %1 = vector.load %arg2[%c0_1, %c0_2] : memref<2048x128xbf16, #tpu.memory_space<vmem>>, vector<2048x128xbf16>
    %cst = arith.constant dense<0.000000e+00> : vector<2x128xf32>
    %2 = tpu.matmul %0, %1, %cst {dimension_numbers = #tpu.dot_dimension_numbers<[1], [0], [0], [1], [0, 0, 1, 1], [], []>} : vector<2x2048xbf16>, vector<2048x128xbf16>, vector<2x128xf32> -> vector<2x128xf32>
    %c0_3 = arith.constant 0 : index
    %c0_4 = arith.constant 0 : index
    %3 = vector.load %arg3[%c0_3, %c0_4] : memref<1x128xf32, #tpu.memory_space<vmem>>, vector<1x128xf32>
    %4 = vector.broadcast %3 : vector<1x128xf32> to vector<2x128xf32>
    %5 = arith.addf %2, %4 : vector<2x128xf32>
    %6 = arith.truncf %5 : vector<2x128xf32> to vector<2x128xbf16>
    %c0_5 = arith.constant 0 : index
    %c0_6 = arith.constant 0 : index
    %7 = vector.load %arg4[%c0_5, %c0_6] : memref<128x128xbf16, #tpu.memory_space<vmem>>, vector<128x128xbf16>
    %cst_7 = arith.constant dense<0.000000e+00> : vector<2x128xf32>
    %8 = tpu.matmul %6, %7, %cst_7 {dimension_numbers = #tpu.dot_dimension_numbers<[1], [0], [0], [1], [0, 0, 1, 1], [], []>} : vector<2x128xbf16>, vector<128x128xbf16>, vector<2x128xf32> -> vector<2x128xf32>
    %c0_8 = arith.constant 0 : index
    %c0_9 = arith.constant 0 : index
    %9 = vector.load %arg5[%c0_8, %c0_9] : memref<1x128xf32, #tpu.memory_space<vmem>>, vector<1x128xf32>
    %10 = vector.broadcast %9 : vector<1x128xf32> to vector<2x128xf32>
    %11 = arith.addf %8, %10 : vector<2x128xf32>
    %c0_10 = arith.constant 0 : index
    %c0_11 = arith.constant 0 : index
    %12 = vector.load %arg6[%c0_10, %c0_11] : memref<2x128xf32, #tpu.memory_space<vmem>>, vector<2x128xf32>
    tpu.vector_store %arg6[%c0_10, %c0_11], %11 {strides = array<i32>} : memref<2x128xf32, #tpu.memory_space<vmem>>, vector<2x128xf32>,
    return
  }
  func.func @transform_0(%arg0: i32) -> (i32, i32) {
    %c0_i32 = arith.constant 0 : i32
    %c0_i32_0 = arith.constant 0 : i32
    return %arg0, %c0_i32 : i32, i32
  }
  func.func @transform_1(%arg0: i32) -> (i32, i32) {
    %c0_i32 = arith.constant 0 : i32
    %c0_i32_0 = arith.constant 0 : i32
    %c0_i32_1 = arith.constant 0 : i32
    return %c0_i32, %c0_i32_0 : i32, i32
  }
  func.func @transform_2(%arg0: i32) -> (i32, i32) {
    %c0_i32 = arith.constant 0 : i32
    %c0_i32_0 = arith.constant 0 : i32
    %c0_i32_1 = arith.constant 0 : i32
    return %c0_i32, %c0_i32_0 : i32, i32
  }
  func.func @transform_3(%arg0: i32) -> (i32, i32) {
    %c0_i32 = arith.constant 0 : i32
    %c0_i32_0 = arith.constant 0 : i32
    %c0_i32_1 = arith.constant 0 : i32
    return %c0_i32, %c0_i32_0 : i32, i32
  }
  func.func @transform_4(%arg0: i32) -> (i32, i32) {
    %c0_i32 = arith.constant 0 : i32
    %c0_i32_0 = arith.constant 0 : i32
    %c0_i32_1 = arith.constant 0 : i32
    return %c0_i32, %c0_i32_0 : i32, i32
  }
  func.func @transform_5(%arg0: i32) -> (i32, i32) {
    %c0_i32 = arith.constant 0 : i32
    %c0_i32_0 = arith.constant 0 : i32
    return %arg0, %c0_i32 : i32, i32
  }
}

</mosaic_0001>

<bundles_post_ra>
// kernel: tudui_forward.4
= control target key start
LH: loop header
LB: loop body
LE: loop exit
PB: predicated region body
PF: predicated region fallthrough
CT: control target
= control target key end

     0   :  { %s2677_s12 = smov 0   ;;  %s2843_s0 = inlined_call_operand.vmem [shape: bf16[2048,128], index: 0, kind: input, shape index: {}]   ;;  %s2844_s1 = inlined_call_operand.vmem [shape: bf16[128,128], index: 1, kind: input, shape index: {}]   ;;  %s2845_s2 = inlined_call_operand.vmem [shape: f32[1,128], index: 2, kind: input, shape index: {}]   ;;  %s2846_s3 = inlined_call_operand.vmem [shape: bf16[512,128], index: 3, kind: output, shape index: {}]  }
   0x1 LB: > { %s2094_s13 = sadd.s32 4294967295, %s2655_s12   ;;  %p2098_p0 = scmp.ge.s32.totalorder %s2655_s12, 1  ;;  %s2655_s12 = sphi %s2677_s12, %s13_s12  }
   0x2   : > { %p138_p1 = scmp.lt.s32.totalorder %s2655_s12, 3 }
   0x4   : > { %p139_p2 = pnand %p2098_p0, %p138_p1 }
   0x5   : > { %v2577_v0 = vld [vmem:[%s2844_s1] sm:$0xff] (!%p139_p2)   ;;  %s2099_s16 = sshll.u32 (!%p139_p2), %s2094_s13, 7  ;;  %v2578_v1 = vld [vmem:[%s2844_s1 + $0x8] sm:$0xff] (!%p139_p2)   ;;  %v2579_v2 = vld [vmem:[%s2844_s1 + $0x10] sm:$0xff] (!%p139_p2)   ;;  %s2101_s8 = sshll.u32 (!%p139_p2), %s2094_s13, 5 }
   0x6   : > { %142 = sbr.rel (%p139_p2) target bundleno = 392 (0x188), region = 32  ;;  %p163_p3 = scmp.lt.s32.totalorder (!%p139_p2), %s2099_s16, 255  ;;  %2409 = vmatprep.subr.bf16.mxu0 (!%p139_p2), %v2577_v0  ;;  %2553 = vmatprep.subr.bf16.mxu1 (!%p139_p2), %v2577_v0  ;;  %v2580_v3 = vld [vmem:[%s2844_s1 + $0x18] sm:$0xff] (!%p139_p2)   ;;  %v2581_v6 = vld [vmem:[%s2844_s1 + $0x20] sm:$0xff] (!%p139_p2)   ;;  %v2582_v7 = vld [vmem:[%s2844_s1 + $0x28] sm:$0xff] (!%p139_p2)  }
   0x7   : > { %2410 = vmatpush3.bf16.msra.mxu0 (!%p139_p2), %v2577_v0  ;;  %2561 = vmatpush3.bf16.msra.mxu1 (!%p139_p2), %v2577_v0  ;;  %v2583_v8 = vld [vmem:[%s2844_s1 + $0x30] sm:$0xff] (!%p139_p2)   ;;  %v2584_v9 = vld [vmem:[%s2844_s1 + $0x38] sm:$0xff] (!%p139_p2)   ;;  %p169_p4 = scmp.lt.s32.totalorder (!%p139_p2), %s2101_s8, 63 }
   0x8   : > { %2411 = vmatprep.subr.bf16.mxu0 (!%p139_p2), %v2578_v1  ;;  %2554 = vmatprep.subr.bf16.mxu1 (!%p139_p2), %v2578_v1 }
   0xb   : > { %2412 = vmatpush3.bf16.msra.mxu0 (!%p139_p2), %v2578_v1  ;;  %2562 = vmatpush3.bf16.msra.mxu1 (!%p139_p2), %v2578_v1 }
   0xc   : > { %2413 = vmatprep.subr.bf16.mxu0 (!%p139_p2), %v2579_v2  ;;  %2555 = vmatprep.subr.bf16.mxu1 (!%p139_p2), %v2579_v2 }
   0xd   : > { %s2848_s16 = smov (!%p163_p3, %s2099_s16), 255  ;;  %s2850_s8 = smov (!%p169_p4, %s2101_s8), 63 }
   0xe   : > { %s2100_s21 = sshll.u32 %s2848_s16, 2  ;;  %s2102_s11 = sshll.u32 %s2850_s8, 2 }
   0xf   : > { %s2699_s24 = scalar_lea.vmem %s2843_s0, %s2100_s21  ;;  %2414 = vmatpush3.bf16.msra.mxu0 %v2579_v2  ;;  %2563 = vmatpush3.bf16.msra.mxu1 %v2579_v2  ;;  %s2793_s15 = scalar_lea.vmem %s2846_s3, %s2102_s11 }
  0x10   : > { %v2585_v4 = vld [vmem:[%s2699_s24] sm:$0xff]   ;;  %2415 = vmatprep.subr.bf16.mxu0 %v2580_v3  ;;  %2556 = vmatprep.subr.bf16.mxu1 %v2580_v3  ;;  %v2587_v10 = vld [vmem:[%s2699_s24 + $0x8] sm:$0xff]   ;;  %v2589_v12 = vld [vmem:[%s2699_s24 + $0x10] sm:$0xff]  }
  0x11   : > { %v2586_v5 = vld [vmem:[%s2699_s24 + $0x100] sm:$0xff]   ;;  %2425 = vmatprep.mubr.bf16.mxu0 %v2585_v4  ;;  %v2588_v11 = vld [vmem:[%s2699_s24 + $0x108] sm:$0xff]   ;;  %v2590_v13 = vld [vmem:[%s2699_s24 + $0x110] sm:$0xff]  }
  0x12   : > { %2489 = vmatprep.mubr.bf16.mxu1 %v2586_v5  ;;  %v2591_v14 = vld [vmem:[%s2699_s24 + $0x18] sm:$0xff]   ;;  %v2593_v16 = vld [vmem:[%s2699_s24 + $0x20] sm:$0xff]   ;;  %v2595_v18 = vld [vmem:[%s2699_s24 + $0x28] sm:$0xff]  }
  0x13   : > { %2416 = vmatpush3.bf16.msra.mxu0 %v2580_v3  ;;  %2564 = vmatpush3.bf16.msra.mxu1 %v2580_v3  ;;  %v2592_v15 = vld [vmem:[%s2699_s24 + $0x118] sm:$0xff]   ;;  %v2594_v17 = vld [vmem:[%s2699_s24 + $0x120] sm:$0xff]   ;;  %v2596_v19 = vld [vmem:[%s2699_s24 + $0x128] sm:$0xff]  }
  0x14   : > { %2417 = vmatprep.subr.bf16.mxu0 %v2581_v6  ;;  %2557 = vmatprep.subr.bf16.mxu1 %v2581_v6  ;;  %v2597_v20 = vld [vmem:[%s2699_s24 + $0x30] sm:$0xff]   ;;  %v2599_v22 = vld [vmem:[%s2699_s24 + $0x38] sm:$0xff]   ;;  %v2601_v24 = vld [vmem:[%s2699_s24 + $0x40] sm:$0xff]  }
  0x15   : > { %v2598_v21 = vld [vmem:[%s2699_s24 + $0x130] sm:$0xff]   ;;  %v2600_v23 = vld [vmem:[%s2699_s24 + $0x138] sm:$0xff]   ;;  %v2602_v25 = vld [vmem:[%s2699_s24 + $0x140] sm:$0xff]  }
  0x16   : > { %v2603_v26 = vld [vmem:[%s2699_s24 + $0x48] sm:$0xff]   ;;  %v2605_v28 = vld [vmem:[%s2699_s24 + $0x50] sm:$0xff]   ;;  %v2607_v30 = vld [vmem:[%s2699_s24 + $0x58] sm:$0xff]  }
  0x17   : > { %2418 = vmatpush3.bf16.msra.mxu0 %v2581_v6  ;;  %2565 = vmatpush3.bf16.msra.mxu1 %v2581_v6  ;;  %v2604_v27 = vld [vmem:[%s2699_s24 + $0x148] sm:$0xff]   ;;  %v2606_v29 = vld [vmem:[%s2699_s24 + $0x150] sm:$0xff]   ;;  %v2608_v31 = vld [vmem:[%s2699_s24 + $0x158] sm:$0xff]  }
  0x18   : > { %2419 = vmatprep.subr.bf16.mxu0 %v2582_v7  ;;  %2558 = vmatprep.subr.bf16.mxu1 %v2582_v7  ;;  %v2609_v32 = vld [vmem:[%s2699_s24 + $0x60] sm:$0xff]   ;;  %v2611_v34 = vld [vmem:[%s2699_s24 + $0x68] sm:$0xff]   ;;  %v2613_v36 = vld [vmem:[%s2699_s24 + $0x70] sm:$0xff]  }
  0x19   : > { %v2610_v33 = vld [vmem:[%s2699_s24 + $0x160] sm:$0xff]   ;;  %v2612_v35 = vld [vmem:[%s2699_s24 + $0x168] sm:$0xff]   ;;  %v2614_v37 = vld [vmem:[%s2699_s24 + $0x170] sm:$0xff]  }
  0x1a   : > { %v2615_v38 = vld [vmem:[%s2699_s24 + $0x78] sm:$0xff]   ;;  %v2617_v40 = vld [vmem:[%s2699_s24 + $0x80] sm:$0xff]   ;;  %v2619_v42 = vld [vmem:[%s2699_s24 + $0x88] sm:$0xff]  }
  0x1b   : > { %2420 = vmatpush3.bf16.msra.mxu0 %v2582_v7  ;;  %2566 = vmatpush3.bf16.msra.mxu1 %v2582_v7  ;;  %v2616_v39 = vld [vmem:[%s2699_s24 + $0x178] sm:$0xff]   ;;  %v2618_v41 = vld [vmem:[%s2699_s24 + $0x180] sm:$0xff]   ;;  %v2620_v43 = vld [vmem:[%s2699_s24 + $0x188] sm:$0xff]  }
  0x1c   : > { %2421 = vmatprep.subr.bf16.mxu0 %v2583_v8  ;;  %2559 = vmatprep.subr.bf16.mxu1 %v2583_v8  ;;  %v2621_v44 = vld [vmem:[%s2699_s24 + $0x90] sm:$0xff]   ;;  %v2623_v46 = vld [vmem:[%s2699_s24 + $0x98] sm:$0xff]   ;;  %v2625_v48 = vld [vmem:[%s2699_s24 + $0xa0] sm:$0xff]  }
  0x1d   : > { %v2622_v45 = vld [vmem:[%s2699_s24 + $0x190] sm:$0xff]   ;;  %v2624_v47 = vld [vmem:[%s2699_s24 + $0x198] sm:$0xff]   ;;  %v2626_v49 = vld [vmem:[%s2699_s24 + $0x1a0] sm:$0xff]  }
  0x1e   : > { %v2627_v50 = vld [vmem:[%s2699_s24 + $0xa8] sm:$0xff]   ;;  %v2629_v52 = vld [vmem:[%s2699_s24 + $0xb0] sm:$0xff]   ;;  %v2631_v54 = vld [vmem:[%s2699_s24 + $0xb8] sm:$0xff]  }
  0x1f   : > { %2422 = vmatpush3.bf16.msra.mxu0 %v2583_v8  ;;  %2567 = vmatpush3.bf16.msra.mxu1 %v2583_v8  ;;  %v2628_v51 = vld [vmem:[%s2699_s24 + $0x1a8] sm:$0xff]   ;;  %v2630_v53 = vld [vmem:[%s2699_s24 + $0x1b0] sm:$0xff]   ;;  %v2632_v55 = vld [vmem:[%s2699_s24 + $0x1b8] sm:$0xff]  }
  0x20   : > { %2423 = vmatprep.subr.bf16.mxu0 %v2584_v9  ;;  %2560 = vmatprep.subr.bf16.mxu1 %v2584_v9  ;;  %v2633_v56 = vld [vmem:[%s2699_s24 + $0xc0] sm:$0xff]   ;;  %v2635_v58 = vld [vmem:[%s2699_s24 + $0xc8] sm:$0xff]   ;;  %v2637_v60 = vld [vmem:[%s2699_s24 + $0xd0] sm:$0xff]  }
  0x21   : > { %v2634_v57 = vld [vmem:[%s2699_s24 + $0x1c0] sm:$0xff]   ;;  %v2636_v59 = vld [vmem:[%s2699_s24 + $0x1c8] sm:$0xff]   ;;  %v2638_v61 = vld [vmem:[%s2699_s24 + $0x1d0] sm:$0xff]  }
  0x22   : > { %v2639_v62 = vld [vmem:[%s2699_s24 + $0xd8] sm:$0xff]   ;;  %v2641_v0 = vld [vmem:[%s2699_s24 + $0xe0] sm:$0xff]   ;;  %v2643_v2 = vld [vmem:[%s2699_s24 + $0xe8] sm:$0xff]  }
  0x23   : > { %2424 = vmatpush3.bf16.msra.mxu0 %v2584_v9  ;;  %2568 = vmatpush3.bf16.msra.mxu1 %v2584_v9  ;;  %v2640_v63 = vld [vmem:[%s2699_s24 + $0x1d8] sm:$0xff]   ;;  %v2642_v1 = vld [vmem:[%s2699_s24 + $0x1e0] sm:$0xff]   ;;  %v2644_v3 = vld [vmem:[%s2699_s24 + $0x1e8] sm:$0xff]  }
  0x24   : > { %v2645_v4 = vld [vmem:[%s2699_s24 + $0xf0] sm:$0xff]   ;;  %v2647_v6 = vld [vmem:[%s2699_s24 + $0xf8] sm:$0xff]  }
  0x25   : > { %v2646_v5 = vld [vmem:[%s2699_s24 + $0x1f0] sm:$0xff]   ;;  %v2648_v7 = vld [vmem:[%s2699_s24 + $0x1f8] sm:$0xff]  }
  0x26   : > { %2426 = vmatmul.mubr.bf16.vlgmr.msra.gmra.mrb[0].mxu0 %v2587_v10  ;;  %2490 = vmatmul.mubr.bf16.vlgmr.msra.gmra.mrb[0].mxu1 %v2588_v11 }
  0x27   : > { %2429 = vmatprep.mubr.bf16.mxu0 %v2589_v12  ;;  %2493 = vmatprep.mubr.bf16.mxu1 %v2590_v13 }
  0x2e   : > { %2430 = vmatmul.mubr.bf16.gmra.mrb[4].mxu0 %v2591_v14  ;;  %2494 = vmatmul.mubr.bf16.gmra.mrb[4].mxu1 %v2592_v15 }
  0x2f   : > { %2433 = vmatprep.mubr.bf16.mxu0 %v2593_v16  ;;  %2497 = vmatprep.mubr.bf16.mxu1 %v2594_v17 }
  0x36   : > { %2434 = vmatmul.mubr.bf16.gmra.mrb[8].mxu0 %v2595_v18  ;;  %2498 = vmatmul.mubr.bf16.gmra.mrb[8].mxu1 %v2596_v19 }
  0x37   : > { %2437 = vmatprep.mubr.bf16.mxu0 %v2597_v20  ;;  %2501 = vmatprep.mubr.bf16.mxu1 %v2598_v21 }
  0x3e   : > { %2438 = vmatmul.mubr.bf16.gmra.mrb[12].mxu0 %v2599_v22  ;;  %2502 = vmatmul.mubr.bf16.gmra.mrb[12].mxu1 %v2600_v23 }
  0x3f   : > { %2441 = vmatprep.mubr.bf16.mxu0 %v2601_v24  ;;  %2505 = vmatprep.mubr.bf16.mxu1 %v2602_v25 }
  0x46   : > { %2442 = vmatmul.mubr.bf16.gmra.mrb[16].mxu0 %v2603_v26  ;;  %2506 = vmatmul.mubr.bf16.gmra.mrb[16].mxu1 %v2604_v27 }
  0x47   : > { %2445 = vmatprep.mubr.bf16.mxu0 %v2605_v28  ;;  %2509 = vmatprep.mubr.bf16.mxu1 %v2606_v29 }
  0x4e   : > { %2446 = vmatmul.mubr.bf16.gmra.mrb[20].mxu0 %v2607_v30  ;;  %2510 = vmatmul.mubr.bf16.gmra.mrb[20].mxu1 %v2608_v31 }
  0x4f   : > { %2449 = vmatprep.mubr.bf16.mxu0 %v2609_v32  ;;  %2513 = vmatprep.mubr.bf16.mxu1 %v2610_v33 }
  0x56   : > { %2450 = vmatmul.mubr.bf16.gmra.mrb[24].mxu0 %v2611_v34  ;;  %2514 = vmatmul.mubr.bf16.gmra.mrb[24].mxu1 %v2612_v35 }
  0x57   : > { %2453 = vmatprep.mubr.bf16.mxu0 %v2613_v36  ;;  %2517 = vmatprep.mubr.bf16.mxu1 %v2614_v37 }
  0x5e   : > { %2454 = vmatmul.mubr.bf16.gmra.mrb[28].mxu0 %v2615_v38  ;;  %2518 = vmatmul.mubr.bf16.gmra.mrb[28].mxu1 %v2616_v39  ;;  %v2785_v38 = vld [vmem:[%s2845_s2] ss:$0 sm:$0xff] }
  0x5f   : > { %2457 = vmatprep.mubr.bf16.mxu0 %v2617_v40  ;;  %2521 = vmatprep.mubr.bf16.mxu1 %v2618_v41 }
  0x66   : > { %2458 = vmatmul.mubr.bf16.gmra.mrb[32].mxu0 %v2619_v42  ;;  %2522 = vmatmul.mubr.bf16.gmra.mrb[32].mxu1 %v2620_v43 }
  0x67   : > { %2461 = vmatprep.mubr.bf16.mxu0 %v2621_v44  ;;  %2525 = vmatprep.mubr.bf16.mxu1 %v2622_v45 }
  0x6e   : > { %2462 = vmatmul.mubr.bf16.gmra.mrb[36].mxu0 %v2623_v46  ;;  %2526 = vmatmul.mubr.bf16.gmra.mrb[36].mxu1 %v2624_v47 }
  0x6f   : > { %2465 = vmatprep.mubr.bf16.mxu0 %v2625_v48  ;;  %2529 = vmatprep.mubr.bf16.mxu1 %v2626_v49 }
  0x76   : > { %2466 = vmatmul.mubr.bf16.gmra.mrb[40].mxu0 %v2627_v50  ;;  %2530 = vmatmul.mubr.bf16.gmra.mrb[40].mxu1 %v2628_v51 }
  0x77   : > { %2469 = vmatprep.mubr.bf16.mxu0 %v2629_v52  ;;  %2533 = vmatprep.mubr.bf16.mxu1 %v2630_v53 }
  0x7e   : > { %2470 = vmatmul.mubr.bf16.gmra.mrb[44].mxu0 %v2631_v54  ;;  %2534 = vmatmul.mubr.bf16.gmra.mrb[44].mxu1 %v2632_v55 }
  0x7f   : > { %2473 = vmatprep.mubr.bf16.mxu0 %v2633_v56  ;;  %2537 = vmatprep.mubr.bf16.mxu1 %v2634_v57 }
  0x86   : > { %2474 = vmatmul.mubr.bf16.gmra.mrb[48].mxu0 %v2635_v58  ;;  %2538 = vmatmul.mubr.bf16.gmra.mrb[48].mxu1 %v2636_v59 }
  0x87   : > { %2477 = vmatprep.mubr.bf16.mxu0 %v2637_v60  ;;  %2541 = vmatprep.mubr.bf16.mxu1 %v2638_v61 }
  0x8e   : > { %2478 = vmatmul.mubr.bf16.gmra.mrb[52].mxu0 %v2639_v62  ;;  %2542 = vmatmul.mubr.bf16.gmra.mrb[52].mxu1 %v2640_v63 }
  0x8f   : > { %2481 = vmatprep.mubr.bf16.mxu0 %v2641_v0  ;;  %2545 = vmatprep.mubr.bf16.mxu1 %v2642_v1 }
  0x96   : > { %2482 = vmatmul.mubr.bf16.gmra.mrb[56].mxu0 %v2643_v2  ;;  %2546 = vmatmul.mubr.bf16.gmra.mrb[56].mxu1 %v2644_v3 }
  0x97   : > { %2485 = vmatprep.mubr.bf16.mxu0 %v2645_v4  ;;  %2549 = vmatprep.mubr.bf16.mxu1 %v2646_v5 }
  0x9e   : > { %2486 = vmatmul.mubr.bf16.gmra.mrb[60].mxu0 %v2647_v6  ;;  %2550 = vmatmul.mubr.bf16.gmra.mrb[60].mxu1 %v2648_v7 }
  0xf9   : > { %v2427_v8 = vpop.f32.mrb[0].mxu0  ;;  %v2491_v9 = vpop.f32.mrb[0].mxu1 }
  0xfa   : > { %v785_v10 = vpop.f32.mrb[1].mxu0  ;;  %v1041_v11 = vpop.f32.mrb[1].mxu1 }
  0xfb   : > { %v2428_v12 = vpop.f32.mrb[2].mxu0  ;;  %v2492_v13 = vpop.f32.mrb[2].mxu1 }
  0xfc   : > { %v788_v14 = vpop.f32.mrb[3].mxu0  ;;  %v1044_v15 = vpop.f32.mrb[3].mxu1 }
 0x101   : > { %v2431_v16 = vpop.f32.mrb[4].mxu0  ;;  %v2495_v17 = vpop.f32.mrb[4].mxu1 }
 0x102   : > { %v1435_v18 = vmax.f32 %v2427_v8, %v2431_v16  ;;  %v1563_v19 = vmax.f32 %v2491_v9, %v2495_v17  ;;  %v801_v20 = vpop.f32.mrb[5].mxu0  ;;  %v1057_v21 = vpop.f32.mrb[5].mxu1 }
 0x103   : > { %v1433_v22 = vmax.f32 %v785_v10, %v801_v20  ;;  %v1561_v23 = vmax.f32 %v1041_v11, %v1057_v21  ;;  %v2432_v24 = vpop.f32.mrb[6].mxu0  ;;  %v2496_v25 = vpop.f32.mrb[6].mxu1 }
 0x104   : > { %1439 = vst [vmem:[#allocation3 + $0x10] sm:$0xff] %v1435_v18  ;;  %1567 = vst [vmem:[#allocation3 + $0x110] sm:$0xff] %v1563_v19  ;;  %v1436_v26 = vmax.f32 %v2428_v12, %v2432_v24  ;;  %v1564_v27 = vmax.f32 %v2492_v13, %v2496_v25  ;;  %v804_v28 = vpop.f32.mrb[7].mxu0  ;;  %v1060_v29 = vpop.f32.mrb[7].mxu1 }
 0x105   : > { %1437 = vst [vmem:[#allocation3] sm:$0xff] %v1433_v22  ;;  %1565 = vst [vmem:[#allocation3 + $0x100] sm:$0xff] %v1561_v23  ;;  %v1434_v30 = vmax.f32 %v788_v14, %v804_v28  ;;  %v1562_v31 = vmax.f32 %v1044_v15, %v1060_v29 }
 0x106   : > { %1440 = vst [vmem:[#allocation3 + $0x18] sm:$0xff] %v1436_v26  ;;  %1568 = vst [vmem:[#allocation3 + $0x118] sm:$0xff] %v1564_v27 }
 0x107   : > { %1438 = vst [vmem:[#allocation3 + $0x8] sm:$0xff] %v1434_v30  ;;  %1566 = vst [vmem:[#allocation3 + $0x108] sm:$0xff] %v1562_v31 }
 0x109   : > { %v2435_v32 = vpop.f32.mrb[8].mxu0  ;;  %v2499_v33 = vpop.f32.mrb[8].mxu1 }
 0x10a   : > { %v817_v34 = vpop.f32.mrb[9].mxu0  ;;  %v1073_v35 = vpop.f32.mrb[9].mxu1 }
 0x10b   : > { %v2436_v36 = vpop.f32.mrb[10].mxu0  ;;  %v2500_v37 = vpop.f32.mrb[10].mxu1 }
 0x10c   : > { %v820_v39 = vpop.f32.mrb[11].mxu0  ;;  %v1076_v40 = vpop.f32.mrb[11].mxu1 }
 0x10d   : > { %v1683_v41 = vld [vmem:[#allocation3 + $0x10] ss:$2 sm:$0xff]  ;;  %v1747_v42 = vld [vmem:[#allocation3 + $0x11] ss:$2 sm:$0xff] }
 0x10e   : > { %v1715_v43 = vld [vmem:[#allocation3 + $0x110] ss:$2 sm:$0xff]  ;;  %v1809_v44 = vmax.f32 %v1683_v41, %v1747_v42  ;;  %v1779_v45 = vld [vmem:[#allocation3 + $0x111] ss:$2 sm:$0xff]  ;;  %v1681_v46 = vld [vmem:[#allocation3] ss:$2 sm:$0xff] }
 0x10f   : > { %v1745_v47 = vld [vmem:[#allocation3 + $0x1] ss:$2 sm:$0xff]  ;;  %v1825_v48 = vmax.f32 %v1715_v43, %v1779_v45  ;;  %v1713_v50 = vld [vmem:[#allocation3 + $0x100] ss:$2 sm:$0xff] }
 0x110   : > { %v1808_v49 = vmax.f32 %v1681_v46, %v1745_v47  ;;  %v1777_v51 = vld [vmem:[#allocation3 + $0x101] ss:$2 sm:$0xff]  ;;  %v1847_v52 = vadd.f32 %v2785_v38, %v1809_v44 }
 0x111   : > { %v1824_v53 = vmax.f32 %v1713_v50, %v1777_v51  ;;  %v1863_v54 = vadd.f32 %v2785_v38, %v1825_v48  ;;  %v2439_v56 = vpop.f32.mrb[12].mxu0  ;;  %v2503_v57 = vpop.f32.mrb[12].mxu1 }
 0x112   : > { %v1846_v55 = vadd.f32 %v2785_v38, %v1808_v49  ;;  %v1451_v59 = vmax.f32 %v2435_v32, %v2439_v56  ;;  %v1579_v60 = vmax.f32 %v2499_v33, %v2503_v57  ;;  %v833_v61 = vpop.f32.mrb[13].mxu0  ;;  %v1089_v62 = vpop.f32.mrb[13].mxu1 }
 0x113   : > { %v1862_v58 = vadd.f32 %v2785_v38, %v1824_v53  ;;  %v1449_v0 = vmax.f32 %v817_v34, %v833_v61  ;;  %v1577_v1 = vmax.f32 %v1073_v35, %v1089_v62  ;;  %v2440_v2 = vpop.f32.mrb[14].mxu0  ;;  %v2504_v3 = vpop.f32.mrb[14].mxu1 }
 0x114   : > { %v2245_v63 = vpack.c.bf16 %v1847_v52, %v1846_v55  ;;  %1455 = vst [vmem:[#allocation3 + $0x30] sm:$0xff] %v1451_v59  ;;  %1583 = vst [vmem:[#allocation3 + $0x130] sm:$0xff] %v1579_v60  ;;  %v1452_v5 = vmax.f32 %v2436_v36, %v2440_v2  ;;  %v1580_v6 = vmax.f32 %v2500_v37, %v2504_v3  ;;  %v836_v7 = vpop.f32.mrb[15].mxu0  ;;  %v1092_v8 = vpop.f32.mrb[15].mxu1 }
 0x115   : > { %v2285_v4 = vpack.c.bf16 %v1863_v54, %v1862_v58  ;;  %1453 = vst [vmem:[#allocation3 + $0x20] sm:$0xff] %v1449_v0  ;;  %1581 = vst [vmem:[#allocation3 + $0x120] sm:$0xff] %v1577_v1  ;;  %v1450_v9 = vmax.f32 %v820_v39, %v836_v7  ;;  %v1578_v10 = vmax.f32 %v1076_v40, %v1092_v8 }
 0x116   : > { %2246 = vst [vmem:[%s2793_s15] sm:$0xff] %v2245_v63   ;;  %1456 = vst [vmem:[#allocation3 + $0x38] sm:$0xff] %v1452_v5 }
 0x117   : > { %2329 = vst [vmem:[%s2793_s15 + $0x40] sm:$0xff] %v2285_v4   ;;  %1584 = vst [vmem:[#allocation3 + $0x138] sm:$0xff] %v1580_v6 }
 0x118   : > { %1454 = vst [vmem:[#allocation3 + $0x28] sm:$0xff] %v1450_v9  ;;  %1582 = vst [vmem:[#allocation3 + $0x128] sm:$0xff] %v1578_v10 }
 0x119   : > { %v2443_v11 = vpop.f32.mrb[16].mxu0  ;;  %v2507_v12 = vpop.f32.mrb[16].mxu1 }
 0x11a   : > { %v849_v13 = vpop.f32.mrb[17].mxu0  ;;  %v1105_v14 = vpop.f32.mrb[17].mxu1 }
 0x11b   : > { %v2444_v15 = vpop.f32.mrb[18].mxu0  ;;  %v2508_v16 = vpop.f32.mrb[18].mxu1 }
 0x11c   : > { %v852_v17 = vpop.f32.mrb[19].mxu0  ;;  %v1108_v18 = vpop.f32.mrb[19].mxu1 }
 0x11d   : > { %v1687_v19 = vld [vmem:[#allocation3 + $0x30] ss:$2 sm:$0xff]  ;;  %v1751_v20 = vld [vmem:[#allocation3 + $0x31] ss:$2 sm:$0xff] }
 0x11e   : > { %v1719_v21 = vld [vmem:[#allocation3 + $0x130] ss:$2 sm:$0xff]  ;;  %v1811_v22 = vmax.f32 %v1687_v19, %v1751_v20  ;;  %v1783_v23 = vld [vmem:[#allocation3 + $0x131] ss:$2 sm:$0xff] }
 0x11f   : > { %v1685_v24 = vld [vmem:[#allocation3 + $0x20] ss:$2 sm:$0xff]  ;;  %v1749_v25 = vld [vmem:[#allocation3 + $0x21] ss:$2 sm:$0xff]  ;;  %v1827_v26 = vmax.f32 %v1719_v21, %v1783_v23 }
 0x120   : > { %v1810_v27 = vmax.f32 %v1685_v24, %v1749_v25  ;;  %v1717_v28 = vld [vmem:[#allocation3 + $0x120] ss:$2 sm:$0xff]  ;;  %v1781_v29 = vld [vmem:[#allocation3 + $0x121] ss:$2 sm:$0xff]  ;;  %v1849_v30 = vadd.f32 %v2785_v38, %v1811_v22 }
 0x121   : > { %v1826_v31 = vmax.f32 %v1717_v28, %v1781_v29  ;;  %v1865_v32 = vadd.f32 %v2785_v38, %v1827_v26  ;;  %v2447_v34 = vpop.f32.mrb[20].mxu0  ;;  %v2511_v35 = vpop.f32.mrb[20].mxu1 }
 0x122   : > { %v1848_v33 = vadd.f32 %v2785_v38, %v1810_v27  ;;  %v1467_v37 = vmax.f32 %v2443_v11, %v2447_v34  ;;  %v1595_v39 = vmax.f32 %v2507_v12, %v2511_v35  ;;  %v865_v40 = vpop.f32.mrb[21].mxu0  ;;  %v1121_v41 = vpop.f32.mrb[21].mxu1 }
 0x123   : > { %v1864_v36 = vadd.f32 %v2785_v38, %v1826_v31  ;;  %v1465_v43 = vmax.f32 %v849_v13, %v865_v40  ;;  %v1593_v44 = vmax.f32 %v1105_v14, %v1121_v41  ;;  %v2448_v45 = vpop.f32.mrb[22].mxu0  ;;  %v2512_v46 = vpop.f32.mrb[22].mxu1 }
 0x124   : > { %v2250_v42 = vpack.c.bf16 %v1849_v30, %v1848_v33  ;;  %1471 = vst [vmem:[#allocation3 + $0x50] sm:$0xff] %v1467_v37  ;;  %1599 = vst [vmem:[#allocation3 + $0x150] sm:$0xff] %v1595_v39  ;;  %v1468_v48 = vmax.f32 %v2444_v15, %v2448_v45  ;;  %v1596_v49 = vmax.f32 %v2508_v16, %v2512_v46  ;;  %v868_v50 = vpop.f32.mrb[23].mxu0  ;;  %v1124_v51 = vpop.f32.mrb[23].mxu1 }
 0x125   : > { %v2290_v47 = vpack.c.bf16 %v1865_v32, %v1864_v36  ;;  %1469 = vst [vmem:[#allocation3 + $0x40] sm:$0xff] %v1465_v43  ;;  %1597 = vst [vmem:[#allocation3 + $0x140] sm:$0xff] %v1593_v44  ;;  %v1466_v52 = vmax.f32 %v852_v17, %v868_v50  ;;  %v1594_v53 = vmax.f32 %v1108_v18, %v1124_v51 }
 0x126   : > { %2322 = vst [vmem:[%s2793_s15 + $0x8] sm:$0xff] %v2250_v42   ;;  %1472 = vst [vmem:[#allocation3 + $0x58] sm:$0xff] %v1468_v48 }
 0x127   : > { %2330 = vst [vmem:[%s2793_s15 + $0x48] sm:$0xff] %v2290_v47   ;;  %1600 = vst [vmem:[#allocation3 + $0x158] sm:$0xff] %v1596_v49 }
 0x128   : > { %1470 = vst [vmem:[#allocation3 + $0x48] sm:$0xff] %v1466_v52  ;;  %1598 = vst [vmem:[#allocation3 + $0x148] sm:$0xff] %v1594_v53 }
 0x129   : > { %v2451_v54 = vpop.f32.mrb[24].mxu0  ;;  %v2515_v55 = vpop.f32.mrb[24].mxu1 }
 0x12a   : > { %v881_v56 = vpop.f32.mrb[25].mxu0  ;;  %v1137_v57 = vpop.f32.mrb[25].mxu1 }
 0x12b   : > { %v2452_v58 = vpop.f32.mrb[26].mxu0  ;;  %v2516_v59 = vpop.f32.mrb[26].mxu1 }
 0x12c   : > { %v884_v60 = vpop.f32.mrb[27].mxu0  ;;  %v1140_v61 = vpop.f32.mrb[27].mxu1 }
 0x12d   : > { %v1691_v62 = vld [vmem:[#allocation3 + $0x50] ss:$2 sm:$0xff]  ;;  %v1755_v63 = vld [vmem:[#allocation3 + $0x51] ss:$2 sm:$0xff] }
 0x12e   : > { %v1723_v0 = vld [vmem:[#allocation3 + $0x150] ss:$2 sm:$0xff]  ;;  %v1813_v1 = vmax.f32 %v1691_v62, %v1755_v63  ;;  %v1787_v2 = vld [vmem:[#allocation3 + $0x151] ss:$2 sm:$0xff] }
 0x12f   : > { %v1689_v3 = vld [vmem:[#allocation3 + $0x40] ss:$2 sm:$0xff]  ;;  %v1753_v4 = vld [vmem:[#allocation3 + $0x41] ss:$2 sm:$0xff]  ;;  %v1829_v5 = vmax.f32 %v1723_v0, %v1787_v2 }
 0x130   : > { %v1812_v6 = vmax.f32 %v1689_v3, %v1753_v4  ;;  %v1721_v7 = vld [vmem:[#allocation3 + $0x140] ss:$2 sm:$0xff]  ;;  %v1785_v8 = vld [vmem:[#allocation3 + $0x141] ss:$2 sm:$0xff]  ;;  %v1851_v9 = vadd.f32 %v2785_v38, %v1813_v1 }
 0x131   : > { %v1828_v10 = vmax.f32 %v1721_v7, %v1785_v8  ;;  %v1867_v11 = vadd.f32 %v2785_v38, %v1829_v5  ;;  %v2455_v13 = vpop.f32.mrb[28].mxu0  ;;  %v2519_v14 = vpop.f32.mrb[28].mxu1 }
 0x132   : > { %v1850_v12 = vadd.f32 %v2785_v38, %v1812_v6  ;;  %v1483_v16 = vmax.f32 %v2451_v54, %v2455_v13  ;;  %v1611_v17 = vmax.f32 %v2515_v55, %v2519_v14  ;;  %v897_v18 = vpop.f32.mrb[29].mxu0  ;;  %v1153_v19 = vpop.f32.mrb[29].mxu1 }
 0x133   : > { %v1866_v15 = vadd.f32 %v2785_v38, %v1828_v10  ;;  %v1481_v21 = vmax.f32 %v881_v56, %v897_v18  ;;  %v1609_v22 = vmax.f32 %v1137_v57, %v1153_v19  ;;  %v2456_v23 = vpop.f32.mrb[30].mxu0  ;;  %v2520_v24 = vpop.f32.mrb[30].mxu1 }
 0x134   : > { %v2255_v20 = vpack.c.bf16 %v1851_v9, %v1850_v12  ;;  %1487 = vst [vmem:[#allocation3 + $0x70] sm:$0xff] %v1483_v16  ;;  %1615 = vst [vmem:[#allocation3 + $0x170] sm:$0xff] %v1611_v17  ;;  %v1484_v26 = vmax.f32 %v2452_v58, %v2456_v23  ;;  %v1612_v27 = vmax.f32 %v2516_v59, %v2520_v24  ;;  %v900_v28 = vpop.f32.mrb[31].mxu0  ;;  %v1156_v29 = vpop.f32.mrb[31].mxu1 }
 0x135   : > { %v2295_v25 = vpack.c.bf16 %v1867_v11, %v1866_v15  ;;  %1485 = vst [vmem:[#allocation3 + $0x60] sm:$0xff] %v1481_v21  ;;  %1613 = vst [vmem:[#allocation3 + $0x160] sm:$0xff] %v1609_v22  ;;  %v1482_v30 = vmax.f32 %v884_v60, %v900_v28  ;;  %v1610_v31 = vmax.f32 %v1140_v61, %v1156_v29 }
 0x136   : > { %2323 = vst [vmem:[%s2793_s15 + $0x10] sm:$0xff] %v2255_v20   ;;  %1488 = vst [vmem:[#allocation3 + $0x78] sm:$0xff] %v1484_v26 }
 0x137   : > { %2331 = vst [vmem:[%s2793_s15 + $0x50] sm:$0xff] %v2295_v25   ;;  %1616 = vst [vmem:[#allocation3 + $0x178] sm:$0xff] %v1612_v27 }
 0x138   : > { %1486 = vst [vmem:[#allocation3 + $0x68] sm:$0xff] %v1482_v30  ;;  %1614 = vst [vmem:[#allocation3 + $0x168] sm:$0xff] %v1610_v31 }
 0x139   : > { %v2459_v32 = vpop.f32.mrb[32].mxu0  ;;  %v2523_v33 = vpop.f32.mrb[32].mxu1 }
 0x13a   : > { %v913_v34 = vpop.f32.mrb[33].mxu0  ;;  %v1169_v35 = vpop.f32.mrb[33].mxu1 }
 0x13b   : > { %v2460_v36 = vpop.f32.mrb[34].mxu0  ;;  %v2524_v37 = vpop.f32.mrb[34].mxu1 }
 0x13c   : > { %v916_v39 = vpop.f32.mrb[35].mxu0  ;;  %v1172_v40 = vpop.f32.mrb[35].mxu1 }
 0x13d   : > { %v1695_v41 = vld [vmem:[#allocation3 + $0x70] ss:$2 sm:$0xff]  ;;  %v1759_v42 = vld [vmem:[#allocation3 + $0x71] ss:$2 sm:$0xff] }
 0x13e   : > { %v1727_v43 = vld [vmem:[#allocation3 + $0x170] ss:$2 sm:$0xff]  ;;  %v1815_v44 = vmax.f32 %v1695_v41, %v1759_v42  ;;  %v1791_v45 = vld [vmem:[#allocation3 + $0x171] ss:$2 sm:$0xff] }
 0x13f   : > { %v1693_v46 = vld [vmem:[#allocation3 + $0x60] ss:$2 sm:$0xff]  ;;  %v1757_v47 = vld [vmem:[#allocation3 + $0x61] ss:$2 sm:$0xff]  ;;  %v1831_v48 = vmax.f32 %v1727_v43, %v1791_v45 }
 0x140   : > { %v1814_v49 = vmax.f32 %v1693_v46, %v1757_v47  ;;  %v1725_v50 = vld [vmem:[#allocation3 + $0x160] ss:$2 sm:$0xff]  ;;  %v1789_v51 = vld [vmem:[#allocation3 + $0x161] ss:$2 sm:$0xff]  ;;  %v1853_v52 = vadd.f32 %v2785_v38, %v1815_v44 }
 0x141   : > { %v1830_v53 = vmax.f32 %v1725_v50, %v1789_v51  ;;  %v1869_v54 = vadd.f32 %v2785_v38, %v1831_v48  ;;  %v2463_v56 = vpop.f32.mrb[36].mxu0  ;;  %v2527_v57 = vpop.f32.mrb[36].mxu1 }
 0x142   : > { %v1852_v55 = vadd.f32 %v2785_v38, %v1814_v49  ;;  %v1499_v59 = vmax.f32 %v2459_v32, %v2463_v56  ;;  %v1627_v60 = vmax.f32 %v2523_v33, %v2527_v57  ;;  %v929_v61 = vpop.f32.mrb[37].mxu0  ;;  %v1185_v62 = vpop.f32.mrb[37].mxu1 }
 0x143   : > { %v1868_v58 = vadd.f32 %v2785_v38, %v1830_v53  ;;  %v1497_v0 = vmax.f32 %v913_v34, %v929_v61  ;;  %v1625_v1 = vmax.f32 %v1169_v35, %v1185_v62  ;;  %v2464_v2 = vpop.f32.mrb[38].mxu0  ;;  %v2528_v3 = vpop.f32.mrb[38].mxu1 }
 0x144   : > { %v2260_v63 = vpack.c.bf16 %v1853_v52, %v1852_v55  ;;  %1503 = vst [vmem:[#allocation3 + $0x90] sm:$0xff] %v1499_v59  ;;  %1631 = vst [vmem:[#allocation3 + $0x190] sm:$0xff] %v1627_v60  ;;  %v1500_v5 = vmax.f32 %v2460_v36, %v2464_v2  ;;  %v1628_v6 = vmax.f32 %v2524_v37, %v2528_v3  ;;  %v932_v7 = vpop.f32.mrb[39].mxu0  ;;  %v1188_v8 = vpop.f32.mrb[39].mxu1 }
 0x145   : > { %v2300_v4 = vpack.c.bf16 %v1869_v54, %v1868_v58  ;;  %1501 = vst [vmem:[#allocation3 + $0x80] sm:$0xff] %v1497_v0  ;;  %1629 = vst [vmem:[#allocation3 + $0x180] sm:$0xff] %v1625_v1  ;;  %v1498_v9 = vmax.f32 %v916_v39, %v932_v7  ;;  %v1626_v10 = vmax.f32 %v1172_v40, %v1188_v8 }
 0x146   : > { %2324 = vst [vmem:[%s2793_s15 + $0x18] sm:$0xff] %v2260_v63   ;;  %1504 = vst [vmem:[#allocation3 + $0x98] sm:$0xff] %v1500_v5 }
 0x147   : > { %2332 = vst [vmem:[%s2793_s15 + $0x58] sm:$0xff] %v2300_v4   ;;  %1632 = vst [vmem:[#allocation3 + $0x198] sm:$0xff] %v1628_v6 }
 0x148   : > { %1502 = vst [vmem:[#allocation3 + $0x88] sm:$0xff] %v1498_v9  ;;  %1630 = vst [vmem:[#allocation3 + $0x188] sm:$0xff] %v1626_v10 }
 0x149   : > { %v2467_v11 = vpop.f32.mrb[40].mxu0  ;;  %v2531_v12 = vpop.f32.mrb[40].mxu1 }
 0x14a   : > { %v945_v13 = vpop.f32.mrb[41].mxu0  ;;  %v1201_v14 = vpop.f32.mrb[41].mxu1 }
 0x14b   : > { %v2468_v15 = vpop.f32.mrb[42].mxu0  ;;  %v2532_v16 = vpop.f32.mrb[42].mxu1 }
 0x14c   : > { %v948_v17 = vpop.f32.mrb[43].mxu0  ;;  %v1204_v18 = vpop.f32.mrb[43].mxu1 }
 0x14d   : > { %v1699_v19 = vld [vmem:[#allocation3 + $0x90] ss:$2 sm:$0xff]  ;;  %v1763_v20 = vld [vmem:[#allocation3 + $0x91] ss:$2 sm:$0xff] }
 0x14e   : > { %v1731_v21 = vld [vmem:[#allocation3 + $0x190] ss:$2 sm:$0xff]  ;;  %v1817_v22 = vmax.f32 %v1699_v19, %v1763_v20  ;;  %v1795_v23 = vld [vmem:[#allocation3 + $0x191] ss:$2 sm:$0xff] }
 0x14f   : > { %v1697_v24 = vld [vmem:[#allocation3 + $0x80] ss:$2 sm:$0xff]  ;;  %v1761_v25 = vld [vmem:[#allocation3 + $0x81] ss:$2 sm:$0xff]  ;;  %v1833_v26 = vmax.f32 %v1731_v21, %v1795_v23 }
 0x150   : > { %v1816_v27 = vmax.f32 %v1697_v24, %v1761_v25  ;;  %v1729_v28 = vld [vmem:[#allocation3 + $0x180] ss:$2 sm:$0xff]  ;;  %v1793_v29 = vld [vmem:[#allocation3 + $0x181] ss:$2 sm:$0xff]  ;;  %v1855_v30 = vadd.f32 %v2785_v38, %v1817_v22 }
 0x151   : > { %v1832_v31 = vmax.f32 %v1729_v28, %v1793_v29  ;;  %v1871_v32 = vadd.f32 %v2785_v38, %v1833_v26  ;;  %v2471_v34 = vpop.f32.mrb[44].mxu0  ;;  %v2535_v35 = vpop.f32.mrb[44].mxu1 }
 0x152   : > { %v1854_v33 = vadd.f32 %v2785_v38, %v1816_v27  ;;  %v1515_v37 = vmax.f32 %v2467_v11, %v2471_v34  ;;  %v1643_v39 = vmax.f32 %v2531_v12, %v2535_v35  ;;  %v961_v40 = vpop.f32.mrb[45].mxu0  ;;  %v1217_v41 = vpop.f32.mrb[45].mxu1 }
 0x153   : > { %v1870_v36 = vadd.f32 %v2785_v38, %v1832_v31  ;;  %v1513_v43 = vmax.f32 %v945_v13, %v961_v40  ;;  %v1641_v44 = vmax.f32 %v1201_v14, %v1217_v41  ;;  %v2472_v45 = vpop.f32.mrb[46].mxu0  ;;  %v2536_v46 = vpop.f32.mrb[46].mxu1 }
 0x154   : > { %v2265_v42 = vpack.c.bf16 %v1855_v30, %v1854_v33  ;;  %1519 = vst [vmem:[#allocation3 + $0xb0] sm:$0xff] %v1515_v37  ;;  %1647 = vst [vmem:[#allocation3 + $0x1b0] sm:$0xff] %v1643_v39  ;;  %v1516_v48 = vmax.f32 %v2468_v15, %v2472_v45  ;;  %v1644_v49 = vmax.f32 %v2532_v16, %v2536_v46  ;;  %v964_v50 = vpop.f32.mrb[47].mxu0  ;;  %v1220_v51 = vpop.f32.mrb[47].mxu1 }
 0x155   : > { %v2305_v47 = vpack.c.bf16 %v1871_v32, %v1870_v36  ;;  %1517 = vst [vmem:[#allocation3 + $0xa0] sm:$0xff] %v1513_v43  ;;  %1645 = vst [vmem:[#allocation3 + $0x1a0] sm:$0xff] %v1641_v44  ;;  %v1514_v52 = vmax.f32 %v948_v17, %v964_v50  ;;  %v1642_v53 = vmax.f32 %v1204_v18, %v1220_v51 }
 0x156   : > { %2325 = vst [vmem:[%s2793_s15 + $0x20] sm:$0xff] %v2265_v42   ;;  %1520 = vst [vmem:[#allocation3 + $0xb8] sm:$0xff] %v1516_v48 }
 0x157   : > { %2333 = vst [vmem:[%s2793_s15 + $0x60] sm:$0xff] %v2305_v47   ;;  %1648 = vst [vmem:[#allocation3 + $0x1b8] sm:$0xff] %v1644_v49 }
 0x158   : > { %1518 = vst [vmem:[#allocation3 + $0xa8] sm:$0xff] %v1514_v52  ;;  %1646 = vst [vmem:[#allocation3 + $0x1a8] sm:$0xff] %v1642_v53 }
 0x159   : > { %v2475_v54 = vpop.f32.mrb[48].mxu0  ;;  %v2539_v55 = vpop.f32.mrb[48].mxu1 }
 0x15a   : > { %v977_v56 = vpop.f32.mrb[49].mxu0  ;;  %v1233_v57 = vpop.f32.mrb[49].mxu1 }
 0x15b   : > { %v2476_v58 = vpop.f32.mrb[50].mxu0  ;;  %v2540_v59 = vpop.f32.mrb[50].mxu1 }
 0x15c   : > { %v980_v60 = vpop.f32.mrb[51].mxu0  ;;  %v1236_v61 = vpop.f32.mrb[51].mxu1 }
 0x15d   : > { %v1703_v62 = vld [vmem:[#allocation3 + $0xb0] ss:$2 sm:$0xff]  ;;  %v1767_v63 = vld [vmem:[#allocation3 + $0xb1] ss:$2 sm:$0xff] }
 0x15e   : > { %v1735_v0 = vld [vmem:[#allocation3 + $0x1b0] ss:$2 sm:$0xff]  ;;  %v1819_v1 = vmax.f32 %v1703_v62, %v1767_v63  ;;  %v1799_v2 = vld [vmem:[#allocation3 + $0x1b1] ss:$2 sm:$0xff] }
 0x15f   : > { %v1701_v3 = vld [vmem:[#allocation3 + $0xa0] ss:$2 sm:$0xff]  ;;  %v1765_v4 = vld [vmem:[#allocation3 + $0xa1] ss:$2 sm:$0xff]  ;;  %v1835_v5 = vmax.f32 %v1735_v0, %v1799_v2 }
 0x160   : > { %v1818_v6 = vmax.f32 %v1701_v3, %v1765_v4  ;;  %v1733_v7 = vld [vmem:[#allocation3 + $0x1a0] ss:$2 sm:$0xff]  ;;  %v1797_v8 = vld [vmem:[#allocation3 + $0x1a1] ss:$2 sm:$0xff]  ;;  %v1857_v9 = vadd.f32 %v2785_v38, %v1819_v1 }
 0x161   : > { %v1834_v10 = vmax.f32 %v1733_v7, %v1797_v8  ;;  %v1873_v11 = vadd.f32 %v2785_v38, %v1835_v5  ;;  %v2479_v13 = vpop.f32.mrb[52].mxu0  ;;  %v2543_v14 = vpop.f32.mrb[52].mxu1 }
 0x162   : > { %v1856_v12 = vadd.f32 %v2785_v38, %v1818_v6  ;;  %v1531_v16 = vmax.f32 %v2475_v54, %v2479_v13  ;;  %v1659_v17 = vmax.f32 %v2539_v55, %v2543_v14  ;;  %v993_v18 = vpop.f32.mrb[53].mxu0  ;;  %v1249_v19 = vpop.f32.mrb[53].mxu1 }
 0x163   : > { %v1872_v15 = vadd.f32 %v2785_v38, %v1834_v10  ;;  %v1529_v21 = vmax.f32 %v977_v56, %v993_v18  ;;  %v1657_v22 = vmax.f32 %v1233_v57, %v1249_v19  ;;  %v2480_v23 = vpop.f32.mrb[54].mxu0  ;;  %v2544_v24 = vpop.f32.mrb[54].mxu1 }
 0x164   : > { %v2270_v20 = vpack.c.bf16 %v1857_v9, %v1856_v12  ;;  %1535 = vst [vmem:[#allocation3 + $0xd0] sm:$0xff] %v1531_v16  ;;  %1663 = vst [vmem:[#allocation3 + $0x1d0] sm:$0xff] %v1659_v17  ;;  %v1532_v26 = vmax.f32 %v2476_v58, %v2480_v23  ;;  %v1660_v27 = vmax.f32 %v2540_v59, %v2544_v24  ;;  %v996_v28 = vpop.f32.mrb[55].mxu0  ;;  %v1252_v29 = vpop.f32.mrb[55].mxu1 }
 0x165   : > { %v2310_v25 = vpack.c.bf16 %v1873_v11, %v1872_v15  ;;  %1533 = vst [vmem:[#allocation3 + $0xc0] sm:$0xff] %v1529_v21  ;;  %1661 = vst [vmem:[#allocation3 + $0x1c0] sm:$0xff] %v1657_v22  ;;  %v1530_v30 = vmax.f32 %v980_v60, %v996_v28  ;;  %v1658_v31 = vmax.f32 %v1236_v61, %v1252_v29 }
 0x166   : > { %2326 = vst [vmem:[%s2793_s15 + $0x28] sm:$0xff] %v2270_v20   ;;  %1536 = vst [vmem:[#allocation3 + $0xd8] sm:$0xff] %v1532_v26 }
 0x167   : > { %2334 = vst [vmem:[%s2793_s15 + $0x68] sm:$0xff] %v2310_v25   ;;  %1664 = vst [vmem:[#allocation3 + $0x1d8] sm:$0xff] %v1660_v27 }
 0x168   : > { %1534 = vst [vmem:[#allocation3 + $0xc8] sm:$0xff] %v1530_v30  ;;  %1662 = vst [vmem:[#allocation3 + $0x1c8] sm:$0xff] %v1658_v31 }
 0x169   : > { %v2483_v32 = vpop.f32.mrb[56].mxu0  ;;  %v2547_v33 = vpop.f32.mrb[56].mxu1 }
 0x16a   : > { %v1009_v34 = vpop.f32.mrb[57].mxu0  ;;  %v1265_v35 = vpop.f32.mrb[57].mxu1 }
 0x16b   : > { %v2484_v36 = vpop.f32.mrb[58].mxu0  ;;  %v2548_v37 = vpop.f32.mrb[58].mxu1 }
 0x16c   : > { %v1012_v39 = vpop.f32.mrb[59].mxu0  ;;  %v1268_v40 = vpop.f32.mrb[59].mxu1 }
 0x16d   : > { %v1707_v41 = vld [vmem:[#allocation3 + $0xd0] ss:$2 sm:$0xff]  ;;  %v1771_v42 = vld [vmem:[#allocation3 + $0xd1] ss:$2 sm:$0xff] }
 0x16e   : > { %v1739_v43 = vld [vmem:[#allocation3 + $0x1d0] ss:$2 sm:$0xff]  ;;  %v1821_v44 = vmax.f32 %v1707_v41, %v1771_v42  ;;  %v1803_v45 = vld [vmem:[#allocation3 + $0x1d1] ss:$2 sm:$0xff] }
 0x16f   : > { %v1705_v46 = vld [vmem:[#allocation3 + $0xc0] ss:$2 sm:$0xff]  ;;  %v1769_v47 = vld [vmem:[#allocation3 + $0xc1] ss:$2 sm:$0xff]  ;;  %v1837_v48 = vmax.f32 %v1739_v43, %v1803_v45 }
 0x170   : > { %v1820_v49 = vmax.f32 %v1705_v46, %v1769_v47  ;;  %v1737_v50 = vld [vmem:[#allocation3 + $0x1c0] ss:$2 sm:$0xff]  ;;  %v1801_v51 = vld [vmem:[#allocation3 + $0x1c1] ss:$2 sm:$0xff]  ;;  %v1859_v52 = vadd.f32 %v2785_v38, %v1821_v44 }
 0x171   : > { %v1836_v53 = vmax.f32 %v1737_v50, %v1801_v51  ;;  %v1875_v54 = vadd.f32 %v2785_v38, %v1837_v48  ;;  %v2487_v56 = vpop.f32.mrb[60].mxu0  ;;  %v2551_v57 = vpop.f32.mrb[60].mxu1 }
 0x172   : > { %v1858_v55 = vadd.f32 %v2785_v38, %v1820_v49  ;;  %v1547_v59 = vmax.f32 %v2483_v32, %v2487_v56  ;;  %v1675_v60 = vmax.f32 %v2547_v33, %v2551_v57  ;;  %v1025_v61 = vpop.f32.mrb[61].mxu0  ;;  %v1281_v62 = vpop.f32.mrb[61].mxu1 }
 0x173   : > { %v1874_v58 = vadd.f32 %v2785_v38, %v1836_v53  ;;  %v1545_v0 = vmax.f32 %v1009_v34, %v1025_v61  ;;  %v1673_v1 = vmax.f32 %v1265_v35, %v1281_v62  ;;  %v2488_v2 = vpop.f32.mrb[62].mxu0  ;;  %v2552_v3 = vpop.f32.mrb[62].mxu1 }
 0x174   : > { %v2275_v63 = vpack.c.bf16 %v1859_v52, %v1858_v55  ;;  %1551 = vst [vmem:[#allocation3 + $0xf0] sm:$0xff] %v1547_v59  ;;  %1679 = vst [vmem:[#allocation3 + $0x1f0] sm:$0xff] %v1675_v60  ;;  %v1548_v5 = vmax.f32 %v2484_v36, %v2488_v2  ;;  %v1676_v6 = vmax.f32 %v2548_v37, %v2552_v3  ;;  %v1028_v7 = vpop.f32.mrb[63].mxu0  ;;  %v1284_v8 = vpop.f32.mrb[63].mxu1 }
 0x175   : > { %v2315_v4 = vpack.c.bf16 %v1875_v54, %v1874_v58  ;;  %1549 = vst [vmem:[#allocation3 + $0xe0] sm:$0xff] %v1545_v0  ;;  %1677 = vst [vmem:[#allocation3 + $0x1e0] sm:$0xff] %v1673_v1  ;;  %v1546_v9 = vmax.f32 %v1012_v39, %v1028_v7  ;;  %v1674_v10 = vmax.f32 %v1268_v40, %v1284_v8 }
 0x176   : > { %2327 = vst [vmem:[%s2793_s15 + $0x30] sm:$0xff] %v2275_v63   ;;  %1552 = vst [vmem:[#allocation3 + $0xf8] sm:$0xff] %v1548_v5 }
 0x177   : > { %2335 = vst [vmem:[%s2793_s15 + $0x70] sm:$0xff] %v2315_v4   ;;  %1680 = vst [vmem:[#allocation3 + $0x1f8] sm:$0xff] %v1676_v6 }
 0x178   : > { %1550 = vst [vmem:[#allocation3 + $0xe8] sm:$0xff] %v1546_v9  ;;  %1678 = vst [vmem:[#allocation3 + $0x1e8] sm:$0xff] %v1674_v10 }
 0x17d   : > { %v1711_v11 = vld [vmem:[#allocation3 + $0xf0] ss:$2 sm:$0xff]  ;;  %v1775_v12 = vld [vmem:[#allocation3 + $0xf1] ss:$2 sm:$0xff] }
 0x17e   : > { %v1743_v13 = vld [vmem:[#allocation3 + $0x1f0] ss:$2 sm:$0xff]  ;;  %v1823_v14 = vmax.f32 %v1711_v11, %v1775_v12  ;;  %v1807_v15 = vld [vmem:[#allocation3 + $0x1f1] ss:$2 sm:$0xff] }
 0x17f   : > { %v1709_v16 = vld [vmem:[#allocation3 + $0xe0] ss:$2 sm:$0xff]  ;;  %v1773_v17 = vld [vmem:[#allocation3 + $0xe1] ss:$2 sm:$0xff]  ;;  %v1839_v18 = vmax.f32 %v1743_v13, %v1807_v15 }
 0x180   : > { %v1822_v19 = vmax.f32 %v1709_v16, %v1773_v17  ;;  %v1741_v20 = vld [vmem:[#allocation3 + $0x1e0] ss:$2 sm:$0xff]  ;;  %v1805_v21 = vld [vmem:[#allocation3 + $0x1e1] ss:$2 sm:$0xff]  ;;  %v1861_v22 = vadd.f32 %v2785_v38, %v1823_v14 }
 0x181   : > { %v1838_v23 = vmax.f32 %v1741_v20, %v1805_v21  ;;  %v1877_v24 = vadd.f32 %v2785_v38, %v1839_v18 }
 0x182   : > { %v1860_v25 = vadd.f32 %v2785_v38, %v1822_v19 }
 0x183   : > { %v1876_v26 = vadd.f32 %v2785_v38, %v1838_v23 }
 0x184   : > { %v2280_v27 = vpack.c.bf16 %v1861_v22, %v1860_v25 }
 0x185   : > { %v2320_v28 = vpack.c.bf16 %v1877_v24, %v1876_v26 }
 0x186   : > { %2328 = vst [vmem:[%s2793_s15 + $0x38] sm:$0xff] %v2280_v27  }
 0x187   : > { %2336 = vst [vmem:[%s2793_s15 + $0x78] sm:$0xff] %v2320_v28  }
 0x188 PF: > { %s13_s12 = sadd.s32 1, %s2655_s12  }
 0x189   : > { %p10_p5 = scmp.ge.s32.totalorder %s13_s12, 4  }
 0x18b   :  { %12 = sbr.rel (!%p10_p5) target bundleno = 1 (0x1), region = 125 }

// kernel: tudui_forward.5
= control target key start
LH: loop header
LB: loop body
LE: loop exit
PB: predicated region body
PF: predicated region fallthrough
CT: control target
= control target key end

     0   :  { %s3116_s12 = smov 0   ;;  %s3640_s0 = inlined_call_operand.vmem [shape: bf16[512,896], index: 0, kind: input, shape index: {}]   ;;  %s3641_s1 = inlined_call_operand.vmem [shape: bf16[896,128], index: 1, kind: input, shape index: {}]   ;;  %s3642_s2 = inlined_call_operand.vmem [shape: f32[1,128], index: 2, kind: input, shape index: {}]   ;;  %s3643_s3 = inlined_call_operand.vmem [shape: bf16[128,128], index: 3, kind: output, shape index: {}]  }
   0x1 LB: > { %s2220_s13 = sadd.s32 4294967295, %s3094_s12   ;;  %p2224_p0 = scmp.ge.s32.totalorder %s3094_s12, 1  ;;  %s3094_s12 = sphi %s3116_s12, %s13_s12  }
   0x2   : > { %p139_p1 = scmp.lt.s32.totalorder %s3094_s12, 3 }
   0x4   : > { %p140_p2 = pnand %p2224_p0, %p139_p1 }
   0x5   : > { %v2872_v0 = vld [vmem:[%s3641_s1 + $0x40] sm:$0xff] (!%p140_p2)   ;;  %s2225_s16 = sshll.u32 (!%p140_p2), %s2220_s13, 5  ;;  %v2874_v2 = vld [vmem:[%s3641_s1 + $0x48] sm:$0xff] (!%p140_p2)   ;;  %v2876_v4 = vld [vmem:[%s3641_s1 + $0x50] sm:$0xff] (!%p140_p2)  }
   0x6   : > { %143 = sbr.rel (%p140_p2) target bundleno = 492 (0x1ec), region = 32  ;;  %v2873_v1 = vld [vmem:[%s3641_s1] sm:$0xff] (!%p140_p2)   ;;  %2439 = vmatprep.subr.bf16.mxu0 (!%p140_p2), %v2872_v0  ;;  %2847 = vmatprep.subr.bf16.mxu1 (!%p140_p2), %v2872_v0  ;;  %p165_p3 = scmp.lt.s32.totalorder (!%p140_p2), %s2225_s16, 63  ;;  %v2875_v3 = vld [vmem:[%s3641_s1 + $0x8] sm:$0xff] (!%p140_p2)   ;;  %v2877_v5 = vld [vmem:[%s3641_s1 + $0x10] sm:$0xff] (!%p140_p2)  }
   0x7   : > { %2440 = vmatpush3.bf16.msra.mxu0 (!%p140_p2), %v2873_v1  ;;  %2855 = vmatpush3.bf16.msra.mxu1 (!%p140_p2), %v2873_v1  ;;  %v2878_v6 = vld [vmem:[%s3641_s1 + $0x58] sm:$0xff] (!%p140_p2)   ;;  %v2880_v8 = vld [vmem:[%s3641_s1 + $0x60] sm:$0xff] (!%p140_p2)   ;;  %v2882_v10 = vld [vmem:[%s3641_s1 + $0x68] sm:$0xff] (!%p140_p2)  }
   0x8   : > { %2441 = vmatprep.subr.bf16.mxu0 (!%p140_p2), %v2874_v2  ;;  %2848 = vmatprep.subr.bf16.mxu1 (!%p140_p2), %v2874_v2  ;;  %v2879_v7 = vld [vmem:[%s3641_s1 + $0x18] sm:$0xff] (!%p140_p2)   ;;  %v2881_v9 = vld [vmem:[%s3641_s1 + $0x20] sm:$0xff] (!%p140_p2)   ;;  %v2883_v13 = vld [vmem:[%s3641_s1 + $0x28] sm:$0xff] (!%p140_p2)  }
   0x9   : > { %v2884_v14 = vld [vmem:[%s3641_s1 + $0x70] sm:$0xff] (!%p140_p2)   ;;  %v2886_v16 = vld [vmem:[%s3641_s1 + $0x78] sm:$0xff] (!%p140_p2)   ;;  %v2894_v18 = vld [vmem:[%s3641_s1 + $0xc0] sm:$0xff] (!%p140_p2)  }
   0xa   : > { %v2885_v15 = vld [vmem:[%s3641_s1 + $0x30] sm:$0xff] (!%p140_p2)   ;;  %v2887_v17 = vld [vmem:[%s3641_s1 + $0x38] sm:$0xff] (!%p140_p2)   ;;  %v2895_v21 = vld [vmem:[%s3641_s1 + $0x140] sm:$0xff] (!%p140_p2)  }
   0xb   : > { %2442 = vmatpush3.bf16.msra.mxu0 (!%p140_p2), %v2875_v3  ;;  %2856 = vmatpush3.bf16.msra.mxu1 (!%p140_p2), %v2875_v3  ;;  %v2896_v22 = vld [vmem:[%s3641_s1 + $0x80] sm:$0xff] (!%p140_p2)   ;;  %v2898_v24 = vld [vmem:[%s3641_s1 + $0xc8] sm:$0xff] (!%p140_p2)   ;;  %v2906_v32 = vld [vmem:[%s3641_s1 + $0xd0] sm:$0xff] (!%p140_p2)  }
   0xc   : > { %2443 = vmatprep.subr.bf16.mxu0 (!%p140_p2), %v2876_v4  ;;  %2849 = vmatprep.subr.bf16.mxu1 (!%p140_p2), %v2876_v4  ;;  %v2897_v23 = vld [vmem:[%s3641_s1 + $0x100] sm:$0xff] (!%p140_p2)   ;;  %v2909_v27 = vld [vmem:[%s3641_s1 + $0x148] sm:$0xff] (!%p140_p2)   ;;  %v2907_v33 = vld [vmem:[%s3641_s1 + $0x90] sm:$0xff] (!%p140_p2)  }
   0xd   : > { %s3645_s16 = smov (!%p165_p3, %s2225_s16), 63  ;;  %v2899_v28 = vld [vmem:[%s3641_s1 + $0x88] sm:$0xff]   ;;  %v2908_v34 = vld [vmem:[%s3641_s1 + $0xd8] sm:$0xff]   ;;  %v2918_v38 = vld [vmem:[%s3641_s1 + $0xe0] sm:$0xff]  }
   0xe   : > { %s2863_s29 = smul.u32 28, %s3645_s16  ;;  %v2911_v29 = vld [vmem:[%s3641_s1 + $0x108] sm:$0xff]   ;;  %v2910_v37 = vld [vmem:[%s3641_s1 + $0x98] sm:$0xff]   ;;  %v2929_v41 = vld [vmem:[%s3641_s1 + $0x150] sm:$0xff]  }
   0xf   : > { %2444 = vmatpush3.bf16.msra.mxu0 %v2877_v5  ;;  %2857 = vmatpush3.bf16.msra.mxu1 %v2877_v5  ;;  %v2919_v42 = vld [vmem:[%s3641_s1 + $0xa0] sm:$0xff]   ;;  %v2920_v43 = vld [vmem:[%s3641_s1 + $0xe8] sm:$0xff]   ;;  %v2931_v44 = vld [vmem:[%s3641_s1 + $0x110] sm:$0xff]  }
  0x10   : > { %2445 = vmatprep.subr.bf16.mxu0 %v2878_v6  ;;  %2850 = vmatprep.subr.bf16.mxu1 %v2878_v6  ;;  %s3156_s9 = scalar_lea.vmem %s3640_s0, %s2863_s29  ;;  %v2921_v47 = vld [vmem:[%s3641_s1 + $0xa8] sm:$0xff]   ;;  %v2928_v48 = vld [vmem:[%s3641_s1 + $0xf0] sm:$0xff]   ;;  %v2940_v51 = vld [vmem:[%s3641_s1 + $0x158] sm:$0xff]  }
  0x11   : > { %v2890_v11 = vld [vmem:[%s3156_s9 + $0x4] ss:$28 sps:$4 sm:$0xff]   ;;  %v2900_v25 = vld [vmem:[%s3156_s9 + $0x3c] ss:$28 sps:$4 sm:$0xff]   ;;  %v2912_v35 = vld [vmem:[%s3156_s9 + $0x74] ss:$28 sps:$4 sm:$0xff]  }
  0x12   : > { %v2893_v12 = vld [vmem:[%s3156_s9 + $0x2a4] ss:$28 sps:$4 sm:$0xff]   ;;  %1362 = vmatprep.mubr.bf16.mxu0 %v2890_v11  ;;  %v2902_v26 = vld [vmem:[%s3156_s9 + $0x2dc] ss:$28 sps:$4 sm:$0xff]   ;;  %v2914_v36 = vld [vmem:[%s3156_s9 + $0x314] ss:$28 sps:$4 sm:$0xff]  }
  0x13   : > { %2446 = vmatpush3.bf16.msra.mxu0 %v2879_v7  ;;  %2858 = vmatpush3.bf16.msra.mxu1 %v2879_v7  ;;  %v2888_v19 = vld [vmem:[%s3156_s9] ss:$28 sps:$4 sm:$0xff]   ;;  %v2904_v30 = vld [vmem:[%s3156_s9 + $0x38] ss:$28 sps:$4 sm:$0xff]   ;;  %v2916_v39 = vld [vmem:[%s3156_s9 + $0x70] ss:$28 sps:$4 sm:$0xff]  }
  0x14   : > { %2447 = vmatprep.subr.bf16.mxu0 %v2880_v8  ;;  %2851 = vmatprep.subr.bf16.mxu1 %v2880_v8  ;;  %v2891_v20 = vld [vmem:[%s3156_s9 + $0x2a0] ss:$28 sps:$4 sm:$0xff]   ;;  %v2905_v31 = vld [vmem:[%s3156_s9 + $0x2d8] ss:$28 sps:$4 sm:$0xff]   ;;  %v2917_v40 = vld [vmem:[%s3156_s9 + $0x310] ss:$28 sps:$4 sm:$0xff]  }
  0x15   : > { %1458 = vmatprep.mubr.bf16.mxu1 %v2893_v12  ;;  %v2922_v45 = vld [vmem:[%s3156_s9 + $0xac] ss:$28 sps:$4 sm:$0xff]   ;;  %v2930_v52 = vld [vmem:[%s3641_s1 + $0xb0] sm:$0xff]   ;;  %v2942_v53 = vld [vmem:[%s3641_s1 + $0x118] sm:$0xff]  }
  0x16   : > { %v2924_v46 = vld [vmem:[%s3156_s9 + $0x34c] ss:$28 sps:$4 sm:$0xff]   ;;  %v2934_v54 = vld [vmem:[%s3156_s9 + $0xe4] ss:$28 sps:$4 sm:$0xff]   ;;  %v2932_v55 = vld [vmem:[%s3641_s1 + $0xf8] sm:$0xff]  }
  0x17   : > { %2448 = vmatpush3.bf16.msra.mxu0 %v2881_v9  ;;  %2859 = vmatpush3.bf16.msra.mxu1 %v2881_v9  ;;  %v2926_v49 = vld [vmem:[%s3156_s9 + $0xa8] ss:$28 sps:$4 sm:$0xff]   ;;  %v2933_v57 = vld [vmem:[%s3641_s1 + $0xb8] sm:$0xff]   ;;  %v2949_v6 = vld [vmem:[%s3156_s9 + $0x154] ss:$28 sps:$4 sm:$0xff]  }
  0x18   : > { %2449 = vmatprep.subr.bf16.mxu0 %v2882_v10  ;;  %2852 = vmatprep.subr.bf16.mxu1 %v2882_v10  ;;  %v2927_v50 = vld [vmem:[%s3156_s9 + $0x348] ss:$28 sps:$4 sm:$0xff]   ;;  %v2939_v62 = vld [vmem:[%s3156_s9 + $0xe0] ss:$28 sps:$4 sm:$0xff]   ;;  %v2947_v4 = vld [vmem:[%s3156_s9 + $0x118] ss:$28 sps:$4 sm:$0xff]  }
  0x19   : > { %v2938_v56 = vld [vmem:[%s3156_s9 + $0xc] ss:$28 sps:$4 sm:$0xff]   ;;  %v2941_v58 = vld [vmem:[%s3641_s1 + $0x180] sm:$0xff]   ;;  %v2943_v63 = vld [vmem:[%s3156_s9 + $0x11c] ss:$28 sps:$4 sm:$0xff]  }
  0x1a   : > { %v2936_v59 = vld [vmem:[%s3156_s9 + $0x8] ss:$28 sps:$4 sm:$0xff]   ;;  %v2948_v5 = vld [vmem:[%s3156_s9 + $0x40] ss:$28 sps:$4 sm:$0xff]   ;;  %v2972_v7 = vld [vmem:[%s3641_s1 + $0x190] sm:$0xff]  }
  0x1b   : > { %2450 = vmatpush3.bf16.msra.mxu0 %v2883_v13  ;;  %2860 = vmatpush3.bf16.msra.mxu1 %v2883_v13  ;;  %v2955_v60 = vld [vmem:[%s3641_s1 + $0x160] sm:$0xff]   ;;  %v2957_v1 = vld [vmem:[%s3641_s1 + $0x188] sm:$0xff]   ;;  %v2951_v8 = vld [vmem:[%s3156_s9 + $0x7c] ss:$28 sps:$4 sm:$0xff]  }
  0x1c   : > { %2451 = vmatprep.subr.bf16.mxu0 %v2884_v14  ;;  %2853 = vmatprep.subr.bf16.mxu1 %v2884_v14  ;;  %v2956_v61 = vld [vmem:[%s3641_s1 + $0x120] sm:$0xff]   ;;  %v2964_v2 = vld [vmem:[%s3641_s1 + $0x168] sm:$0xff]   ;;  %v2979_v9 = vld [vmem:[%s3641_s1 + $0x170] sm:$0xff]  }
  0x1d   : > { %v2945_v0 = vld [vmem:[%s3156_s9 + $0x44] ss:$28 sps:$4 sm:$0xff]   ;;  %v2965_v3 = vld [vmem:[%s3641_s1 + $0x128] sm:$0xff]   ;;  %v2980_v10 = vld [vmem:[%s3641_s1 + $0x130] sm:$0xff]  }
  0x1e   : > { %v2953_v11 = vld [vmem:[%s3156_s9 + $0x150] ss:$28 sps:$4 sm:$0xff]   ;;  %v2954_v12 = vld [vmem:[%s3156_s9 + $0x78] ss:$28 sps:$4 sm:$0xff]  }
  0x1f   : > { %2452 = vmatpush3.bf16.msra.mxu0 %v2885_v15  ;;  %2861 = vmatpush3.bf16.msra.mxu1 %v2885_v15  ;;  %v2958_v13 = vld [vmem:[%s3156_s9 + $0x18c] ss:$28 sps:$4 sm:$0xff]   ;;  %v2960_v14 = vld [vmem:[%s3156_s9 + $0xb4] ss:$28 sps:$4 sm:$0xff]   ;;  %v2987_v15 = vld [vmem:[%s3641_s1 + $0x178] sm:$0xff]  }
  0x20   : > { %2453 = vmatprep.subr.bf16.mxu0 %v2886_v16  ;;  %2854 = vmatprep.subr.bf16.mxu1 %v2886_v16  ;;  %v2988_v16 = vld [vmem:[%s3641_s1 + $0x198] sm:$0xff]  }
  0x23   : > { %2454 = vmatpush3.bf16.msra.mxu0 %v2887_v17  ;;  %2862 = vmatpush3.bf16.msra.mxu1 %v2887_v17  ;;  %v2989_v17 = vld [vmem:[%s3641_s1 + $0x138] sm:$0xff]  }
  0x24   : > { %2551 = vmatprep.subr.bf16.mxu1 %v2894_v18  ;;  %2663 = vmatprep.subr.bf16.mxu0 %v2895_v21  ;;  %v2962_v18 = vld [vmem:[%s3156_s9 + $0x188] ss:$28 sps:$4 sm:$0xff]  }
  0x25   : > { %v2968_v21 = vld [vmem:[%s3156_s9 + $0xec] ss:$28 sps:$4 sm:$0xff]  }
  0x26   : > { %1363 = vmatmul.mubr.bf16.vlgmr.msra.gmra.mrb[0].mxu0 %v2888_v19  ;;  %1459 = vmatmul.mubr.bf16.vlgmr.msra.gmra.mrb[0].mxu1 %v2891_v20  ;;  %v2963_v19 = vld [vmem:[%s3156_s9 + $0xb0] ss:$28 sps:$4 sm:$0xff]   ;;  %v2966_v20 = vld [vmem:[%s3156_s9 + $0x1c4] ss:$28 sps:$4 sm:$0xff]  }
  0x27   : > { %2552 = vmatpush3.bf16.msra.mxu1 %v2896_v22  ;;  %2664 = vmatpush3.bf16.msra.mxu0 %v2897_v23  ;;  %v3002_v22 = vld [vmem:[%s3641_s1 + $0x1a0] sm:$0xff]  }
  0x28   : > { %2553 = vmatprep.subr.bf16.mxu1 %v2898_v24  ;;  %1370 = vmatprep.mubr.bf16.mxu0 %v2900_v25  ;;  %v2970_v23 = vld [vmem:[%s3156_s9 + $0x1c0] ss:$28 sps:$4 sm:$0xff]   ;;  %v2971_v24 = vld [vmem:[%s3156_s9 + $0xe8] ss:$28 sps:$4 sm:$0xff]  }
  0x29   : > { %1466 = vmatprep.mubr.bf16.mxu1 %v2902_v26  ;;  %2665 = vmatprep.subr.bf16.mxu0 %v2909_v27  ;;  %v3015_v25 = vld [vmem:[%s3641_s1 + $0x1a8] sm:$0xff]   ;;  %v2973_v26 = vld [vmem:[%s3156_s9 + $0x1fc] ss:$28 sps:$4 sm:$0xff]   ;;  %v2975_v27 = vld [vmem:[%s3156_s9 + $0x124] ss:$28 sps:$4 sm:$0xff]  }
  0x2b   : > { %2554 = vmatpush3.bf16.msra.mxu1 %v2899_v28  ;;  %2666 = vmatpush3.bf16.msra.mxu0 %v2911_v29  ;;  %v3028_v28 = vld [vmem:[%s3641_s1 + $0x1b0] sm:$0xff]  }
  0x2c   : > { %2555 = vmatprep.subr.bf16.mxu1 %v2906_v32  ;;  %2667 = vmatprep.subr.bf16.mxu0 %v2929_v41  ;;  %v2977_v29 = vld [vmem:[%s3156_s9 + $0x1f8] ss:$28 sps:$4 sm:$0xff]  }
  0x2d   : > { %v2983_v32 = vld [vmem:[%s3156_s9 + $0x15c] ss:$28 sps:$4 sm:$0xff]   ;;  %v3000_v41 = vld [vmem:[%s3156_s9 + $0x14] ss:$28 sps:$4 sm:$0xff]  }
  0x2e   : > { %1371 = vmatmul.mubr.bf16.gmra.mrb[4].mxu0 %v2904_v30  ;;  %1467 = vmatmul.mubr.bf16.gmra.mrb[4].mxu1 %v2905_v31  ;;  %v2978_v30 = vld [vmem:[%s3156_s9 + $0x120] ss:$28 sps:$4 sm:$0xff]   ;;  %v2981_v31 = vld [vmem:[%s3156_s9 + $0x234] ss:$28 sps:$4 sm:$0xff]  }
  0x2f   : > { %2556 = vmatpush3.bf16.msra.mxu1 %v2907_v33  ;;  %1378 = vmatprep.mubr.bf16.mxu0 %v2912_v35  ;;  %v3041_v33 = vld [vmem:[%s3641_s1 + $0x1b8] sm:$0xff]  }
  0x30   : > { %2557 = vmatprep.subr.bf16.mxu1 %v2908_v34  ;;  %1474 = vmatprep.mubr.bf16.mxu1 %v2914_v36  ;;  %v2985_v34 = vld [vmem:[%s3156_s9 + $0x230] ss:$28 sps:$4 sm:$0xff]   ;;  %v2986_v35 = vld [vmem:[%s3156_s9 + $0x158] ss:$28 sps:$4 sm:$0xff]  }
  0x31   : > { %2668 = vmatpush3.bf16.msra.mxu0 %v2931_v44  ;;  %v2990_v36 = vld [vmem:[%s3156_s9 + $0x26c] ss:$28 sps:$4 sm:$0xff]   ;;  %v3003_v44 = vld [vmem:[%s3156_s9 + $0x204] ss:$28 sps:$4 sm:$0xff]  }
  0x32   : > { %2669 = vmatprep.subr.bf16.mxu0 %v2940_v51  ;;  %v3014_v51 = vld [vmem:[%s3156_s9 + $0x80] ss:$28 sps:$4 sm:$0xff]  }
  0x33   : > { %2558 = vmatpush3.bf16.msra.mxu1 %v2910_v37  ;;  %v2992_v37 = vld [vmem:[%s3156_s9 + $0x194] ss:$28 sps:$4 sm:$0xff]  }
  0x34   : > { %2559 = vmatprep.subr.bf16.mxu1 %v2918_v38  ;;  %v2994_v38 = vld [vmem:[%s3156_s9 + $0x268] ss:$28 sps:$4 sm:$0xff]  }
  0x35   : > { %2670 = vmatpush3.bf16.msra.mxu0 %v2942_v53  ;;  %v3018_v53 = vld [vmem:[%s3156_s9 + $0xbc] ss:$28 sps:$4 sm:$0xff]  }
  0x36   : > { %1379 = vmatmul.mubr.bf16.gmra.mrb[8].mxu0 %v2916_v39  ;;  %1475 = vmatmul.mubr.bf16.gmra.mrb[8].mxu1 %v2917_v40  ;;  %v2995_v39 = vld [vmem:[%s3156_s9 + $0x190] ss:$28 sps:$4 sm:$0xff]  }
  0x37   : > { %2560 = vmatpush3.bf16.msra.mxu1 %v2919_v42  ;;  %1386 = vmatprep.mubr.bf16.mxu0 %v2922_v45  ;;  %v2996_v40 = vld [vmem:[%s3156_s9 + $0x1cc] ss:$28 sps:$4 sm:$0xff]  }
  0x38   : > { %2561 = vmatprep.subr.bf16.mxu1 %v2920_v43  ;;  %1482 = vmatprep.mubr.bf16.mxu1 %v2924_v46  ;;  %v2998_v42 = vld [vmem:[%s3156_s9 + $0x10] ss:$28 sps:$4 sm:$0xff]   ;;  %v3001_v43 = vld [vmem:[%s3156_s9 + $0x1c8] ss:$28 sps:$4 sm:$0xff]   ;;  %v3007_v46 = vld [vmem:[%s3156_s9 + $0x200] ss:$28 sps:$4 sm:$0xff]  }
  0x39   : > { %2671 = vmatprep.subr.bf16.mxu0 %v2955_v60  ;;  %v3005_v45 = vld [vmem:[%s3156_s9 + $0x4c] ss:$28 sps:$4 sm:$0xff]   ;;  %v3029_v60 = vld [vmem:[%s3156_s9 + $0x2e4] ss:$28 sps:$4 sm:$0xff]  }
  0x3a   : > { %2672 = vmatpush3.bf16.msra.mxu0 %v2956_v61  ;;  %v3031_v61 = vld [vmem:[%s3156_s9 + $0x12c] ss:$28 sps:$4 sm:$0xff]  }
  0x3b   : > { %2562 = vmatpush3.bf16.msra.mxu1 %v2921_v47  ;;  %2673 = vmatprep.subr.bf16.mxu0 %v2964_v2  ;;  %v3008_v47 = vld [vmem:[%s3156_s9 + $0x48] ss:$28 sps:$4 sm:$0xff]   ;;  %v3039_v2 = vld [vmem:[%s3156_s9 + $0x318] ss:$28 sps:$4 sm:$0xff]  }
  0x3c   : > { %2563 = vmatprep.subr.bf16.mxu1 %v2928_v48  ;;  %v3009_v48 = vld [vmem:[%s3156_s9 + $0x23c] ss:$28 sps:$4 sm:$0xff]  }
  0x3e   : > { %1387 = vmatmul.mubr.bf16.gmra.mrb[12].mxu0 %v2926_v49  ;;  %1483 = vmatmul.mubr.bf16.gmra.mrb[12].mxu1 %v2927_v50  ;;  %v3011_v49 = vld [vmem:[%s3156_s9 + $0x84] ss:$28 sps:$4 sm:$0xff]   ;;  %v3013_v50 = vld [vmem:[%s3156_s9 + $0x238] ss:$28 sps:$4 sm:$0xff]  }
  0x3f   : > { %2564 = vmatpush3.bf16.msra.mxu1 %v2930_v52  ;;  %1394 = vmatprep.mubr.bf16.mxu0 %v2934_v54  ;;  %v3016_v52 = vld [vmem:[%s3156_s9 + $0x274] ss:$28 sps:$4 sm:$0xff]  }
  0x40   : > { %2565 = vmatprep.subr.bf16.mxu1 %v2932_v55  ;;  %1523 = vmatprep.mubr.bf16.mxu1 %v2938_v56  ;;  %v3020_v54 = vld [vmem:[%s3156_s9 + $0x270] ss:$28 sps:$4 sm:$0xff]   ;;  %v3021_v55 = vld [vmem:[%s3156_s9 + $0xb8] ss:$28 sps:$4 sm:$0xff]  }
  0x41   : > { %2674 = vmatpush3.bf16.msra.mxu0 %v2965_v3  ;;  %v3022_v56 = vld [vmem:[%s3156_s9 + $0x2ac] ss:$28 sps:$4 sm:$0xff]   ;;  %v3040_v3 = vld [vmem:[%s3156_s9 + $0x160] ss:$28 sps:$4 sm:$0xff]  }
  0x42   : > { %2675 = vmatprep.subr.bf16.mxu0 %v2979_v9  ;;  %v3050_v9 = vld [vmem:[%s3156_s9 + $0x18] ss:$28 sps:$4 sm:$0xff]  }
  0x43   : > { %2566 = vmatpush3.bf16.msra.mxu1 %v2933_v57  ;;  %v3024_v57 = vld [vmem:[%s3156_s9 + $0xf4] ss:$28 sps:$4 sm:$0xff]  }
  0x44   : > { %2799 = vmatprep.subr.bf16.mxu1 %v2941_v58 }
  0x45   : > { %2676 = vmatpush3.bf16.msra.mxu0 %v2980_v10  ;;  %v3051_v10 = vld [vmem:[%s3156_s9 + $0x1d0] ss:$28 sps:$4 sm:$0xff]  }
  0x46   : > { %1395 = vmatmul.mubr.bf16.gmra.mrb[16].mxu0 %v2939_v62  ;;  %1524 = vmatmul.mubr.bf16.vlgmr.msra.gmra.mrb[16].mxu1 %v2936_v59  ;;  %v3027_v59 = vld [vmem:[%s3156_s9 + $0xf0] ss:$28 sps:$4 sm:$0xff]   ;;  %v3033_v62 = vld [vmem:[%s3156_s9 + $0x2e0] ss:$28 sps:$4 sm:$0xff]  }
  0x47   : > { %2800 = vmatpush3.bf16.msra.mxu1 %v2941_v58  ;;  %1402 = vmatprep.mubr.bf16.mxu0 %v2943_v63  ;;  %v3026_v58 = vld [vmem:[%s3156_s9 + $0x2a8] ss:$28 sps:$4 sm:$0xff]  }
  0x48   : > { %1531 = vmatprep.mubr.bf16.mxu1 %v2945_v0  ;;  %2801 = vmatprep.subr.bf16.mxu1 %v2957_v1  ;;  %v3034_v63 = vld [vmem:[%s3156_s9 + $0x128] ss:$28 sps:$4 sm:$0xff]   ;;  %v3035_v0 = vld [vmem:[%s3156_s9 + $0x31c] ss:$28 sps:$4 sm:$0xff]  }
  0x49   : > { %2677 = vmatprep.subr.bf16.mxu0 %v2987_v15  ;;  %v3057_v15 = vld [vmem:[%s3156_s9 + $0xc0] ss:$28 sps:$4 sm:$0xff]  }
  0x4a   : > { %2678 = vmatpush3.bf16.msra.mxu0 %v2989_v17  ;;  %v3060_v17 = vld [vmem:[%s3156_s9 + $0xf8] ss:$28 sps:$4 sm:$0xff]  }
  0x4b   : > { %2802 = vmatpush3.bf16.msra.mxu1 %v2957_v1  ;;  %v3037_v1 = vld [vmem:[%s3156_s9 + $0x164] ss:$28 sps:$4 sm:$0xff]  }
  0x4c   : > { %2803 = vmatprep.subr.bf16.mxu1 %v2972_v7 }
  0x4e   : > { %1403 = vmatmul.mubr.bf16.gmra.mrb[20].mxu0 %v2947_v4  ;;  %1532 = vmatmul.mubr.bf16.gmra.mrb[20].mxu1 %v2948_v5  ;;  %v3042_v4 = vld [vmem:[%s3156_s9 + $0x354] ss:$28 sps:$4 sm:$0xff]   ;;  %v3044_v5 = vld [vmem:[%s3156_s9 + $0x19c] ss:$28 sps:$4 sm:$0xff]  }
  0x4f   : > { %1410 = vmatprep.mubr.bf16.mxu0 %v2949_v6  ;;  %1539 = vmatprep.mubr.bf16.mxu1 %v2951_v8  ;;  %v3046_v6 = vld [vmem:[%s3156_s9 + $0x350] ss:$28 sps:$4 sm:$0xff]  }
  0x50   : > { %2804 = vmatpush3.bf16.msra.mxu1 %v2972_v7  ;;  %v3047_v7 = vld [vmem:[%s3156_s9 + $0x198] ss:$28 sps:$4 sm:$0xff]  }
  0x51   : > { %2805 = vmatprep.subr.bf16.mxu1 %v2988_v16  ;;  %v3048_v8 = vld [vmem:[%s3156_s9 + $0x1d4] ss:$28 sps:$4 sm:$0xff]  }
  0x54   : > { %2806 = vmatpush3.bf16.msra.mxu1 %v2988_v16  ;;  %v3058_v16 = vld [vmem:[%s3156_s9 + $0x244] ss:$28 sps:$4 sm:$0xff]  }
  0x55   : > { %2807 = vmatprep.subr.bf16.mxu1 %v3002_v22 }
  0x56   : > { %1411 = vmatmul.mubr.bf16.gmra.mrb[24].mxu0 %v2953_v11  ;;  %1540 = vmatmul.mubr.bf16.gmra.mrb[24].mxu1 %v2954_v12  ;;  %v3052_v11 = vld [vmem:[%s3156_s9 + $0x50] ss:$28 sps:$4 sm:$0xff]  }
  0x57   : > { %1418 = vmatprep.mubr.bf16.mxu0 %v2958_v13  ;;  %1547 = vmatprep.mubr.bf16.mxu1 %v2960_v14  ;;  %v3053_v12 = vld [vmem:[%s3156_s9 + $0x20c] ss:$28 sps:$4 sm:$0xff]  }
  0x58   : > { %2808 = vmatpush3.bf16.msra.mxu1 %v3002_v22  ;;  %v3055_v13 = vld [vmem:[%s3156_s9 + $0x88] ss:$28 sps:$4 sm:$0xff]   ;;  %v3066_v22 = vld [vmem:[%s3156_s9 + $0x278] ss:$28 sps:$4 sm:$0xff]  }
  0x59   : > { %2809 = vmatprep.subr.bf16.mxu1 %v3015_v25  ;;  %v3056_v14 = vld [vmem:[%s3156_s9 + $0x208] ss:$28 sps:$4 sm:$0xff]  }
  0x5c   : > { %2810 = vmatpush3.bf16.msra.mxu1 %v3015_v25  ;;  %v3070_v25 = vld [vmem:[%s3156_s9 + $0x1d8] ss:$28 sps:$4 sm:$0xff]  }
  0x5d   : > { %2811 = vmatprep.subr.bf16.mxu1 %v3028_v28 }
  0x5e   : > { %1419 = vmatmul.mubr.bf16.gmra.mrb[28].mxu0 %v2962_v18  ;;  %1548 = vmatmul.mubr.bf16.gmra.mrb[28].mxu1 %v2963_v19  ;;  %v3061_v18 = vld [vmem:[%s3156_s9 + $0x240] ss:$28 sps:$4 sm:$0xff]   ;;  %v3062_v19 = vld [vmem:[%s3156_s9 + $0x130] ss:$28 sps:$4 sm:$0xff]  }
  0x5f   : > { %1426 = vmatprep.mubr.bf16.mxu0 %v2966_v20  ;;  %1555 = vmatprep.mubr.bf16.mxu1 %v2968_v21  ;;  %v3063_v20 = vld [vmem:[%s3156_s9 + $0x27c] ss:$28 sps:$4 sm:$0xff]   ;;  %v3065_v21 = vld [vmem:[%s3156_s9 + $0x168] ss:$28 sps:$4 sm:$0xff]  }
  0x60   : > { %2812 = vmatpush3.bf16.msra.mxu1 %v3028_v28  ;;  %v3073_v28 = vld [vmem:[%s3156_s9 + $0x2ec] ss:$28 sps:$4 sm:$0xff]  }
  0x61   : > { %2813 = vmatprep.subr.bf16.mxu1 %v3041_v33 }
  0x64   : > { %2814 = vmatpush3.bf16.msra.mxu1 %v3041_v33  ;;  %v3080_v33 = vld [vmem:[%s3156_s9 + $0x2b8] ss:$28 sps:$4 sm:$0xff]  }
  0x66   : > { %1427 = vmatmul.mubr.bf16.gmra.mrb[32].mxu0 %v2970_v23  ;;  %1556 = vmatmul.mubr.bf16.gmra.mrb[32].mxu1 %v2971_v24  ;;  %v3067_v23 = vld [vmem:[%s3156_s9 + $0x1a0] ss:$28 sps:$4 sm:$0xff]   ;;  %v3068_v24 = vld [vmem:[%s3156_s9 + $0x2b4] ss:$28 sps:$4 sm:$0xff]  }
  0x67   : > { %1434 = vmatprep.mubr.bf16.mxu0 %v2973_v26  ;;  %1563 = vmatprep.mubr.bf16.mxu1 %v2975_v27  ;;  %v3071_v26 = vld [vmem:[%s3156_s9 + $0x2b0] ss:$28 sps:$4 sm:$0xff]  }
  0x68   : > { %v3072_v27 = vld [vmem:[%s3156_s9 + $0x210] ss:$28 sps:$4 sm:$0xff]  }
  0x6e   : > { %1435 = vmatmul.mubr.bf16.gmra.mrb[36].mxu0 %v2977_v29  ;;  %1564 = vmatmul.mubr.bf16.gmra.mrb[36].mxu1 %v2978_v30  ;;  %v3075_v29 = vld [vmem:[%s3156_s9 + $0x248] ss:$28 sps:$4 sm:$0xff]  }
  0x6f   : > { %1442 = vmatprep.mubr.bf16.mxu0 %v2981_v31  ;;  %1571 = vmatprep.mubr.bf16.mxu1 %v2983_v32  ;;  %v3076_v30 = vld [vmem:[%s3156_s9 + $0x2e8] ss:$28 sps:$4 sm:$0xff]   ;;  %v3077_v31 = vld [vmem:[%s3156_s9 + $0x280] ss:$28 sps:$4 sm:$0xff]  }
  0x70   : > { %v3078_v32 = vld [vmem:[%s3156_s9 + $0x324] ss:$28 sps:$4 sm:$0xff]  }
  0x76   : > { %1443 = vmatmul.mubr.bf16.gmra.mrb[40].mxu0 %v2985_v34  ;;  %1572 = vmatmul.mubr.bf16.gmra.mrb[40].mxu1 %v2986_v35  ;;  %v3081_v34 = vld [vmem:[%s3156_s9 + $0x320] ss:$28 sps:$4 sm:$0xff]   ;;  %v3082_v35 = vld [vmem:[%s3156_s9 + $0x2f0] ss:$28 sps:$4 sm:$0xff]  }
  0x77   : > { %1450 = vmatprep.mubr.bf16.mxu0 %v2990_v36  ;;  %1579 = vmatprep.mubr.bf16.mxu1 %v2992_v37  ;;  %v3083_v36 = vld [vmem:[%s3156_s9 + $0x35c] ss:$28 sps:$4 sm:$0xff]   ;;  %v3085_v37 = vld [vmem:[%s3156_s9 + $0x328] ss:$28 sps:$4 sm:$0xff]  }
  0x7e   : > { %1451 = vmatmul.mubr.bf16.gmra.mrb[44].mxu0 %v2994_v38  ;;  %1580 = vmatmul.mubr.bf16.gmra.mrb[44].mxu1 %v2995_v39 }
  0x7f   : > { %1587 = vmatprep.mubr.bf16.mxu1 %v2996_v40  ;;  %1684 = vmatprep.mubr.bf16.mxu0 %v3000_v41 }
  0x86   : > { %1588 = vmatmul.mubr.bf16.gmra.mrb[48].mxu1 %v3001_v43  ;;  %1685 = vmatmul.mubr.bf16.vlgmr.msra.gmra.mrb[48].mxu0 %v2998_v42  ;;  %v3086_v42 = vld [vmem:[%s3156_s9 + $0x358] ss:$28 sps:$4 sm:$0xff]   ;;  %v3087_v43 = vld [vmem:[%s3156_s9 + $0x360] ss:$28 sps:$4 sm:$0xff]   ;;  %s2227_s9 = sshll.u32 %s2220_s13, 3 }
  0x87   : > { %1595 = vmatprep.mubr.bf16.mxu1 %v3003_v44  ;;  %1692 = vmatprep.mubr.bf16.mxu0 %v3005_v45  ;;  %p172_p4 = scmp.lt.s32.totalorder %s2227_s9, 15 }
  0x89   : > { %s3647_s9 = smov (!%p172_p4, %s2227_s9), 15 }
  0x8a   : > { %s2228_s8 = sshll.u32 %s3647_s9, 2 }
  0x8b   : > { %s3607_s14 = scalar_lea.vmem %s3643_s3, %s2228_s8 }
  0x8e   : > { %1596 = vmatmul.mubr.bf16.gmra.mrb[52].mxu1 %v3007_v46  ;;  %1693 = vmatmul.mubr.bf16.gmra.mrb[52].mxu0 %v3008_v47 }
  0x8f   : > { %1603 = vmatprep.mubr.bf16.mxu1 %v3009_v48  ;;  %1700 = vmatprep.mubr.bf16.mxu0 %v3011_v49 }
  0x96   : > { %1604 = vmatmul.mubr.bf16.gmra.mrb[56].mxu1 %v3013_v50  ;;  %1701 = vmatmul.mubr.bf16.gmra.mrb[56].mxu0 %v3014_v51 }
  0x97   : > { %1611 = vmatprep.mubr.bf16.mxu1 %v3016_v52  ;;  %1708 = vmatprep.mubr.bf16.mxu0 %v3018_v53 }
  0x9e   : > { %1612 = vmatmul.mubr.bf16.gmra.mrb[60].mxu1 %v3020_v54  ;;  %1709 = vmatmul.mubr.bf16.gmra.mrb[60].mxu0 %v3021_v55 }
  0x9f   : > { %1619 = vmatprep.mubr.bf16.mxu1 %v3022_v56  ;;  %1716 = vmatprep.mubr.bf16.mxu0 %v3024_v57 }
  0xa6   : > { %1620 = vmatmul.mubr.bf16.gmra.mrb[64].mxu1 %v3026_v58  ;;  %1717 = vmatmul.mubr.bf16.gmra.mrb[64].mxu0 %v3027_v59 }
  0xa7   : > { %1627 = vmatprep.mubr.bf16.mxu1 %v3029_v60  ;;  %1724 = vmatprep.mubr.bf16.mxu0 %v3031_v61 }
  0xae   : > { %1628 = vmatmul.mubr.bf16.gmra.mrb[68].mxu1 %v3033_v62  ;;  %1725 = vmatmul.mubr.bf16.gmra.mrb[68].mxu0 %v3034_v63 }
  0xaf   : > { %1635 = vmatprep.mubr.bf16.mxu1 %v3035_v0  ;;  %1732 = vmatprep.mubr.bf16.mxu0 %v3037_v1 }
  0xb6   : > { %1636 = vmatmul.mubr.bf16.gmra.mrb[72].mxu1 %v3039_v2  ;;  %1733 = vmatmul.mubr.bf16.gmra.mrb[72].mxu0 %v3040_v3 }
  0xb7   : > { %1643 = vmatprep.mubr.bf16.mxu1 %v3042_v4  ;;  %1740 = vmatprep.mubr.bf16.mxu0 %v3044_v5 }
  0xbe   : > { %1644 = vmatmul.mubr.bf16.gmra.mrb[76].mxu1 %v3046_v6  ;;  %1741 = vmatmul.mubr.bf16.gmra.mrb[76].mxu0 %v3047_v7 }
  0xbf   : > { %1748 = vmatprep.mubr.bf16.mxu0 %v3048_v8  ;;  %2815 = vmatprep.mubr.bf16.mxu1 %v3050_v9 }
  0xc6   : > { %1749 = vmatmul.mubr.bf16.gmra.mrb[80].mxu0 %v3051_v10  ;;  %2816 = vmatmul.mubr.bf16.vlgmr.msra.gmra.mrb[80].mxu1 %v3052_v11 }
  0xc7   : > { %1756 = vmatprep.mubr.bf16.mxu0 %v3053_v12  ;;  %2819 = vmatprep.mubr.bf16.mxu1 %v3055_v13 }
  0xce   : > { %1757 = vmatmul.mubr.bf16.gmra.mrb[84].mxu0 %v3056_v14  ;;  %2820 = vmatmul.mubr.bf16.gmra.mrb[84].mxu1 %v3057_v15 }
  0xcf   : > { %1764 = vmatprep.mubr.bf16.mxu0 %v3058_v16  ;;  %2823 = vmatprep.mubr.bf16.mxu1 %v3060_v17 }
  0xd6   : > { %1765 = vmatmul.mubr.bf16.gmra.mrb[88].mxu0 %v3061_v18  ;;  %2824 = vmatmul.mubr.bf16.gmra.mrb[88].mxu1 %v3062_v19 }
  0xd7   : > { %1772 = vmatprep.mubr.bf16.mxu0 %v3063_v20  ;;  %2827 = vmatprep.mubr.bf16.mxu1 %v3065_v21 }
  0xde   : > { %1773 = vmatmul.mubr.bf16.gmra.mrb[92].mxu0 %v3066_v22  ;;  %2828 = vmatmul.mubr.bf16.gmra.mrb[92].mxu1 %v3067_v23 }
  0xdf   : > { %1780 = vmatprep.mubr.bf16.mxu0 %v3068_v24  ;;  %2831 = vmatprep.mubr.bf16.mxu1 %v3070_v25 }
  0xe6   : > { %1781 = vmatmul.mubr.bf16.gmra.mrb[96].mxu0 %v3071_v26  ;;  %2832 = vmatmul.mubr.bf16.gmra.mrb[96].mxu1 %v3072_v27 }
  0xe7   : > { %1788 = vmatprep.mubr.bf16.mxu0 %v3073_v28  ;;  %2835 = vmatprep.mubr.bf16.mxu1 %v3075_v29 }
  0xee   : > { %1789 = vmatmul.mubr.bf16.gmra.mrb[100].mxu0 %v3076_v30  ;;  %2836 = vmatmul.mubr.bf16.gmra.mrb[100].mxu1 %v3077_v31 }
  0xef   : > { %1796 = vmatprep.mubr.bf16.mxu0 %v3078_v32  ;;  %2839 = vmatprep.mubr.bf16.mxu1 %v3080_v33 }
  0xf6   : > { %1797 = vmatmul.mubr.bf16.gmra.mrb[104].mxu0 %v3081_v34  ;;  %2840 = vmatmul.mubr.bf16.gmra.mrb[104].mxu1 %v3082_v35 }
  0xf7   : > { %1804 = vmatprep.mubr.bf16.mxu0 %v3083_v36  ;;  %2843 = vmatprep.mubr.bf16.mxu1 %v3085_v37 }
  0xf9   : > { %v2455_v38 = vpop.f32.mrb[0].mxu0  ;;  %v2527_v39 = vpop.f32.mrb[0].mxu1 }
  0xfa   : > { %v2456_v40 = vpop.f32.mrb[1].mxu0  ;;  %v2528_v41 = vpop.f32.mrb[1].mxu1 }
  0xfb   : > { %v2457_v44 = vadd.f32 %v2456_v40, %v2455_v38  ;;  %v2458_v45 = vpop.f32.mrb[2].mxu0  ;;  %v3411_v46 = vadd.f32 %v2528_v41, %v2527_v39  ;;  %v2530_v47 = vpop.f32.mrb[2].mxu1 }
  0xfc   : > { %v2459_v48 = vpop.f32.mrb[3].mxu0  ;;  %v2531_v49 = vpop.f32.mrb[3].mxu1 }
  0xfd   : > { %v2460_v50 = vadd.f32 %v2459_v48, %v2458_v45  ;;  %v3413_v51 = vadd.f32 %v2531_v49, %v2530_v47 }
  0xfe   : > { %1805 = vmatmul.mubr.bf16.gmra.mrb[108].mxu0 %v3086_v42  ;;  %2844 = vmatmul.mubr.bf16.gmra.mrb[108].mxu1 %v3087_v43 }
 0x101   : > { %v2461_v52 = vpop.f32.mrb[4].mxu0  ;;  %v2533_v53 = vpop.f32.mrb[4].mxu1 }
 0x102   : > { %v2462_v54 = vpop.f32.mrb[5].mxu0  ;;  %v2534_v55 = vpop.f32.mrb[5].mxu1 }
 0x103   : > { %v2463_v56 = vadd.f32 %v2462_v54, %v2461_v52  ;;  %v2464_v57 = vpop.f32.mrb[6].mxu0  ;;  %v3415_v58 = vadd.f32 %v2534_v55, %v2533_v53  ;;  %v2536_v59 = vpop.f32.mrb[6].mxu1 }
 0x104   : > { %v2465_v60 = vpop.f32.mrb[7].mxu0  ;;  %v2537_v61 = vpop.f32.mrb[7].mxu1 }
 0x105   : > { %v2466_v62 = vadd.f32 %v2465_v60, %v2464_v57  ;;  %v3417_v63 = vadd.f32 %v2537_v61, %v2536_v59 }
 0x109   : > { %v2467_v0 = vpop.f32.mrb[8].mxu0  ;;  %v2539_v1 = vpop.f32.mrb[8].mxu1 }
 0x10a   : > { %v2468_v2 = vpop.f32.mrb[9].mxu0  ;;  %v2540_v3 = vpop.f32.mrb[9].mxu1 }
 0x10b   : > { %v2469_v4 = vadd.f32 %v2468_v2, %v2467_v0  ;;  %v2470_v5 = vpop.f32.mrb[10].mxu0  ;;  %v3419_v6 = vadd.f32 %v2540_v3, %v2539_v1  ;;  %v2542_v7 = vpop.f32.mrb[10].mxu1 }
 0x10c   : > { %v2471_v8 = vpop.f32.mrb[11].mxu0  ;;  %v2543_v9 = vpop.f32.mrb[11].mxu1 }
 0x10d   : > { %v2472_v10 = vadd.f32 %v2471_v8, %v2470_v5  ;;  %v3421_v11 = vadd.f32 %v2543_v9, %v2542_v7 }
 0x111   : > { %v2473_v12 = vpop.f32.mrb[12].mxu0  ;;  %v2545_v13 = vpop.f32.mrb[12].mxu1 }
 0x112   : > { %v2474_v14 = vpop.f32.mrb[13].mxu0  ;;  %v2546_v15 = vpop.f32.mrb[13].mxu1 }
 0x113   : > { %v2475_v16 = vadd.f32 %v2474_v14, %v2473_v12  ;;  %v2476_v17 = vpop.f32.mrb[14].mxu0  ;;  %v3423_v18 = vadd.f32 %v2546_v15, %v2545_v13  ;;  %v2548_v19 = vpop.f32.mrb[14].mxu1 }
 0x114   : > { %v2477_v20 = vpop.f32.mrb[15].mxu0  ;;  %v2549_v21 = vpop.f32.mrb[15].mxu1 }
 0x115   : > { %v2478_v22 = vadd.f32 %v2477_v20, %v2476_v17  ;;  %v3425_v23 = vadd.f32 %v2549_v21, %v2548_v19 }
 0x119   : > { %v2479_v24 = vpop.f32.mrb[16].mxu0  ;;  %v2567_v25 = vpop.f32.mrb[16].mxu1 }
 0x11a   : > { %v2480_v26 = vpop.f32.mrb[17].mxu0  ;;  %v2568_v27 = vpop.f32.mrb[17].mxu1 }
 0x11b   : > { %v2481_v28 = vadd.f32 %v2480_v26, %v2479_v24  ;;  %v2569_v29 = vadd.f32 %v2568_v27, %v2567_v25  ;;  %v2482_v30 = vpop.f32.mrb[18].mxu0  ;;  %v2570_v31 = vpop.f32.mrb[18].mxu1 }
 0x11c   : > { %v2483_v32 = vpop.f32.mrb[19].mxu0  ;;  %v2571_v33 = vpop.f32.mrb[19].mxu1 }
 0x11d   : > { %v3427_v34 = vadd.f32 %v2569_v29, %v2457_v44  ;;  %v2484_v35 = vadd.f32 %v2483_v32, %v2482_v30  ;;  %v2572_v36 = vadd.f32 %v2571_v33, %v2570_v31 }
 0x11f   : > { %v3429_v37 = vadd.f32 %v2572_v36, %v2460_v50 }
 0x121   : > { %v2485_v38 = vpop.f32.mrb[20].mxu0  ;;  %v2573_v39 = vpop.f32.mrb[20].mxu1 }
 0x122   : > { %v2486_v40 = vpop.f32.mrb[21].mxu0  ;;  %v2574_v41 = vpop.f32.mrb[21].mxu1 }
 0x123   : > { %v2487_v42 = vadd.f32 %v2486_v40, %v2485_v38  ;;  %v2575_v43 = vadd.f32 %v2574_v41, %v2573_v39  ;;  %v2488_v45 = vpop.f32.mrb[22].mxu0  ;;  %v2576_v47 = vpop.f32.mrb[22].mxu1 }
 0x124   : > { %v2489_v48 = vpop.f32.mrb[23].mxu0  ;;  %v2577_v49 = vpop.f32.mrb[23].mxu1 }
 0x125   : > { %v3431_v52 = vadd.f32 %v2575_v43, %v2463_v56  ;;  %v2490_v53 = vadd.f32 %v2489_v48, %v2488_v45  ;;  %v2578_v54 = vadd.f32 %v2577_v49, %v2576_v47 }
 0x127   : > { %v3433_v44 = vadd.f32 %v2578_v54, %v2466_v62 }
 0x129   : > { %v2491_v55 = vpop.f32.mrb[24].mxu0  ;;  %v2579_v57 = vpop.f32.mrb[24].mxu1 }
 0x12a   : > { %v2492_v50 = vpop.f32.mrb[25].mxu0  ;;  %v2580_v59 = vpop.f32.mrb[25].mxu1 }
 0x12b   : > { %v2493_v60 = vadd.f32 %v2492_v50, %v2491_v55  ;;  %v2581_v61 = vadd.f32 %v2580_v59, %v2579_v57  ;;  %v2494_v0 = vpop.f32.mrb[26].mxu0  ;;  %v2582_v1 = vpop.f32.mrb[26].mxu1 }
 0x12c   : > { %v2495_v2 = vpop.f32.mrb[27].mxu0  ;;  %v2583_v3 = vpop.f32.mrb[27].mxu1 }
 0x12d   : > { %v3435_v5 = vadd.f32 %v2581_v61, %v2469_v4  ;;  %v2496_v7 = vadd.f32 %v2495_v2, %v2494_v0  ;;  %v2584_v8 = vadd.f32 %v2583_v3, %v2582_v1 }
 0x12f   : > { %v3437_v56 = vadd.f32 %v2584_v8, %v2472_v10 }
 0x131   : > { %v2497_v9 = vpop.f32.mrb[28].mxu0  ;;  %v2585_v12 = vpop.f32.mrb[28].mxu1 }
 0x132   : > { %v2498_v62 = vpop.f32.mrb[29].mxu0  ;;  %v2586_v13 = vpop.f32.mrb[29].mxu1 }
 0x133   : > { %v2499_v14 = vadd.f32 %v2498_v62, %v2497_v9  ;;  %v2587_v15 = vadd.f32 %v2586_v13, %v2585_v12  ;;  %v2500_v17 = vpop.f32.mrb[30].mxu0  ;;  %v2588_v19 = vpop.f32.mrb[30].mxu1 }
 0x134   : > { %v2501_v20 = vpop.f32.mrb[31].mxu0  ;;  %v2589_v21 = vpop.f32.mrb[31].mxu1 }
 0x135   : > { %v3439_v24 = vadd.f32 %v2587_v15, %v2475_v16  ;;  %v2502_v25 = vadd.f32 %v2501_v20, %v2500_v17  ;;  %v2590_v26 = vadd.f32 %v2589_v21, %v2588_v19 }
 0x137   : > { %v3441_v4 = vadd.f32 %v2590_v26, %v2478_v22 }
 0x139   : > { %v2503_v27 = vpop.f32.mrb[32].mxu0  ;;  %v2591_v29 = vpop.f32.mrb[32].mxu1 }
 0x13a   : > { %v2504_v10 = vpop.f32.mrb[33].mxu0  ;;  %v2592_v30 = vpop.f32.mrb[33].mxu1 }
 0x13b   : > { %v2505_v31 = vadd.f32 %v2504_v10, %v2503_v27  ;;  %v2593_v32 = vadd.f32 %v2592_v30, %v2591_v29  ;;  %v2506_v33 = vpop.f32.mrb[34].mxu0  ;;  %v2594_v36 = vpop.f32.mrb[34].mxu1 }
 0x13c   : > { %v2507_v38 = vpop.f32.mrb[35].mxu0  ;;  %v2595_v39 = vpop.f32.mrb[35].mxu1 }
 0x13d   : > { %v3443_v40 = vadd.f32 %v2593_v32, %v2481_v28  ;;  %v2508_v41 = vadd.f32 %v2507_v38, %v2506_v33  ;;  %v2596_v43 = vadd.f32 %v2595_v39, %v2594_v36 }
 0x13f   : > { %v3445_v16 = vadd.f32 %v2596_v43, %v2484_v35 }
 0x141   : > { %v2509_v45 = vpop.f32.mrb[36].mxu0  ;;  %v2597_v47 = vpop.f32.mrb[36].mxu1 }
 0x142   : > { %v2510_v22 = vpop.f32.mrb[37].mxu0  ;;  %v2598_v48 = vpop.f32.mrb[37].mxu1 }
 0x143   : > { %v3447_v49 = vadd.f32 %v2510_v22, %v2509_v45  ;;  %v2599_v54 = vadd.f32 %v2598_v48, %v2597_v47  ;;  %v2512_v55 = vpop.f32.mrb[38].mxu0  ;;  %v2600_v57 = vpop.f32.mrb[38].mxu1 }
 0x144   : > { %v2513_v50 = vpop.f32.mrb[39].mxu0  ;;  %v2601_v59 = vpop.f32.mrb[39].mxu1 }
 0x145   : > { %v3449_v61 = vadd.f32 %v2599_v54, %v2487_v42  ;;  %v2514_v0 = vadd.f32 %v2513_v50, %v2512_v55  ;;  %v2602_v28 = vadd.f32 %v2601_v59, %v2600_v57 }
 0x147   : > { %v3451_v1 = vadd.f32 %v2602_v28, %v2490_v53 }
 0x149   : > { %v2515_v2 = vpop.f32.mrb[40].mxu0  ;;  %v2603_v35 = vpop.f32.mrb[40].mxu1 }
 0x14a   : > { %v2516_v3 = vpop.f32.mrb[41].mxu0  ;;  %v2604_v8 = vpop.f32.mrb[41].mxu1 }
 0x14b   : > { %v3453_v9 = vadd.f32 %v2516_v3, %v2515_v2  ;;  %v2605_v12 = vadd.f32 %v2604_v8, %v2603_v35  ;;  %v2518_v62 = vpop.f32.mrb[42].mxu0  ;;  %v2606_v13 = vpop.f32.mrb[42].mxu1 }
 0x14c   : > { %v2519_v15 = vpop.f32.mrb[43].mxu0  ;;  %v2607_v17 = vpop.f32.mrb[43].mxu1 }
 0x14d   : > { %v3455_v19 = vadd.f32 %v2605_v12, %v2493_v60  ;;  %v3457_v20 = vadd.f32 %v2519_v15, %v2518_v62  ;;  %v2608_v42 = vadd.f32 %v2607_v17, %v2606_v13 }
 0x14f   : > { %v3459_v21 = vadd.f32 %v2608_v42, %v2496_v7 }
 0x151   : > { %v2521_v53 = vpop.f32.mrb[44].mxu0  ;;  %v2609_v26 = vpop.f32.mrb[44].mxu1 }
 0x152   : > { %v2522_v27 = vpop.f32.mrb[45].mxu0  ;;  %v2610_v29 = vpop.f32.mrb[45].mxu1 }
 0x153   : > { %v3461_v10 = vadd.f32 %v2522_v27, %v2521_v53  ;;  %v2611_v30 = vadd.f32 %v2610_v29, %v2609_v26  ;;  %v2524_v32 = vpop.f32.mrb[46].mxu0  ;;  %v2612_v33 = vpop.f32.mrb[46].mxu1 }
 0x154   : > { %v2525_v36 = vpop.f32.mrb[47].mxu0  ;;  %v2613_v38 = vpop.f32.mrb[47].mxu1 }
 0x155   : > { %v3463_v39 = vadd.f32 %v2611_v30, %v2499_v14  ;;  %v3465_v60 = vadd.f32 %v2525_v36, %v2524_v32  ;;  %v2614_v43 = vadd.f32 %v2613_v38, %v2612_v33 }
 0x157   : > { %v3467_v45 = vadd.f32 %v2614_v43, %v2502_v25 }
 0x159   : > { %v2615_v7 = vpop.f32.mrb[48].mxu1  ;;  %v2679_v47 = vpop.f32.mrb[48].mxu0 }
 0x15a   : > { %v2616_v22 = vpop.f32.mrb[49].mxu1  ;;  %v2680_v48 = vpop.f32.mrb[49].mxu0 }
 0x15b   : > { %v2617_v54 = vadd.f32 %v2616_v22, %v2615_v7  ;;  %v2681_v55 = vadd.f32 %v2680_v48, %v2679_v47  ;;  %v2618_v57 = vpop.f32.mrb[50].mxu1  ;;  %v2682_v50 = vpop.f32.mrb[50].mxu0 }
 0x15c   : > { %v2619_v59 = vpop.f32.mrb[51].mxu1  ;;  %v2683_v28 = vpop.f32.mrb[51].mxu0 }
 0x15d   : > { %v3469_v2 = vadd.f32 %v2617_v54, %v2505_v31  ;;  %v2620_v35 = vadd.f32 %v2619_v59, %v2618_v57  ;;  %v2684_v14 = vadd.f32 %v2683_v28, %v2682_v50  ;;  %v3472_v3 = vadd.f32 %v2681_v55, %v3427_v34 }
 0x15f   : > { %v3474_v8 = vadd.f32 %v2620_v35, %v2508_v41  ;;  %v3477_v25 = vadd.f32 %v2684_v14, %v3429_v37 }
 0x161   : > { %v2621_v12 = vpop.f32.mrb[52].mxu1  ;;  %v2685_v62 = vpop.f32.mrb[52].mxu0 }
 0x162   : > { %v2622_v13 = vpop.f32.mrb[53].mxu1  ;;  %v2686_v15 = vpop.f32.mrb[53].mxu0 }
 0x163   : > { %v2623_v17 = vadd.f32 %v2622_v13, %v2621_v12  ;;  %v2687_v42 = vadd.f32 %v2686_v15, %v2685_v62  ;;  %v2624_v53 = vpop.f32.mrb[54].mxu1  ;;  %v2688_v26 = vpop.f32.mrb[54].mxu0 }
 0x164   : > { %v2625_v31 = vpop.f32.mrb[55].mxu1  ;;  %v2689_v27 = vpop.f32.mrb[55].mxu0 }
 0x165   : > { %v3480_v29 = vadd.f32 %v2623_v17, %v3447_v49  ;;  %v2626_v34 = vadd.f32 %v2625_v31, %v2624_v53  ;;  %v2690_v30 = vadd.f32 %v2689_v27, %v2688_v26  ;;  %v3483_v41 = vadd.f32 %v2687_v42, %v3431_v52 }
 0x167   : > { %v3485_v37 = vadd.f32 %v2626_v34, %v2514_v0  ;;  %v3488_v32 = vadd.f32 %v2690_v30, %v3433_v44 }
 0x169   : > { %v2627_v33 = vpop.f32.mrb[56].mxu1  ;;  %v2691_v36 = vpop.f32.mrb[56].mxu0 }
 0x16a   : > { %v2628_v38 = vpop.f32.mrb[57].mxu1  ;;  %v2692_v43 = vpop.f32.mrb[57].mxu0 }
 0x16b   : > { %v2629_v7 = vadd.f32 %v2628_v38, %v2627_v33  ;;  %v2693_v47 = vadd.f32 %v2692_v43, %v2691_v36  ;;  %v2630_v22 = vpop.f32.mrb[58].mxu1  ;;  %v2694_v48 = vpop.f32.mrb[58].mxu0 }
 0x16c   : > { %v2631_v49 = vpop.f32.mrb[59].mxu1  ;;  %v2695_v54 = vpop.f32.mrb[59].mxu0 }
 0x16d   : > { %v3491_v55 = vadd.f32 %v2629_v7, %v3453_v9  ;;  %v2632_v52 = vadd.f32 %v2631_v49, %v2630_v22  ;;  %v2696_v57 = vadd.f32 %v2695_v54, %v2694_v48  ;;  %v3494_v0 = vadd.f32 %v2693_v47, %v3435_v5 }
 0x16f   : > { %v3497_v44 = vadd.f32 %v2632_v52, %v3457_v20  ;;  %v3500_v50 = vadd.f32 %v2696_v57, %v3437_v56 }
 0x171   : > { %v2633_v59 = vpop.f32.mrb[60].mxu1  ;;  %v2697_v28 = vpop.f32.mrb[60].mxu0 }
 0x172   : > { %v2634_v35 = vpop.f32.mrb[61].mxu1  ;;  %v2698_v14 = vpop.f32.mrb[61].mxu0 }
 0x173   : > { %v2635_v12 = vadd.f32 %v2634_v35, %v2633_v59  ;;  %v2699_v62 = vadd.f32 %v2698_v14, %v2697_v28  ;;  %v2636_v13 = vpop.f32.mrb[62].mxu1  ;;  %v2700_v9 = vpop.f32.mrb[62].mxu0 }
 0x174   : > { %v2637_v15 = vpop.f32.mrb[63].mxu1  ;;  %v2701_v17 = vpop.f32.mrb[63].mxu0 }
 0x175   : > { %v3503_v42 = vadd.f32 %v2635_v12, %v3461_v10  ;;  %v2638_v5 = vadd.f32 %v2637_v15, %v2636_v13  ;;  %v2702_v53 = vadd.f32 %v2701_v17, %v2700_v9  ;;  %v3506_v20 = vadd.f32 %v2699_v62, %v3439_v24 }
 0x177   : > { %v3509_v56 = vadd.f32 %v2638_v5, %v3465_v60  ;;  %v3512_v26 = vadd.f32 %v2702_v53, %v3441_v4 }
 0x179   : > { %v2639_v31 = vpop.f32.mrb[64].mxu1  ;;  %v2703_v27 = vpop.f32.mrb[64].mxu0 }
 0x17a   : > { %v2640_v34 = vpop.f32.mrb[65].mxu1  ;;  %v2704_v30 = vpop.f32.mrb[65].mxu0 }
 0x17b   : > { %v2641_v33 = vadd.f32 %v2640_v34, %v2639_v31  ;;  %v2705_v36 = vadd.f32 %v2704_v30, %v2703_v27  ;;  %v2642_v38 = vpop.f32.mrb[66].mxu1  ;;  %v2706_v10 = vpop.f32.mrb[66].mxu0 }
 0x17c   : > { %v2643_v43 = vpop.f32.mrb[67].mxu1  ;;  %v2707_v7 = vpop.f32.mrb[67].mxu0 }
 0x17d   : > { %v3515_v47 = vadd.f32 %v2641_v33, %v3411_v46  ;;  %v2644_v24 = vadd.f32 %v2643_v43, %v2642_v38  ;;  %v2708_v22 = vadd.f32 %v2707_v7, %v2706_v10  ;;  %v3518_v60 = vadd.f32 %v2705_v36, %v3443_v40 }
 0x17f   : > { %v3521_v4 = vadd.f32 %v2644_v24, %v3413_v51  ;;  %v3524_v48 = vadd.f32 %v2708_v22, %v3445_v16 }
 0x181   : > { %v2645_v49 = vpop.f32.mrb[68].mxu1  ;;  %v2709_v54 = vpop.f32.mrb[68].mxu0 }
 0x182   : > { %v2646_v52 = vpop.f32.mrb[69].mxu1  ;;  %v2710_v57 = vpop.f32.mrb[69].mxu0 }
 0x183   : > { %v2647_v59 = vadd.f32 %v2646_v52, %v2645_v49  ;;  %v2711_v28 = vadd.f32 %v2710_v57, %v2709_v54  ;;  %v2648_v35 = vpop.f32.mrb[70].mxu1  ;;  %v2712_v46 = vpop.f32.mrb[70].mxu0 }
 0x184   : > { %v2649_v14 = vpop.f32.mrb[71].mxu1  ;;  %v2713_v12 = vpop.f32.mrb[71].mxu0 }
 0x185   : > { %v3527_v62 = vadd.f32 %v2647_v59, %v3415_v58  ;;  %v2650_v40 = vadd.f32 %v2649_v14, %v2648_v35  ;;  %v2714_v13 = vadd.f32 %v2713_v12, %v2712_v46  ;;  %v3530_v51 = vadd.f32 %v2711_v28, %v3449_v61 }
 0x187   : > { %v3533_v16 = vadd.f32 %v2650_v40, %v3417_v63  ;;  %v3536_v9 = vadd.f32 %v2714_v13, %v3451_v1 }
 0x189   : > { %v2651_v15 = vpop.f32.mrb[72].mxu1  ;;  %v2715_v17 = vpop.f32.mrb[72].mxu0 }
 0x18a   : > { %v2652_v5 = vpop.f32.mrb[73].mxu1  ;;  %v2716_v53 = vpop.f32.mrb[73].mxu0 }
 0x18b   : > { %v2653_v31 = vadd.f32 %v2652_v5, %v2651_v15  ;;  %v2717_v27 = vadd.f32 %v2716_v53, %v2715_v17  ;;  %v2654_v34 = vpop.f32.mrb[74].mxu1  ;;  %v2718_v58 = vpop.f32.mrb[74].mxu0 }
 0x18c   : > { %v2655_v30 = vpop.f32.mrb[75].mxu1  ;;  %v2719_v33 = vpop.f32.mrb[75].mxu0 }
 0x18d   : > { %v3539_v36 = vadd.f32 %v2653_v31, %v3419_v6  ;;  %v2656_v61 = vadd.f32 %v2655_v30, %v2654_v34  ;;  %v2720_v38 = vadd.f32 %v2719_v33, %v2718_v58  ;;  %v3542_v63 = vadd.f32 %v2717_v27, %v3455_v19 }
 0x18f   : > { %v3545_v1 = vadd.f32 %v2656_v61, %v3421_v11  ;;  %v3548_v10 = vadd.f32 %v2720_v38, %v3459_v21 }
 0x191   : > { %v2657_v43 = vpop.f32.mrb[76].mxu1  ;;  %v2721_v7 = vpop.f32.mrb[76].mxu0 }
 0x192   : > { %v2658_v24 = vpop.f32.mrb[77].mxu1  ;;  %v2722_v22 = vpop.f32.mrb[77].mxu0 }
 0x193   : > { %v2659_v49 = vadd.f32 %v2658_v24, %v2657_v43  ;;  %v2723_v54 = vadd.f32 %v2722_v22, %v2721_v7  ;;  %v2660_v52 = vpop.f32.mrb[78].mxu1  ;;  %v2724_v6 = vpop.f32.mrb[78].mxu0 }
 0x194   : > { %v2661_v57 = vpop.f32.mrb[79].mxu1  ;;  %v2725_v59 = vpop.f32.mrb[79].mxu0 }
 0x195   : > { %v3551_v28 = vadd.f32 %v2659_v49, %v3423_v18  ;;  %v2662_v19 = vadd.f32 %v2661_v57, %v2660_v52  ;;  %v2726_v35 = vadd.f32 %v2725_v59, %v2724_v6  ;;  %v3554_v11 = vadd.f32 %v2723_v54, %v3463_v39 }
 0x197   : > { %v3557_v21 = vadd.f32 %v2662_v19, %v3425_v23  ;;  %v3560_v46 = vadd.f32 %v2726_v35, %v3467_v45 }
 0x199   : > { %v2727_v14 = vpop.f32.mrb[80].mxu0  ;;  %v2817_v12 = vpop.f32.mrb[80].mxu1 }
 0x19a   : > { %v1856_v40 = vadd.f32 %v2817_v12, %v3483_v41  ;;  %v2728_v13 = vpop.f32.mrb[81].mxu0  ;;  %v1847_v15 = vpop.f32.mrb[81].mxu1 }
 0x19b   : > { %v2729_v17 = vadd.f32 %v2728_v13, %v2727_v14  ;;  %v1848_v18 = vadd.f32 %v1847_v15, %v3472_v3  ;;  %v2730_v5 = vpop.f32.mrb[82].mxu0  ;;  %v2818_v53 = vpop.f32.mrb[82].mxu1 }
 0x19c   : > { %v1859_v39 = vadd.f32 %v2818_v53, %v3488_v32  ;;  %v2731_v31 = vpop.f32.mrb[83].mxu0  ;;  %v1850_v27 = vpop.f32.mrb[83].mxu1 }
 0x19d   : > { %v2011_v23 = vmax.f32 %v1848_v18, %v1856_v40  ;;  %v2732_v34 = vadd.f32 %v2731_v31, %v2730_v5  ;;  %v1851_v45 = vadd.f32 %v1850_v27, %v3477_v25  ;;  %v3567_v58 = vadd.f32 %v2729_v17, %v3469_v2 }
 0x19f   : > { %2013 = vst [vmem:[#allocation3] sm:$0xff] %v2011_v23  ;;  %v2012_v41 = vmax.f32 %v1851_v45, %v1859_v39  ;;  %v3570_v30 = vadd.f32 %v2732_v34, %v3474_v8 }
 0x1a1   : > { %2014 = vst [vmem:[#allocation3 + $0x8] sm:$0xff] %v2012_v41  ;;  %v2733_v3 = vpop.f32.mrb[84].mxu0  ;;  %v2821_v33 = vpop.f32.mrb[84].mxu1 }
 0x1a2   : > { %v1872_v32 = vadd.f32 %v2821_v33, %v3506_v20  ;;  %v2734_v61 = vpop.f32.mrb[85].mxu0  ;;  %v1863_v38 = vpop.f32.mrb[85].mxu1 }
 0x1a3   : > { %v2735_v43 = vadd.f32 %v2734_v61, %v2733_v3  ;;  %v1864_v7 = vadd.f32 %v1863_v38, %v3494_v0  ;;  %v2736_v25 = vpop.f32.mrb[86].mxu0  ;;  %v2822_v24 = vpop.f32.mrb[86].mxu1 }
 0x1a4   : > { %v1875_v2 = vadd.f32 %v2822_v24, %v3512_v26  ;;  %v2737_v22 = vpop.f32.mrb[87].mxu0  ;;  %v1866_v49 = vpop.f32.mrb[87].mxu1 }
 0x1a5   : > { %v2019_v54 = vmax.f32 %v1864_v7, %v1872_v32  ;;  %v2738_v8 = vadd.f32 %v2737_v22, %v2736_v25  ;;  %v1867_v52 = vadd.f32 %v1866_v49, %v3500_v50  ;;  %v3577_v6 = vadd.f32 %v2735_v43, %v3480_v29 }
 0x1a7   : > { %2021 = vst [vmem:[#allocation3 + $0x10] sm:$0xff] %v2019_v54  ;;  %v2020_v20 = vmax.f32 %v1867_v52, %v1875_v2  ;;  %v3582_v57 = vadd.f32 %v2738_v8, %v3485_v37 }
 0x1a8   : > { %v2071_v40 = vld [vmem:[#allocation3] ss:$2 sm:$0xff]  ;;  %v2087_v13 = vld [vmem:[#allocation3 + $0x1] ss:$2 sm:$0xff] }
 0x1a9   : > { %2022 = vst [vmem:[#allocation3 + $0x18] sm:$0xff] %v2020_v20  ;;  %v2739_v0 = vpop.f32.mrb[88].mxu0  ;;  %v2825_v26 = vpop.f32.mrb[88].mxu1  ;;  %v2102_v39 = vmax.f32 %v2071_v40, %v2087_v13 }
 0x1aa   : > { %v1888_v59 = vadd.f32 %v2825_v26, %v3530_v51  ;;  %v2740_v19 = vpop.f32.mrb[89].mxu0  ;;  %v1879_v35 = vpop.f32.mrb[89].mxu1 }
 0x1ab   : > { %v2741_v14 = vadd.f32 %v2740_v19, %v2739_v0  ;;  %v1880_v50 = vadd.f32 %v1879_v35, %v3518_v60  ;;  %v2742_v29 = vpop.f32.mrb[90].mxu0  ;;  %v2826_v12 = vpop.f32.mrb[90].mxu1 }
 0x1ac   : > { %v1891_v15 = vadd.f32 %v2826_v12, %v3536_v9  ;;  %v2743_v17 = vpop.f32.mrb[91].mxu0  ;;  %v1882_v37 = vpop.f32.mrb[91].mxu1  ;;  %v3598_v9 = vld [vmem:[%s3642_s2] ss:$0 sm:$0xff] }
 0x1ad   : > { %v2027_v18 = vmax.f32 %v1880_v50, %v1888_v59  ;;  %v2744_v5 = vadd.f32 %v2743_v17, %v2742_v29  ;;  %v1883_v53 = vadd.f32 %v1882_v37, %v3524_v48  ;;  %v3590_v51 = vadd.f32 %v2741_v14, %v3491_v55 }
 0x1ae   : > { %v2116_v33 = vadd.f32 %v3598_v9, %v2102_v39 }
 0x1af   : > { %2029 = vst [vmem:[#allocation3 + $0x20] sm:$0xff] %v2027_v18  ;;  %v2028_v60 = vmax.f32 %v1883_v53, %v1891_v15  ;;  %v3593_v31 = vadd.f32 %v2744_v5, %v3497_v44 }
 0x1b0   : > { %v2073_v27 = vld [vmem:[#allocation3 + $0x10] ss:$2 sm:$0xff]  ;;  %v2089_v23 = vld [vmem:[#allocation3 + $0x11] ss:$2 sm:$0xff] }
 0x1b1   : > { %v2103_v34 = vmax.f32 %v2073_v27, %v2089_v23  ;;  %2030 = vst [vmem:[#allocation3 + $0x28] sm:$0xff] %v2028_v60  ;;  %v2745_v48 = vpop.f32.mrb[92].mxu0  ;;  %v2829_v45 = vpop.f32.mrb[92].mxu1 }
 0x1b2   : > { %v1904_v55 = vadd.f32 %v2829_v45, %v3554_v11  ;;  %v2746_v41 = vpop.f32.mrb[93].mxu0  ;;  %v1895_v3 = vpop.f32.mrb[93].mxu1 }
 0x1b3   : > { %v2117_v44 = vadd.f32 %v3598_v9, %v2103_v34  ;;  %v2747_v32 = vadd.f32 %v2746_v41, %v2745_v48  ;;  %v1896_v61 = vadd.f32 %v1895_v3, %v3542_v63  ;;  %v2748_v38 = vpop.f32.mrb[94].mxu0  ;;  %v2830_v43 = vpop.f32.mrb[94].mxu1 }
 0x1b4   : > { %v1907_v7 = vadd.f32 %v2830_v43, %v3560_v46  ;;  %v2749_v11 = vpop.f32.mrb[95].mxu0  ;;  %v1898_v25 = vpop.f32.mrb[95].mxu1 }
 0x1b5   : > { %v2419_v24 = vpack.c.bf16 %v2117_v44, %v2116_v33  ;;  %v2035_v2 = vmax.f32 %v1896_v61, %v1904_v55  ;;  %v2750_v22 = vadd.f32 %v2749_v11, %v2748_v38  ;;  %v1899_v49 = vadd.f32 %v1898_v25, %v3548_v10 }
 0x1b6   : > { %v1775_v54 = vadd.f32 %v2747_v32, %v3503_v42 }
 0x1b7   : > { %2420 = vst [vmem:[%s3607_s14] sm:$0xff] %v2419_v24   ;;  %2037 = vst [vmem:[#allocation3 + $0x30] sm:$0xff] %v2035_v2  ;;  %v2036_v63 = vmax.f32 %v1899_v49, %v1907_v7  ;;  %v1778_v8 = vadd.f32 %v2750_v22, %v3509_v56 }
 0x1b8   : > { %v2075_v10 = vld [vmem:[#allocation3 + $0x20] ss:$2 sm:$0xff]  ;;  %v2091_v50 = vld [vmem:[#allocation3 + $0x21] ss:$2 sm:$0xff] }
 0x1b9   : > { %2038 = vst [vmem:[#allocation3 + $0x38] sm:$0xff] %v2036_v63  ;;  %v2751_v52 = vpop.f32.mrb[96].mxu0  ;;  %v2833_v20 = vpop.f32.mrb[96].mxu1 }
 0x1ba   : > { %v1920_v0 = vadd.f32 %v2833_v20, %v3577_v6  ;;  %v2752_v46 = vpop.f32.mrb[97].mxu0  ;;  %v1911_v26 = vpop.f32.mrb[97].mxu1  ;;  %v2104_v6 = vmax.f32 %v2075_v10, %v2091_v50 }
 0x1bb   : > { %v2753_v59 = vadd.f32 %v2752_v46, %v2751_v52  ;;  %v1912_v19 = vadd.f32 %v1911_v26, %v3567_v58  ;;  %v2754_v35 = vpop.f32.mrb[98].mxu0  ;;  %v2834_v14 = vpop.f32.mrb[98].mxu1 }
 0x1bc   : > { %v1923_v42 = vadd.f32 %v2834_v14, %v3582_v57  ;;  %v2755_v29 = vpop.f32.mrb[99].mxu0  ;;  %v1914_v12 = vpop.f32.mrb[99].mxu1  ;;  %v2118_v23 = vadd.f32 %v3598_v9, %v2104_v6 }
 0x1bd   : > { %v2043_v40 = vmax.f32 %v1912_v19, %v1920_v0  ;;  %v2756_v56 = vadd.f32 %v2755_v29, %v2754_v35  ;;  %v1915_v13 = vadd.f32 %v1914_v12, %v3570_v30  ;;  %v1783_v15 = vadd.f32 %v2753_v59, %v3515_v47 }
 0x1bf   : > { %2045 = vst [vmem:[#allocation3 + $0x40] sm:$0xff] %v2043_v40  ;;  %v2044_v17 = vmax.f32 %v1915_v13, %v1923_v42  ;;  %v1786_v37 = vadd.f32 %v2756_v56, %v3521_v4 }
 0x1c0   : > { %v2077_v58 = vld [vmem:[#allocation3 + $0x30] ss:$2 sm:$0xff]  ;;  %v2093_v18 = vld [vmem:[#allocation3 + $0x31] ss:$2 sm:$0xff] }
 0x1c1   : > { %v2105_v5 = vmax.f32 %v2077_v58, %v2093_v18  ;;  %2046 = vst [vmem:[#allocation3 + $0x48] sm:$0xff] %v2044_v17  ;;  %v2757_v53 = vpop.f32.mrb[100].mxu0  ;;  %v2837_v39 = vpop.f32.mrb[100].mxu1 }
 0x1c2   : > { %v1936_v57 = vadd.f32 %v2837_v39, %v1775_v54  ;;  %v2758_v60 = vpop.f32.mrb[101].mxu0  ;;  %v1927_v27 = vpop.f32.mrb[101].mxu1 }
 0x1c3   : > { %v2119_v30 = vadd.f32 %v3598_v9, %v2105_v5  ;;  %v2759_v47 = vadd.f32 %v2758_v60, %v2757_v53  ;;  %v1928_v34 = vadd.f32 %v1927_v27, %v3590_v51  ;;  %v2760_v48 = vpop.f32.mrb[102].mxu0  ;;  %v2838_v45 = vpop.f32.mrb[102].mxu1 }
 0x1c4   : > { %v1939_v4 = vadd.f32 %v2838_v45, %v1778_v8  ;;  %v2761_v55 = vpop.f32.mrb[103].mxu0  ;;  %v1930_v41 = vpop.f32.mrb[103].mxu1 }
 0x1c5   : > { %v2424_v3 = vpack.c.bf16 %v2119_v30, %v2118_v23  ;;  %v2051_v33 = vmax.f32 %v1928_v34, %v1936_v57  ;;  %v2762_v44 = vadd.f32 %v2761_v55, %v2760_v48  ;;  %v1931_v32 = vadd.f32 %v1930_v41, %v3593_v31 }
 0x1c6   : > { %v1791_v61 = vadd.f32 %v2759_v47, %v3527_v62 }
 0x1c7   : > { %2436 = vst [vmem:[%s3607_s14 + $0x8] sm:$0xff] %v2424_v3   ;;  %2053 = vst [vmem:[#allocation3 + $0x50] sm:$0xff] %v2051_v33  ;;  %v2052_v38 = vmax.f32 %v1931_v32, %v1939_v4  ;;  %v1794_v43 = vadd.f32 %v2762_v44, %v3533_v16 }
 0x1c8   : > { %v2079_v63 = vld [vmem:[#allocation3 + $0x40] ss:$2 sm:$0xff]  ;;  %v2095_v8 = vld [vmem:[#allocation3 + $0x41] ss:$2 sm:$0xff] }
 0x1c9   : > { %2054 = vst [vmem:[#allocation3 + $0x58] sm:$0xff] %v2052_v38  ;;  %v2763_v7 = vpop.f32.mrb[104].mxu0  ;;  %v2841_v51 = vpop.f32.mrb[104].mxu1  ;;  %v2106_v26 = vmax.f32 %v2079_v63, %v2095_v8 }
 0x1ca   : > { %v1952_v11 = vadd.f32 %v2841_v51, %v1791_v61  ;;  %v2764_v25 = vpop.f32.mrb[105].mxu0  ;;  %v1943_v24 = vpop.f32.mrb[105].mxu1 }
 0x1cb   : > { %v2765_v2 = vadd.f32 %v2764_v25, %v2763_v7  ;;  %v1944_v22 = vadd.f32 %v1943_v24, %v1783_v15  ;;  %v2766_v49 = vpop.f32.mrb[106].mxu0  ;;  %v2842_v54 = vpop.f32.mrb[106].mxu1  ;;  %v2120_v40 = vadd.f32 %v3598_v9, %v2106_v26 }
 0x1cc   : > { %v1955_v31 = vadd.f32 %v2842_v54, %v1794_v43  ;;  %v2767_v52 = vpop.f32.mrb[107].mxu0  ;;  %v1946_v62 = vpop.f32.mrb[107].mxu1 }
 0x1cd   : > { %v2059_v20 = vmax.f32 %v1944_v22, %v1952_v11  ;;  %v2768_v0 = vadd.f32 %v2767_v52, %v2766_v49  ;;  %v1947_v46 = vadd.f32 %v1946_v62, %v1786_v37  ;;  %v1799_v16 = vadd.f32 %v2765_v2, %v3539_v36 }
 0x1cf   : > { %2061 = vst [vmem:[#allocation3 + $0x60] sm:$0xff] %v2059_v20  ;;  %v2060_v59 = vmax.f32 %v1947_v46, %v1955_v31  ;;  %v1802_v19 = vadd.f32 %v2768_v0, %v3545_v1 }
 0x1d0   : > { %v2081_v35 = vld [vmem:[#allocation3 + $0x50] ss:$2 sm:$0xff]  ;;  %v2097_v14 = vld [vmem:[#allocation3 + $0x51] ss:$2 sm:$0xff] }
 0x1d1   : > { %v2107_v10 = vmax.f32 %v2081_v35, %v2097_v14  ;;  %2062 = vst [vmem:[#allocation3 + $0x68] sm:$0xff] %v2060_v59  ;;  %v2769_v50 = vpop.f32.mrb[108].mxu0  ;;  %v2845_v42 = vpop.f32.mrb[108].mxu1 }
 0x1d2   : > { %v2770_v29 = vpop.f32.mrb[109].mxu0  ;;  %v1959_v12 = vpop.f32.mrb[109].mxu1 }
 0x1d3   : > { %v2121_v56 = vadd.f32 %v3598_v9, %v2107_v10  ;;  %v2771_v13 = vadd.f32 %v2770_v29, %v2769_v50  ;;  %v1960_v36 = vadd.f32 %v1959_v12, %v1799_v16  ;;  %v2772_v15 = vpop.f32.mrb[110].mxu0  ;;  %v2846_v6 = vpop.f32.mrb[110].mxu1 }
 0x1d4   : > { %v2773_v17 = vpop.f32.mrb[111].mxu0  ;;  %v1962_v37 = vpop.f32.mrb[111].mxu1 }
 0x1d5   : > { %v2429_v1 = vpack.c.bf16 %v2121_v56, %v2120_v40  ;;  %v1807_v58 = vadd.f32 %v2771_v13, %v3551_v28  ;;  %v2774_v18 = vadd.f32 %v2773_v17, %v2772_v15  ;;  %v1963_v5 = vadd.f32 %v1962_v37, %v1802_v19 }
 0x1d7   : > { %2437 = vst [vmem:[%s3607_s14 + $0x10] sm:$0xff] %v2429_v1   ;;  %v1968_v53 = vadd.f32 %v2845_v42, %v1807_v58  ;;  %v1810_v39 = vadd.f32 %v2774_v18, %v3557_v21 }
 0x1d8   : > { %v2083_v23 = vld [vmem:[#allocation3 + $0x60] ss:$2 sm:$0xff]  ;;  %v2099_v30 = vld [vmem:[#allocation3 + $0x61] ss:$2 sm:$0xff] }
 0x1d9   : > { %v2067_v57 = vmax.f32 %v1960_v36, %v1968_v53  ;;  %v1971_v60 = vadd.f32 %v2846_v6, %v1810_v39  ;;  %v2108_v47 = vmax.f32 %v2083_v23, %v2099_v30 }
 0x1db   : > { %2069 = vst [vmem:[#allocation3 + $0x70] sm:$0xff] %v2067_v57  ;;  %v2068_v27 = vmax.f32 %v1963_v5, %v1971_v60  ;;  %v2122_v28 = vadd.f32 %v3598_v9, %v2108_v47 }
 0x1dd   : > { %2070 = vst [vmem:[#allocation3 + $0x78] sm:$0xff] %v2068_v27 }
 0x1e4   : > { %v2085_v34 = vld [vmem:[#allocation3 + $0x70] ss:$2 sm:$0xff]  ;;  %v2101_v48 = vld [vmem:[#allocation3 + $0x71] ss:$2 sm:$0xff] }
 0x1e5   : > { %v2109_v45 = vmax.f32 %v2085_v34, %v2101_v48 }
 0x1e7   : > { %v2123_v4 = vadd.f32 %v3598_v9, %v2109_v45 }
 0x1e9   : > { %v2434_v55 = vpack.c.bf16 %v2123_v4, %v2122_v28 }
 0x1eb   : > { %2438 = vst [vmem:[%s3607_s14 + $0x18] sm:$0xff] %v2434_v55  }
 0x1ec PF: > { %s13_s12 = sadd.s32 1, %s3094_s12  }
 0x1ed   : > { %p10_p5 = scmp.ge.s32.totalorder %s13_s12, 4  }
 0x1ef   :  { %12 = sbr.rel (!%p10_p5) target bundleno = 1 (0x1), region = 77 }

// kernel: tudui_forward.6
= control target key start
LH: loop header
LB: loop body
LE: loop exit
PB: predicated region body
PF: predicated region fallthrough
CT: control target
= control target key end

     0   :  { %s1564_s12 = smov 0   ;;  %s1786_s0 = inlined_call_operand.vmem [shape: bf16[128,896], index: 0, kind: input, shape index: {}]   ;;  %s1787_s1 = inlined_call_operand.vmem [shape: bf16[896,128], index: 1, kind: input, shape index: {}]   ;;  %s1788_s2 = inlined_call_operand.vmem [shape: f32[1,128], index: 2, kind: input, shape index: {}]   ;;  %s1789_s3 = inlined_call_operand.vmem [shape: bf16[32,128], index: 3, kind: output, shape index: {}]  }
   0x1 LB: > { %s1170_s13 = sadd.s32 4294967295, %s1542_s12   ;;  %p1174_p0 = scmp.ge.s32.totalorder %s1542_s12, 1  ;;  %s1542_s12 = sphi %s1564_s12, %s13_s12  }
   0x2   : > { %p139_p1 = scmp.lt.s32.totalorder %s1542_s12, 3 }
   0x4   : > { %p140_p2 = pnand %p1174_p0, %p139_p1 }
   0x5   : > { %v1440_v0 = vld [vmem:[%s1787_s1 + $0x40] sm:$0xff] (!%p140_p2)   ;;  %v1444_v4 = vld [vmem:[%s1787_s1 + $0x48] sm:$0xff] (!%p140_p2)   ;;  %v1448_v8 = vld [vmem:[%s1787_s1 + $0x50] sm:$0xff] (!%p140_p2)   ;;  %s1175_s19 = sshll.u32 (!%p140_p2), %s1170_s13, 3 }
   0x6   : > { %143 = sbr.rel (%p140_p2) target bundleno = 333 (0x14d), region = 32  ;;  %v1441_v1 = vld [vmem:[%s1787_s1 + $0xc0] sm:$0xff] (!%p140_p2)   ;;  %1275 = vmatprep.subr.bf16.mxu0 (!%p140_p2), %v1440_v0  ;;  %v1445_v5 = vld [vmem:[%s1787_s1 + $0xc8] sm:$0xff] (!%p140_p2)   ;;  %v1449_v9 = vld [vmem:[%s1787_s1 + $0xd0] sm:$0xff] (!%p140_p2)   ;;  %p165_p3 = scmp.lt.s32.totalorder (!%p140_p2), %s1175_s19, 15 }
   0x7   : > { %v1442_v2 = vld [vmem:[%s1787_s1] sm:$0xff] (!%p140_p2)   ;;  %1315 = vmatprep.subr.bf16.mxu1 (!%p140_p2), %v1441_v1  ;;  %v1446_v6 = vld [vmem:[%s1787_s1 + $0x8] sm:$0xff] (!%p140_p2)   ;;  %v1450_v10 = vld [vmem:[%s1787_s1 + $0x10] sm:$0xff] (!%p140_p2)  }
   0x8   : > { %v1443_v3 = vld [vmem:[%s1787_s1 + $0x80] sm:$0xff] (!%p140_p2)   ;;  %1276 = vmatpush3.bf16.msra.mxu0 (!%p140_p2), %v1442_v2  ;;  %v1447_v7 = vld [vmem:[%s1787_s1 + $0x88] sm:$0xff] (!%p140_p2)   ;;  %v1451_v11 = vld [vmem:[%s1787_s1 + $0x90] sm:$0xff] (!%p140_p2)  }
   0x9   : > { %1316 = vmatpush3.bf16.msra.mxu1 (!%p140_p2), %v1443_v3  ;;  %1277 = vmatprep.subr.bf16.mxu0 (!%p140_p2), %v1444_v4  ;;  %v1452_v12 = vld [vmem:[%s1787_s1 + $0x58] sm:$0xff] (!%p140_p2)   ;;  %v1456_v16 = vld [vmem:[%s1787_s1 + $0x60] sm:$0xff] (!%p140_p2)   ;;  %v1460_v20 = vld [vmem:[%s1787_s1 + $0x68] sm:$0xff] (!%p140_p2)  }
   0xa   : > { %1317 = vmatprep.subr.bf16.mxu1 (!%p140_p2), %v1445_v5  ;;  %v1453_v13 = vld [vmem:[%s1787_s1 + $0xd8] sm:$0xff] (!%p140_p2)   ;;  %v1457_v17 = vld [vmem:[%s1787_s1 + $0xe0] sm:$0xff] (!%p140_p2)   ;;  %v1461_v21 = vld [vmem:[%s1787_s1 + $0xe8] sm:$0xff] (!%p140_p2)  }
   0xb   : > { %v1454_v14 = vld [vmem:[%s1787_s1 + $0x18] sm:$0xff] (!%p140_p2)   ;;  %v1458_v18 = vld [vmem:[%s1787_s1 + $0x20] sm:$0xff] (!%p140_p2)   ;;  %v1462_v22 = vld [vmem:[%s1787_s1 + $0x28] sm:$0xff] (!%p140_p2)  }
   0xc   : > { %1278 = vmatpush3.bf16.msra.mxu0 (!%p140_p2), %v1446_v6  ;;  %v1455_v15 = vld [vmem:[%s1787_s1 + $0x98] sm:$0xff] (!%p140_p2)   ;;  %v1459_v19 = vld [vmem:[%s1787_s1 + $0xa0] sm:$0xff] (!%p140_p2)   ;;  %v1463_v23 = vld [vmem:[%s1787_s1 + $0xa8] sm:$0xff] (!%p140_p2)  }
   0xd   : > { %1318 = vmatpush3.bf16.msra.mxu1 %v1447_v7  ;;  %1279 = vmatprep.subr.bf16.mxu0 %v1448_v8  ;;  %s1791_s19 = smov (!%p165_p3, %s1175_s19), 15  ;;  %v1464_v24 = vld [vmem:[%s1787_s1 + $0x70] sm:$0xff]   ;;  %v1468_v28 = vld [vmem:[%s1787_s1 + $0x78] sm:$0xff]   ;;  %v1478_v36 = vld [vmem:[%s1787_s1 + $0x140] sm:$0xff]  }
   0xe   : > { %1319 = vmatprep.subr.bf16.mxu1 %v1449_v9  ;;  %v1465_v25 = vld [vmem:[%s1787_s1 + $0xf0] sm:$0xff]   ;;  %s1431_s17 = smul.u32 28, %s1791_s19  ;;  %v1469_v29 = vld [vmem:[%s1787_s1 + $0xf8] sm:$0xff]   ;;  %v1479_v37 = vld [vmem:[%s1787_s1 + $0x100] sm:$0xff]  }
   0xf   : > { %v1466_v26 = vld [vmem:[%s1787_s1 + $0x30] sm:$0xff]   ;;  %v1470_v30 = vld [vmem:[%s1787_s1 + $0x38] sm:$0xff]   ;;  %v1480_v38 = vld [vmem:[%s1787_s1 + $0x148] sm:$0xff]  }
  0x10   : > { %1280 = vmatpush3.bf16.msra.mxu0 %v1450_v10  ;;  %v1467_v27 = vld [vmem:[%s1787_s1 + $0xb0] sm:$0xff]   ;;  %s1667_s28 = scalar_lea.vmem %s1786_s0, %s1431_s17  ;;  %v1471_v31 = vld [vmem:[%s1787_s1 + $0xb8] sm:$0xff]   ;;  %v1481_v39 = vld [vmem:[%s1787_s1 + $0x180] sm:$0xff]  }
  0x11   : > { %1320 = vmatpush3.bf16.msra.mxu1 %v1451_v11  ;;  %1281 = vmatprep.subr.bf16.mxu0 %v1452_v12  ;;  %v1472_v32 = vld [vmem:[%s1667_s28] ss:$28 sps:$4 sm:$0xff]   ;;  %v1475_v34 = vld [vmem:[%s1667_s28 + $0x8] ss:$28 sps:$4 sm:$0xff]   ;;  %v1487_v43 = vld [vmem:[%s1667_s28 + $0x38] ss:$28 sps:$4 sm:$0xff]  }
  0x12   : > { %1321 = vmatprep.subr.bf16.mxu1 %v1453_v13  ;;  %v1474_v33 = vld [vmem:[%s1667_s28 + $0x4] ss:$28 sps:$4 sm:$0xff]   ;;  %v1477_v35 = vld [vmem:[%s1667_s28 + $0xc] ss:$28 sps:$4 sm:$0xff]   ;;  %v1483_v41 = vld [vmem:[%s1667_s28 + $0x3c] ss:$28 sps:$4 sm:$0xff]  }
  0x13   : > { %834 = vmatprep.mubr.bf16.mxu0 %v1474_v33  ;;  %899 = vmatprep.mubr.bf16.mxu1 %v1477_v35  ;;  %v1482_v40 = vld [vmem:[%s1787_s1 + $0x108] sm:$0xff]   ;;  %v1485_v42 = vld [vmem:[%s1667_s28 + $0x44] ss:$28 sps:$4 sm:$0xff]   ;;  %v1489_v45 = vld [vmem:[%s1787_s1 + $0x150] sm:$0xff]  }
  0x14   : > { %1282 = vmatpush3.bf16.msra.mxu0 %v1454_v14  ;;  %v1488_v44 = vld [vmem:[%s1667_s28 + $0x40] ss:$28 sps:$4 sm:$0xff]   ;;  %v1490_v46 = vld [vmem:[%s1787_s1 + $0x188] sm:$0xff]   ;;  %v1491_v47 = vld [vmem:[%s1787_s1 + $0x110] sm:$0xff]  }
  0x15   : > { %1322 = vmatpush3.bf16.msra.mxu1 %v1455_v15  ;;  %1283 = vmatprep.subr.bf16.mxu0 %v1456_v16  ;;  %v1492_v48 = vld [vmem:[%s1787_s1 + $0x158] sm:$0xff]   ;;  %v1493_v49 = vld [vmem:[%s1787_s1 + $0x190] sm:$0xff]   ;;  %v1501_v55 = vld [vmem:[%s1787_s1 + $0x160] sm:$0xff]  }
  0x16   : > { %1323 = vmatprep.subr.bf16.mxu1 %v1457_v17  ;;  %v1494_v50 = vld [vmem:[%s1787_s1 + $0x118] sm:$0xff]   ;;  %v1495_v51 = vld [vmem:[%s1667_s28 + $0x74] ss:$28 sps:$4 sm:$0xff]   ;;  %v1503_v57 = vld [vmem:[%s1787_s1 + $0x120] sm:$0xff]  }
  0x17   : > { %v1497_v52 = vld [vmem:[%s1667_s28 + $0x7c] ss:$28 sps:$4 sm:$0xff]   ;;  %v1499_v53 = vld [vmem:[%s1667_s28 + $0x70] ss:$28 sps:$4 sm:$0xff]   ;;  %v1505_v59 = vld [vmem:[%s1787_s1 + $0x1a0] sm:$0xff]  }
  0x18   : > { %1284 = vmatpush3.bf16.msra.mxu0 %v1458_v18  ;;  %v1500_v54 = vld [vmem:[%s1667_s28 + $0x78] ss:$28 sps:$4 sm:$0xff]   ;;  %v1504_v58 = vld [vmem:[%s1787_s1 + $0x168] sm:$0xff]   ;;  %v1528_v15 = vld [vmem:[%s1667_s28 + $0x84] ss:$28 sps:$4 sm:$0xff]  }
  0x19   : > { %1324 = vmatpush3.bf16.msra.mxu1 %v1459_v19  ;;  %1285 = vmatprep.subr.bf16.mxu0 %v1460_v20  ;;  %v1502_v56 = vld [vmem:[%s1787_s1 + $0x198] sm:$0xff]   ;;  %v1506_v60 = vld [vmem:[%s1787_s1 + $0x128] sm:$0xff]   ;;  %v1509_v62 = vld [vmem:[%s1667_s28 + $0xb4] ss:$28 sps:$4 sm:$0xff]  }
  0x1a   : > { %1325 = vmatprep.subr.bf16.mxu1 %v1461_v21  ;;  %v1507_v61 = vld [vmem:[%s1667_s28 + $0xac] ss:$28 sps:$4 sm:$0xff]   ;;  %v1513_v1 = vld [vmem:[%s1787_s1 + $0x170] sm:$0xff]   ;;  %v1516_v4 = vld [vmem:[%s1787_s1 + $0x178] sm:$0xff]  }
  0x1b   : > { %v1511_v63 = vld [vmem:[%s1667_s28 + $0xa8] ss:$28 sps:$4 sm:$0xff]   ;;  %v1512_v0 = vld [vmem:[%s1667_s28 + $0xb0] ss:$28 sps:$4 sm:$0xff]   ;;  %v1518_v6 = vld [vmem:[%s1787_s1 + $0x138] sm:$0xff]  }
  0x1c   : > { %1286 = vmatpush3.bf16.msra.mxu0 %v1462_v22  ;;  %v1514_v2 = vld [vmem:[%s1787_s1 + $0x1a8] sm:$0xff]   ;;  %v1515_v3 = vld [vmem:[%s1787_s1 + $0x130] sm:$0xff]   ;;  %v1522_v9 = vld [vmem:[%s1787_s1 + $0x1b8] sm:$0xff]  }
  0x1d   : > { %1326 = vmatpush3.bf16.msra.mxu1 %v1463_v23  ;;  %1287 = vmatprep.subr.bf16.mxu0 %v1464_v24  ;;  %v1517_v5 = vld [vmem:[%s1787_s1 + $0x1b0] sm:$0xff]   ;;  %v1525_v11 = vld [vmem:[%s1667_s28 + $0x4c] ss:$28 sps:$4 sm:$0xff]   ;;  %v1532_v16 = vld [vmem:[%s1667_s28 + $0xc0] ss:$28 sps:$4 sm:$0xff]  }
  0x1e   : > { %1327 = vmatprep.subr.bf16.mxu1 %v1465_v25  ;;  %v1519_v7 = vld [vmem:[%s1667_s28 + $0x10] ss:$28 sps:$4 sm:$0xff]   ;;  %v1523_v10 = vld [vmem:[%s1667_s28 + $0x18] ss:$28 sps:$4 sm:$0xff]   ;;  %v1531_v13 = vld [vmem:[%s1667_s28 + $0x88] ss:$28 sps:$4 sm:$0xff]  }
  0x1f   : > { %v1521_v8 = vld [vmem:[%s1667_s28 + $0x14] ss:$28 sps:$4 sm:$0xff]   ;;  %v1527_v14 = vld [vmem:[%s1667_s28 + $0x48] ss:$28 sps:$4 sm:$0xff]   ;;  %v1530_v17 = vld [vmem:[%s1667_s28 + $0x80] ss:$28 sps:$4 sm:$0xff]  }
  0x20   : > { %1288 = vmatpush3.bf16.msra.mxu0 %v1466_v26  ;;  %v1524_v12 = vld [vmem:[%s1667_s28 + $0x50] ss:$28 sps:$4 sm:$0xff]   ;;  %v1533_v18 = vld [vmem:[%s1667_s28 + $0xbc] ss:$28 sps:$4 sm:$0xff]  }
  0x21   : > { %1328 = vmatpush3.bf16.msra.mxu1 %v1467_v27  ;;  %1289 = vmatprep.subr.bf16.mxu0 %v1468_v28  ;;  %v1535_v19 = vld [vmem:[%s1667_s28 + $0xb8] ss:$28 sps:$4 sm:$0xff]   ;;  %s1177_s28 = sshll.u32 %s1170_s13, 1 }
  0x22   : > { %1329 = vmatprep.subr.bf16.mxu1 %v1469_v29  ;;  %p172_p4 = scmp.lt.s32.totalorder %s1177_s28, 3 }
  0x24   : > { %1290 = vmatpush3.bf16.msra.mxu0 %v1470_v30  ;;  %s1793_s28 = smov (!%p172_p4, %s1177_s28), 3 }
  0x25   : > { %1330 = vmatpush3.bf16.msra.mxu1 %v1471_v31  ;;  %1355 = vmatprep.subr.bf16.mxu0 %v1478_v36  ;;  %s1178_s8 = sshll.u32 %s1793_s28, 2 }
  0x26   : > { %1407 = vmatprep.subr.bf16.mxu1 %v1481_v39  ;;  %s175_s13 = scalar_lea.vmem %s1789_s3, %s1178_s8 }
  0x27   : > { %835 = vmatmul.mubr.bf16.vlgmr.msra.gmra.mrb[0].mxu0 %v1472_v32 }
  0x28   : > { %900 = vmatmul.mubr.bf16.vlgmr.msra.gmra.mrb[0].mxu1 %v1475_v34  ;;  %1356 = vmatpush3.bf16.msra.mxu0 %v1479_v37 }
  0x29   : > { %1357 = vmatprep.subr.bf16.mxu0 %v1480_v38  ;;  %1408 = vmatpush3.bf16.msra.mxu1 %v1481_v39 }
  0x2a   : > { %842 = vmatprep.mubr.bf16.mxu0 %v1483_v41  ;;  %907 = vmatprep.mubr.bf16.mxu1 %v1485_v42 }
  0x2b   : > { %1409 = vmatprep.subr.bf16.mxu1 %v1490_v46 }
  0x2c   : > { %1358 = vmatpush3.bf16.msra.mxu0 %v1482_v40 }
  0x2d   : > { %1359 = vmatprep.subr.bf16.mxu0 %v1489_v45  ;;  %1410 = vmatpush3.bf16.msra.mxu1 %v1490_v46 }
  0x2e   : > { %1411 = vmatprep.subr.bf16.mxu1 %v1493_v49 }
  0x2f   : > { %843 = vmatmul.mubr.bf16.gmra.mrb[4].mxu0 %v1487_v43 }
  0x30   : > { %908 = vmatmul.mubr.bf16.gmra.mrb[4].mxu1 %v1488_v44  ;;  %1360 = vmatpush3.bf16.msra.mxu0 %v1491_v47 }
  0x31   : > { %1361 = vmatprep.subr.bf16.mxu0 %v1492_v48  ;;  %1412 = vmatpush3.bf16.msra.mxu1 %v1493_v49 }
  0x32   : > { %850 = vmatprep.mubr.bf16.mxu0 %v1495_v51  ;;  %915 = vmatprep.mubr.bf16.mxu1 %v1497_v52 }
  0x33   : > { %1413 = vmatprep.subr.bf16.mxu1 %v1502_v56 }
  0x34   : > { %1362 = vmatpush3.bf16.msra.mxu0 %v1494_v50 }
  0x35   : > { %1363 = vmatprep.subr.bf16.mxu0 %v1501_v55  ;;  %1414 = vmatpush3.bf16.msra.mxu1 %v1502_v56 }
  0x36   : > { %1415 = vmatprep.subr.bf16.mxu1 %v1505_v59 }
  0x37   : > { %851 = vmatmul.mubr.bf16.gmra.mrb[8].mxu0 %v1499_v53 }
  0x38   : > { %916 = vmatmul.mubr.bf16.gmra.mrb[8].mxu1 %v1500_v54  ;;  %1364 = vmatpush3.bf16.msra.mxu0 %v1503_v57 }
  0x39   : > { %1365 = vmatprep.subr.bf16.mxu0 %v1504_v58  ;;  %1416 = vmatpush3.bf16.msra.mxu1 %v1505_v59 }
  0x3a   : > { %858 = vmatprep.mubr.bf16.mxu0 %v1507_v61  ;;  %923 = vmatprep.mubr.bf16.mxu1 %v1509_v62 }
  0x3b   : > { %1417 = vmatprep.subr.bf16.mxu1 %v1514_v2 }
  0x3c   : > { %1366 = vmatpush3.bf16.msra.mxu0 %v1506_v60 }
  0x3d   : > { %1367 = vmatprep.subr.bf16.mxu0 %v1513_v1  ;;  %1418 = vmatpush3.bf16.msra.mxu1 %v1514_v2 }
  0x3e   : > { %1419 = vmatprep.subr.bf16.mxu1 %v1517_v5 }
  0x3f   : > { %859 = vmatmul.mubr.bf16.gmra.mrb[12].mxu0 %v1511_v63 }
  0x40   : > { %924 = vmatmul.mubr.bf16.gmra.mrb[12].mxu1 %v1512_v0  ;;  %1368 = vmatpush3.bf16.msra.mxu0 %v1515_v3 }
  0x41   : > { %1369 = vmatprep.subr.bf16.mxu0 %v1516_v4  ;;  %1420 = vmatpush3.bf16.msra.mxu1 %v1517_v5 }
  0x42   : > { %964 = vmatprep.mubr.bf16.mxu0 %v1521_v8  ;;  %1421 = vmatprep.subr.bf16.mxu1 %v1522_v9 }
  0x43   : > { %1423 = vmatprep.mubr.bf16.mxu1 %v1523_v10 }
  0x44   : > { %1370 = vmatpush3.bf16.msra.mxu0 %v1518_v6 }
  0x45   : > { %1422 = vmatpush3.bf16.msra.mxu1 %v1522_v9 }
  0x47   : > { %965 = vmatmul.mubr.bf16.vlgmr.msra.gmra.mrb[16].mxu0 %v1519_v7 }
  0x48   : > { %972 = vmatprep.mubr.bf16.mxu0 %v1525_v11  ;;  %1424 = vmatmul.mubr.bf16.vlgmr.msra.gmra.mrb[16].mxu1 %v1524_v12 }
  0x49   : > { %1427 = vmatprep.mubr.bf16.mxu1 %v1531_v13 }
  0x4f   : > { %973 = vmatmul.mubr.bf16.gmra.mrb[20].mxu0 %v1527_v14 }
  0x50   : > { %980 = vmatprep.mubr.bf16.mxu0 %v1528_v15  ;;  %1428 = vmatmul.mubr.bf16.gmra.mrb[20].mxu1 %v1532_v16 }
  0x57   : > { %981 = vmatmul.mubr.bf16.gmra.mrb[24].mxu0 %v1530_v17 }
  0x58   : > { %988 = vmatprep.mubr.bf16.mxu0 %v1533_v18 }
  0x5f   : > { %989 = vmatmul.mubr.bf16.gmra.mrb[28].mxu0 %v1535_v19 }
  0xfa   : > { %v1291_v20 = vpop.f32.mrb[0].mxu0 }
  0xfb   : > { %v1331_v21 = vpop.f32.mrb[0].mxu1  ;;  %v1292_v22 = vpop.f32.mrb[1].mxu0 }
  0xfc   : > { %v1293_v23 = vadd.f32 %v1292_v22, %v1291_v20  ;;  %v1332_v24 = vpop.f32.mrb[1].mxu1  ;;  %v1294_v25 = vpop.f32.mrb[2].mxu0 }
  0xfd   : > { %v1333_v26 = vadd.f32 %v1332_v24, %v1331_v21  ;;  %v1334_v27 = vpop.f32.mrb[2].mxu1  ;;  %v1295_v28 = vpop.f32.mrb[3].mxu0 }
  0xfe   : > { %v1296_v29 = vadd.f32 %v1295_v28, %v1294_v25  ;;  %v1335_v30 = vpop.f32.mrb[3].mxu1 }
  0xff   : > { %v902_v31 = vadd.f32 %v1333_v26, %v1293_v23  ;;  %v1336_v32 = vadd.f32 %v1335_v30, %v1334_v27 }
 0x101   : > { %v905_v33 = vadd.f32 %v1336_v32, %v1296_v29 }
 0x102   : > { %v1297_v34 = vpop.f32.mrb[4].mxu0 }
 0x103   : > { %v1337_v35 = vpop.f32.mrb[4].mxu1  ;;  %v1298_v36 = vpop.f32.mrb[5].mxu0 }
 0x104   : > { %v1299_v37 = vadd.f32 %v1298_v36, %v1297_v34  ;;  %v1338_v38 = vpop.f32.mrb[5].mxu1  ;;  %v1300_v39 = vpop.f32.mrb[6].mxu0 }
 0x105   : > { %v1339_v40 = vadd.f32 %v1338_v38, %v1337_v35  ;;  %v1340_v41 = vpop.f32.mrb[6].mxu1  ;;  %v1301_v42 = vpop.f32.mrb[7].mxu0 }
 0x106   : > { %v1302_v43 = vadd.f32 %v1301_v42, %v1300_v39  ;;  %v1341_v44 = vpop.f32.mrb[7].mxu1 }
 0x107   : > { %v910_v45 = vadd.f32 %v1339_v40, %v1299_v37  ;;  %v1342_v46 = vadd.f32 %v1341_v44, %v1340_v41 }
 0x109   : > { %v913_v47 = vadd.f32 %v1342_v46, %v1302_v43 }
 0x10a   : > { %v1303_v48 = vpop.f32.mrb[8].mxu0 }
 0x10b   : > { %v1343_v49 = vpop.f32.mrb[8].mxu1  ;;  %v1304_v50 = vpop.f32.mrb[9].mxu0 }
 0x10c   : > { %v1344_v51 = vpop.f32.mrb[9].mxu1  ;;  %v1305_v52 = vadd.f32 %v1304_v50, %v1303_v48  ;;  %v1306_v54 = vpop.f32.mrb[10].mxu0 }
 0x10d   : > { %v1345_v53 = vadd.f32 %v1344_v51, %v1343_v49  ;;  %v1346_v55 = vpop.f32.mrb[10].mxu1  ;;  %v1307_v56 = vpop.f32.mrb[11].mxu0 }
 0x10e   : > { %v1347_v57 = vpop.f32.mrb[11].mxu1  ;;  %v1308_v59 = vadd.f32 %v1307_v56, %v1306_v54 }
 0x10f   : > { %v918_v58 = vadd.f32 %v1345_v53, %v1305_v52  ;;  %v1348_v60 = vadd.f32 %v1347_v57, %v1346_v55 }
 0x111   : > { %v921_v61 = vadd.f32 %v1348_v60, %v1308_v59 }
 0x112   : > { %v1309_v62 = vpop.f32.mrb[12].mxu0 }
 0x113   : > { %v1349_v63 = vpop.f32.mrb[12].mxu1  ;;  %v1310_v0 = vpop.f32.mrb[13].mxu0 }
 0x114   : > { %v1350_v1 = vpop.f32.mrb[13].mxu1  ;;  %v1311_v2 = vadd.f32 %v1310_v0, %v1309_v62  ;;  %v1312_v4 = vpop.f32.mrb[14].mxu0 }
 0x115   : > { %v1351_v3 = vadd.f32 %v1350_v1, %v1349_v63  ;;  %v1352_v5 = vpop.f32.mrb[14].mxu1  ;;  %v1313_v6 = vpop.f32.mrb[15].mxu0 }
 0x116   : > { %v1353_v7 = vpop.f32.mrb[15].mxu1  ;;  %v1314_v9 = vadd.f32 %v1313_v6, %v1312_v4 }
 0x117   : > { %v926_v8 = vadd.f32 %v1351_v3, %v1311_v2  ;;  %v1354_v10 = vadd.f32 %v1353_v7, %v1352_v5  ;;  %v1263_v3 = vld [vmem:[%s1788_s2] ss:$0 sm:$0xff] }
 0x119   : > { %v929_v11 = vadd.f32 %v1354_v10, %v1314_v9 }
 0x11a   : > { %v1371_v12 = vpop.f32.mrb[16].mxu0 }
 0x11b   : > { %v1372_v13 = vpop.f32.mrb[17].mxu0  ;;  %v1425_v18 = vpop.f32.mrb[16].mxu1 }
 0x11c   : > { %v1373_v14 = vadd.f32 %v1372_v13, %v1371_v12  ;;  %v1374_v15 = vpop.f32.mrb[18].mxu0  ;;  %v1031_v20 = vpop.f32.mrb[17].mxu1 }
 0x11d   : > { %v1375_v16 = vpop.f32.mrb[19].mxu0  ;;  %v1426_v22 = vpop.f32.mrb[18].mxu1 }
 0x11e   : > { %v1376_v17 = vadd.f32 %v1375_v16, %v1374_v15  ;;  %v967_v19 = vadd.f32 %v1373_v14, %v902_v31  ;;  %v1034_v24 = vpop.f32.mrb[19].mxu1 }
 0x120   : > { %v1032_v21 = vadd.f32 %v1031_v20, %v967_v19  ;;  %v970_v23 = vadd.f32 %v1376_v17, %v905_v33 }
 0x122   : > { %v1035_v25 = vadd.f32 %v1034_v24, %v970_v23  ;;  %v1377_v26 = vpop.f32.mrb[20].mxu0 }
 0x123   : > { %v1378_v27 = vpop.f32.mrb[21].mxu0  ;;  %v1429_v36 = vpop.f32.mrb[20].mxu1 }
 0x124   : > { %v1073_v28 = vmax.f32 %v1032_v21, %v1035_v25  ;;  %v1379_v29 = vadd.f32 %v1378_v27, %v1377_v26  ;;  %v1380_v30 = vpop.f32.mrb[22].mxu0  ;;  %v1047_v37 = vpop.f32.mrb[21].mxu1 }
 0x125   : > { %v1381_v32 = vpop.f32.mrb[23].mxu0  ;;  %v1430_v31 = vpop.f32.mrb[22].mxu1 }
 0x126   : > { %1074 = vst [vmem:[#allocation3] sm:$0xff] %v1073_v28  ;;  %v975_v34 = vadd.f32 %v1379_v29, %v910_v45  ;;  %v1382_v35 = vadd.f32 %v1381_v32, %v1380_v30  ;;  %v1050_v40 = vpop.f32.mrb[23].mxu1 }
 0x128   : > { %v1040_v38 = vadd.f32 %v1425_v18, %v975_v34  ;;  %v978_v39 = vadd.f32 %v1382_v35, %v913_v47 }
 0x12a   : > { %v1043_v41 = vadd.f32 %v1426_v22, %v978_v39  ;;  %v1383_v42 = vpop.f32.mrb[24].mxu0 }
 0x12b   : > { %v1384_v33 = vpop.f32.mrb[25].mxu0 }
 0x12c   : > { %v1077_v43 = vmax.f32 %v1040_v38, %v1043_v41  ;;  %v1385_v44 = vadd.f32 %v1384_v33, %v1383_v42  ;;  %v1386_v46 = vpop.f32.mrb[26].mxu0 }
 0x12d   : > { %v1387_v48 = vpop.f32.mrb[27].mxu0 }
 0x12e   : > { %1078 = vst [vmem:[#allocation3 + $0x8] sm:$0xff] %v1077_v43  ;;  %v1388_v49 = vadd.f32 %v1387_v48, %v1386_v46  ;;  %v983_v50 = vadd.f32 %v1385_v44, %v918_v58 }
 0x130   : > { %v1048_v51 = vadd.f32 %v1047_v37, %v983_v50  ;;  %v986_v45 = vadd.f32 %v1388_v49, %v921_v61 }
 0x132   : > { %v1051_v52 = vadd.f32 %v1050_v40, %v986_v45  ;;  %v1389_v53 = vpop.f32.mrb[28].mxu0 }
 0x133   : > { %v1390_v54 = vpop.f32.mrb[29].mxu0 }
 0x134   : > { %v1081_v55 = vmax.f32 %v1048_v51, %v1051_v52  ;;  %v1391_v47 = vadd.f32 %v1390_v54, %v1389_v53  ;;  %v1392_v56 = vpop.f32.mrb[30].mxu0 }
 0x135   : > { %v1393_v57 = vpop.f32.mrb[31].mxu0  ;;  %v1087_v58 = vld [vmem:[#allocation3] ss:$2 sm:$0xff]  ;;  %v1091_v61 = vld [vmem:[#allocation3 + $0x1] ss:$2 sm:$0xff] }
 0x136   : > { %1082 = vst [vmem:[#allocation3 + $0x10] sm:$0xff] %v1081_v55  ;;  %v991_v59 = vadd.f32 %v1391_v47, %v926_v8  ;;  %v1394_v60 = vadd.f32 %v1393_v57, %v1392_v56  ;;  %v1094_v2 = vmax.f32 %v1087_v58, %v1091_v61 }
 0x138   : > { %v1056_v62 = vadd.f32 %v1429_v36, %v991_v59  ;;  %v994_v63 = vadd.f32 %v1394_v60, %v929_v11  ;;  %v1102_v7 = vadd.f32 %v1263_v3, %v1094_v2 }
 0x13a   : > { %v1059_v0 = vadd.f32 %v1430_v31, %v994_v63 }
 0x13c   : > { %v1085_v1 = vmax.f32 %v1056_v62, %v1059_v0 }
 0x13e   : > { %1086 = vst [vmem:[#allocation3 + $0x18] sm:$0xff] %v1085_v1 }
 0x145   : > { %v1089_v4 = vld [vmem:[#allocation3 + $0x10] ss:$2 sm:$0xff]  ;;  %v1093_v5 = vld [vmem:[#allocation3 + $0x11] ss:$2 sm:$0xff] }
 0x146   : > { %v1095_v6 = vmax.f32 %v1089_v4, %v1093_v5 }
 0x148   : > { %v1103_v8 = vadd.f32 %v1263_v3, %v1095_v6 }
 0x14a   : > { %v1273_v9 = vpack.c.bf16 %v1103_v8, %v1102_v7 }
 0x14c   : > { %1274 = vst [vmem:[%s175_s13] sm:$0xff] %v1273_v9  }
 0x14d PF: > { %s13_s12 = sadd.s32 1, %s1542_s12  }
 0x14e   : > { %p10_p5 = scmp.ge.s32.totalorder %s13_s12, 4  }
 0x150   :  { %12 = sbr.rel (!%p10_p5) target bundleno = 1 (0x1), region = 65 }

// kernel: tudui_forward.7
= control target key start
LH: loop header
LB: loop body
LE: loop exit
PB: predicated region body
PF: predicated region fallthrough
CT: control target
= control target key end

     0   :  { %v293_v28 = vlaneseq  ;;  %v2127_v36 = vmov 1966171168   ;;  %s2617_s0 = inlined_call_operand.vmem [shape: bf16[2,2048], index: 0, kind: input, shape index: {}]   ;;  %s2618_s1 = inlined_call_operand.vmem [shape: bf16[2048,128], index: 1, kind: input, shape index: {}]   ;;  %s2619_s2 = inlined_call_operand.vmem [shape: f32[1,128], index: 2, kind: input, shape index: {}]   ;;  %s2620_s3 = inlined_call_operand.vmem [shape: bf16[128,128], index: 3, kind: input, shape index: {}]   ;;  %s2621_s4 = inlined_call_operand.vmem [shape: f32[1,128], index: 4, kind: input, shape index: {}]   ;;  %s2622_s5 = inlined_call_operand.hbm [shape: f32[2,128], index: 5, kind: output, shape index: {}]  }
   0x1   :  { %v1965_v0 = vld [vmem:[%s2618_s1 + $0x40] sm:$0xff]   ;;  %v1969_v4 = vld [vmem:[%s2618_s1 + $0x48] sm:$0xff]   ;;  %v1973_v8 = vld [vmem:[%s2618_s1 + $0x50] sm:$0xff]   ;;  %v291_v37 = vunpack.c.l.s4 %v2127_v36 }
   0x2   :  { %v1966_v1 = vld [vmem:[%s2618_s1 + $0xc0] sm:$0xff]   ;;  %1756 = vmatprep.subr.bf16.mxu0 %v1965_v0  ;;  %v1970_v5 = vld [vmem:[%s2618_s1 + $0xc8] sm:$0xff]   ;;  %v1974_v9 = vld [vmem:[%s2618_s1 + $0xd0] sm:$0xff]   ;;  %v294_v33 = vshrl.u32 %v293_v28, 7 }
   0x3   :  { %v1967_v2 = vld [vmem:[%s2618_s1] sm:$0xff]   ;;  %1778 = vmatprep.subr.bf16.mxu1 %v1966_v1  ;;  %v1971_v6 = vld [vmem:[%s2618_s1 + $0x8] sm:$0xff]   ;;  %v1975_v10 = vld [vmem:[%s2618_s1 + $0x10] sm:$0xff]   ;;  %v292_v40 = vunpack.c.0.s8 %v291_v37 }
   0x4   :  { %v1968_v3 = vld [vmem:[%s2618_s1 + $0x80] sm:$0xff]   ;;  %1757 = vmatpush3.bf16.msra.mxu0 %v1967_v2  ;;  %v1972_v7 = vld [vmem:[%s2618_s1 + $0x88] sm:$0xff]   ;;  %v1976_v11 = vld [vmem:[%s2618_s1 + $0x90] sm:$0xff]  }
   0x5   :  { %1779 = vmatpush3.bf16.msra.mxu1 %v1968_v3  ;;  %1758 = vmatprep.subr.bf16.mxu0 %v1969_v4  ;;  %v1977_v12 = vld [vmem:[%s2618_s1 + $0x58] sm:$0xff]   ;;  %v1981_v16 = vld [vmem:[%s2618_s1 + $0x60] sm:$0xff]   ;;  %v1985_v20 = vld [vmem:[%s2618_s1 + $0x68] sm:$0xff]   ;;  %v2266_v41 = vsub.s32 %v292_v40, %v294_v33 }
   0x6   :  { %1780 = vmatprep.subr.bf16.mxu1 %v1970_v5  ;;  %v1978_v13 = vld [vmem:[%s2618_s1 + $0xd8] sm:$0xff]   ;;  %v1982_v17 = vld [vmem:[%s2618_s1 + $0xe0] sm:$0xff]   ;;  %v1986_v21 = vld [vmem:[%s2618_s1 + $0xe8] sm:$0xff]  }
   0x7   :  { %v1979_v14 = vld [vmem:[%s2618_s1 + $0x18] sm:$0xff]   ;;  %v1983_v18 = vld [vmem:[%s2618_s1 + $0x20] sm:$0xff]   ;;  %v1987_v22 = vld [vmem:[%s2618_s1 + $0x28] sm:$0xff]  }
   0x8   :  { %1759 = vmatpush3.bf16.msra.mxu0 %v1971_v6  ;;  %v1980_v15 = vld [vmem:[%s2618_s1 + $0x98] sm:$0xff]   ;;  %v1984_v19 = vld [vmem:[%s2618_s1 + $0xa0] sm:$0xff]   ;;  %v1988_v23 = vld [vmem:[%s2618_s1 + $0xa8] sm:$0xff]  }
   0x9   :  { %1781 = vmatpush3.bf16.msra.mxu1 %v1972_v7  ;;  %1760 = vmatprep.subr.bf16.mxu0 %v1973_v8  ;;  %v1989_v24 = vld [vmem:[%s2618_s1 + $0x70] sm:$0xff]   ;;  %v1993_v29 = vld [vmem:[%s2618_s1 + $0x78] sm:$0xff]   ;;  %v22_v34 = vld [vmem:[%s2617_s0] sm:$0xff] }
   0xa   :  { %1782 = vmatprep.subr.bf16.mxu1 %v1974_v9  ;;  %v1990_v25 = vld [vmem:[%s2618_s1 + $0xf0] sm:$0xff]   ;;  %v1994_v30 = vld [vmem:[%s2618_s1 + $0xf8] sm:$0xff]   ;;  %v1998_v35 = vld [vmem:[%s2618_s1 + $0x140] sm:$0xff]   ;;  %v289_v39 = vcombine.high %v22_v34, %v22_v34  ;;  %v296_v42 = vrot.slane %v22_v34, %v2266_v41 }
   0xb   :  { %v1991_v26 = vld [vmem:[%s2618_s1 + $0x30] sm:$0xff]   ;;  %v1995_v31 = vld [vmem:[%s2618_s1 + $0x38] sm:$0xff]   ;;  %v1999_v38 = vld [vmem:[%s2618_s1 + $0x1c0] sm:$0xff]  }
   0xc   :  { %1761 = vmatpush3.bf16.msra.mxu0 %v1975_v10  ;;  %v1992_v27 = vld [vmem:[%s2618_s1 + $0xb0] sm:$0xff]   ;;  %v1996_v32 = vld [vmem:[%s2618_s1 + $0xb8] sm:$0xff]   ;;  %v2270_v43 = vrot.slane %v289_v39, %v2266_v41  ;;  %v304_v44 = vcombine.high %v296_v42, %v296_v42  ;;  %v312_v45 = vrot.slane %v296_v42, %v2266_v41  ;;  %v2000_v47 = vld [vmem:[%s2618_s1 + $0x100] sm:$0xff]  }
   0xd   :  { %1783 = vmatpush3.bf16.msra.mxu1 %v1976_v11  ;;  %1762 = vmatprep.subr.bf16.mxu0 %v1977_v12  ;;  %v2001_v49 = vld [vmem:[%s2618_s1 + $0x180] sm:$0xff]   ;;  %v2002_v52 = vld [vmem:[%s2618_s1 + $0x148] sm:$0xff]   ;;  %v2006_v58 = vld [vmem:[%s2618_s1 + $0x150] sm:$0xff]  }
   0xe   :  { %1784 = vmatprep.subr.bf16.mxu1 %v1978_v13  ;;  %v305_v46 = vcombine.high %v2270_v43, %v2270_v43  ;;  %v326_v48 = vrot.slane %v304_v44, %v2266_v41  ;;  %v334_v51 = vcombine.high %v312_v45, %v312_v45  ;;  %v2003_v54 = vld [vmem:[%s2618_s1 + $0x1c8] sm:$0xff]   ;;  %v2007_v59 = vld [vmem:[%s2618_s1 + $0x1d0] sm:$0xff]   ;;  %v2010_v62 = vld [vmem:[%s2618_s1 + $0x158] sm:$0xff]  }
   0xf   :  { %v2004_v55 = vld [vmem:[%s2618_s1 + $0x108] sm:$0xff]   ;;  %v2008_v60 = vld [vmem:[%s2618_s1 + $0x110] sm:$0xff]   ;;  %v2011_v63 = vld [vmem:[%s2618_s1 + $0x1d8] sm:$0xff]  }
  0x10   :  { %1763 = vmatpush3.bf16.msra.mxu0 %v1979_v14  ;;  %v333_v50 = vrot.slane %v305_v46, %v2266_v41  ;;  %1203 = vmatprep.mubr.bf16.mxu0 %v326_v48  ;;  %v336_v53 = vcombine.high %v326_v48, %v326_v48  ;;  %v2005_v57 = vld [vmem:[%s2618_s1 + $0x188] sm:$0xff]   ;;  %v2009_v61 = vld [vmem:[%s2618_s1 + $0x190] sm:$0xff]   ;;  %v2012_v0 = vld [vmem:[%s2618_s1 + $0x118] sm:$0xff]  }
  0x11   :  { %1785 = vmatpush3.bf16.msra.mxu1 %v1980_v15  ;;  %1764 = vmatprep.subr.bf16.mxu0 %v1981_v16  ;;  %v2013_v1 = vld [vmem:[%s2618_s1 + $0x198] sm:$0xff]   ;;  %v2014_v2 = vld [vmem:[%s2618_s1 + $0x160] sm:$0xff]   ;;  %v2018_v6 = vld [vmem:[%s2618_s1 + $0x168] sm:$0xff]  }
  0x12   :  { %1786 = vmatprep.subr.bf16.mxu1 %v1982_v17  ;;  %v337_v56 = vcombine.high %v333_v50, %v333_v50  ;;  %1243 = vmatprep.mubr.bf16.mxu1 %v336_v53  ;;  %v2015_v3 = vld [vmem:[%s2618_s1 + $0x1e0] sm:$0xff]   ;;  %v2019_v7 = vld [vmem:[%s2618_s1 + $0x1e8] sm:$0xff]   ;;  %v2022_v10 = vld [vmem:[%s2618_s1 + $0x170] sm:$0xff]  }
  0x13   :  { %v2016_v4 = vld [vmem:[%s2618_s1 + $0x120] sm:$0xff]   ;;  %v2020_v8 = vld [vmem:[%s2618_s1 + $0x128] sm:$0xff]   ;;  %v2023_v11 = vld [vmem:[%s2618_s1 + $0x1f0] sm:$0xff]  }
  0x14   :  { %1765 = vmatpush3.bf16.msra.mxu0 %v1983_v18  ;;  %v2017_v5 = vld [vmem:[%s2618_s1 + $0x1a0] sm:$0xff]   ;;  %v2021_v9 = vld [vmem:[%s2618_s1 + $0x1a8] sm:$0xff]   ;;  %v2024_v12 = vld [vmem:[%s2618_s1 + $0x130] sm:$0xff]   ;;  %v319_v18 = vrot.slane %v2270_v43, %v2266_v41 }
  0x15   :  { %1787 = vmatpush3.bf16.msra.mxu1 %v1984_v19  ;;  %1766 = vmatprep.subr.bf16.mxu0 %v1985_v20  ;;  %v2025_v13 = vld [vmem:[%s2618_s1 + $0x1b0] sm:$0xff]   ;;  %v2026_v14 = vld [vmem:[%s2618_s1 + $0x178] sm:$0xff]   ;;  %v2030_v19 = vld [vmem:[%s2618_s1 + $0x240] sm:$0xff]  }
  0x16   :  { %1788 = vmatprep.subr.bf16.mxu1 %v1986_v21  ;;  %v2027_v15 = vld [vmem:[%s2618_s1 + $0x1f8] sm:$0xff]   ;;  %v2031_v20 = vld [vmem:[%s2618_s1 + $0x2c0] sm:$0xff]   ;;  %v2038_v28 = vld [vmem:[%s2618_s1 + $0x250] sm:$0xff]  }
  0x17   :  { %v2028_v16 = vld [vmem:[%s2618_s1 + $0x138] sm:$0xff]   ;;  %v2032_v21 = vld [vmem:[%s2618_s1 + $0x200] sm:$0xff]   ;;  %v2050_v40 = vld [vmem:[%s2618_s1 + $0x268] sm:$0xff]  }
  0x18   :  { %1767 = vmatpush3.bf16.msra.mxu0 %v1987_v22  ;;  %v2029_v17 = vld [vmem:[%s2618_s1 + $0x1b8] sm:$0xff]   ;;  %v2033_v22 = vld [vmem:[%s2618_s1 + $0x280] sm:$0xff]   ;;  %v2051_v42 = vld [vmem:[%s2618_s1 + $0x2e8] sm:$0xff]  }
  0x19   :  { %1789 = vmatpush3.bf16.msra.mxu1 %v1988_v23  ;;  %1768 = vmatprep.subr.bf16.mxu0 %v1989_v24  ;;  %v335_v23 = vcombine.high %v319_v18, %v319_v18  ;;  %v2034_v24 = vld [vmem:[%s2618_s1 + $0x248] sm:$0xff]   ;;  %v2043_v33 = vld [vmem:[%s2618_s1 + $0x2d8] sm:$0xff]   ;;  %v2046_v36 = vld [vmem:[%s2618_s1 + $0x260] sm:$0xff]  }
  0x1a   :  { %1790 = vmatprep.subr.bf16.mxu1 %v1990_v25  ;;  %v2035_v25 = vld [vmem:[%s2618_s1 + $0x2c8] sm:$0xff]   ;;  %v2044_v34 = vld [vmem:[%s2618_s1 + $0x218] sm:$0xff]   ;;  %v2047_v37 = vld [vmem:[%s2618_s1 + $0x2e0] sm:$0xff]  }
  0x1b   :  { %v2049_v39 = vld [vmem:[%s2618_s1 + $0x2a0] sm:$0xff]   ;;  %v2052_v43 = vld [vmem:[%s2618_s1 + $0x228] sm:$0xff]  }
  0x1c   :  { %1769 = vmatpush3.bf16.msra.mxu0 %v1991_v26  ;;  %v2036_v26 = vld [vmem:[%s2618_s1 + $0x208] sm:$0xff]  }
  0x1d   :  { %1791 = vmatpush3.bf16.msra.mxu1 %v1992_v27  ;;  %1770 = vmatprep.subr.bf16.mxu0 %v1993_v29  ;;  %v2037_v27 = vld [vmem:[%s2618_s1 + $0x288] sm:$0xff]   ;;  %v2039_v29 = vld [vmem:[%s2618_s1 + $0x2d0] sm:$0xff]  }
  0x1e   :  { %1792 = vmatprep.subr.bf16.mxu1 %v1994_v30  ;;  %v2040_v30 = vld [vmem:[%s2618_s1 + $0x210] sm:$0xff]   ;;  %v2053_v44 = vld [vmem:[%s2618_s1 + $0x2a8] sm:$0xff]  }
  0x1f   :  { %v23_v46 = vld [vmem:[%s2617_s0 + $0x8] sm:$0xff] }
  0x20   :  { %1771 = vmatpush3.bf16.msra.mxu0 %v1995_v31  ;;  %v2041_v31 = vld [vmem:[%s2618_s1 + $0x290] sm:$0xff]   ;;  %v345_v48 = vrot.slane %v23_v46, %v2266_v41 }
  0x21   :  { %1793 = vmatpush3.bf16.msra.mxu1 %v1996_v32  ;;  %1800 = vmatprep.subr.bf16.mxu0 %v1998_v35  ;;  %v2042_v32 = vld [vmem:[%s2618_s1 + $0x258] sm:$0xff]  }
  0x22   :  { %1822 = vmatprep.subr.bf16.mxu1 %v1999_v38  ;;  %v2045_v35 = vld [vmem:[%s2618_s1 + $0x298] sm:$0xff]   ;;  %v2048_v38 = vld [vmem:[%s2618_s1 + $0x220] sm:$0xff]  }
  0x23   :  { %1204 = vmatmul.mubr.bf16.vlgmr.msra.gmra.mrb[0].mxu0 %v312_v45  ;;  %v2054_v45 = vld [vmem:[%s2618_s1 + $0x270] sm:$0xff]  }
  0x24   :  { %1801 = vmatpush3.bf16.msra.mxu0 %v2000_v47  ;;  %1244 = vmatmul.mubr.bf16.vlgmr.msra.gmra.mrb[0].mxu1 %v334_v51  ;;  %v2055_v47 = vld [vmem:[%s2618_s1 + $0x2f0] sm:$0xff]  }
  0x25   :  { %1802 = vmatprep.subr.bf16.mxu0 %v2002_v52  ;;  %1823 = vmatpush3.bf16.msra.mxu1 %v2001_v49  ;;  %v338_v49 = vcombine.high %v23_v46, %v23_v46  ;;  %v2057_v51 = vld [vmem:[%s2618_s1 + $0x2b0] sm:$0xff]   ;;  %v353_v52 = vcombine.high %v345_v48, %v345_v48 }
  0x26   :  { %1283 = vmatprep.mubr.bf16.mxu0 %v333_v50  ;;  %1824 = vmatprep.subr.bf16.mxu1 %v2003_v54  ;;  %v2056_v50 = vld [vmem:[%s2618_s1 + $0x230] sm:$0xff]   ;;  %v2058_v54 = vld [vmem:[%s2618_s1 + $0x278] sm:$0xff]  }
  0x27   :  { %1323 = vmatprep.mubr.bf16.mxu1 %v337_v56  ;;  %v2458_v53 = vrot.slane %v338_v49, %v2266_v41  ;;  %v375_v56 = vrot.slane %v353_v52, %v2266_v41 }
  0x28   :  { %1803 = vmatpush3.bf16.msra.mxu0 %v2004_v55  ;;  %v2059_v55 = vld [vmem:[%s2618_s1 + $0x2f8] sm:$0xff]  }
  0x29   :  { %1804 = vmatprep.subr.bf16.mxu0 %v2006_v58  ;;  %1825 = vmatpush3.bf16.msra.mxu1 %v2005_v57  ;;  %v354_v57 = vcombine.high %v2458_v53, %v2458_v53  ;;  %v2060_v58 = vld [vmem:[%s2618_s1 + $0x238] sm:$0xff]  }
  0x2a   :  { %1826 = vmatprep.subr.bf16.mxu1 %v2007_v59  ;;  %v2061_v59 = vld [vmem:[%s2618_s1 + $0x2b8] sm:$0xff]  }
  0x2c   :  { %1805 = vmatpush3.bf16.msra.mxu0 %v2008_v60  ;;  %v385_v60 = vcombine.high %v375_v56, %v375_v56 }
  0x2d   :  { %1806 = vmatprep.subr.bf16.mxu0 %v2010_v62  ;;  %1827 = vmatpush3.bf16.msra.mxu1 %v2009_v61  ;;  %v361_v61 = vrot.slane %v345_v48, %v2266_v41  ;;  %v2062_v62 = vld [vmem:[%s2618_s1 + $0x340] sm:$0xff]  }
  0x2e   :  { %1828 = vmatprep.subr.bf16.mxu1 %v2011_v63  ;;  %v2063_v63 = vld [vmem:[%s2618_s1 + $0x3c0] sm:$0xff]  }
  0x30   :  { %1807 = vmatpush3.bf16.msra.mxu0 %v2012_v0  ;;  %v382_v0 = vrot.slane %v354_v57, %v2266_v41 }
  0x31   :  { %1808 = vmatprep.subr.bf16.mxu0 %v2014_v2  ;;  %1829 = vmatpush3.bf16.msra.mxu1 %v2013_v1  ;;  %v2064_v1 = vld [vmem:[%s2618_s1 + $0x300] sm:$0xff]  }
  0x32   :  { %1830 = vmatprep.subr.bf16.mxu1 %v2015_v3  ;;  %v2065_v2 = vld [vmem:[%s2618_s1 + $0x380] sm:$0xff]   ;;  %v383_v3 = vcombine.high %v361_v61, %v361_v61 }
  0x34   :  { %1809 = vmatpush3.bf16.msra.mxu0 %v2016_v4  ;;  %v2066_v4 = vld [vmem:[%s2618_s1 + $0x348] sm:$0xff]  }
  0x35   :  { %1810 = vmatprep.subr.bf16.mxu0 %v2018_v6  ;;  %1831 = vmatpush3.bf16.msra.mxu1 %v2017_v5  ;;  %v2067_v5 = vld [vmem:[%s2618_s1 + $0x3c8] sm:$0xff]   ;;  %v386_v6 = vcombine.high %v382_v0, %v382_v0 }
  0x36   :  { %1832 = vmatprep.subr.bf16.mxu1 %v2019_v7  ;;  %v2068_v7 = vld [vmem:[%s2618_s1 + $0x308] sm:$0xff]  }
  0x38   :  { %1811 = vmatpush3.bf16.msra.mxu0 %v2020_v8  ;;  %v2069_v8 = vld [vmem:[%s2618_s1 + $0x388] sm:$0xff]  }
  0x39   :  { %1812 = vmatprep.subr.bf16.mxu0 %v2022_v10  ;;  %1833 = vmatpush3.bf16.msra.mxu1 %v2021_v9  ;;  %v2070_v9 = vld [vmem:[%s2618_s1 + $0x350] sm:$0xff]  }
  0x3a   :  { %1834 = vmatprep.subr.bf16.mxu1 %v2023_v11  ;;  %v2071_v10 = vld [vmem:[%s2618_s1 + $0x3d0] sm:$0xff]  }
  0x3b   :  { %v2072_v11 = vld [vmem:[%s2618_s1 + $0x310] sm:$0xff]  }
  0x3c   :  { %1813 = vmatpush3.bf16.msra.mxu0 %v2024_v12  ;;  %v2073_v12 = vld [vmem:[%s2618_s1 + $0x390] sm:$0xff]  }
  0x3d   :  { %1814 = vmatprep.subr.bf16.mxu0 %v2026_v14  ;;  %1835 = vmatpush3.bf16.msra.mxu1 %v2025_v13  ;;  %v2074_v13 = vld [vmem:[%s2618_s1 + $0x358] sm:$0xff]  }
  0x3e   :  { %1836 = vmatprep.subr.bf16.mxu1 %v2027_v15  ;;  %v2075_v14 = vld [vmem:[%s2618_s1 + $0x3d8] sm:$0xff]  }
  0x3f   :  { %v2076_v15 = vld [vmem:[%s2618_s1 + $0x318] sm:$0xff]  }
  0x40   :  { %1815 = vmatpush3.bf16.msra.mxu0 %v2028_v16  ;;  %v2077_v16 = vld [vmem:[%s2618_s1 + $0x398] sm:$0xff]  }
  0x41   :  { %1844 = vmatprep.subr.bf16.mxu0 %v2030_v19  ;;  %1837 = vmatpush3.bf16.msra.mxu1 %v2029_v17  ;;  %v2078_v17 = vld [vmem:[%s2618_s1 + $0x360] sm:$0xff]  }
  0x42   :  { %1866 = vmatprep.subr.bf16.mxu1 %v2031_v20  ;;  %v2080_v19 = vld [vmem:[%s2618_s1 + $0x320] sm:$0xff]  }
  0x43   :  { %1284 = vmatmul.mubr.bf16.vlgmr.msra.gmra.mrb[4].mxu0 %v319_v18  ;;  %v2079_v18 = vld [vmem:[%s2618_s1 + $0x3e0] sm:$0xff]  }
  0x44   :  { %1845 = vmatpush3.bf16.msra.mxu0 %v2032_v21  ;;  %1324 = vmatmul.mubr.bf16.vlgmr.msra.gmra.mrb[4].mxu1 %v335_v23  ;;  %v2081_v20 = vld [vmem:[%s2618_s1 + $0x3a0] sm:$0xff]   ;;  %v2082_v21 = vld [vmem:[%s2618_s1 + $0x368] sm:$0xff]  }
  0x45   :  { %1846 = vmatprep.subr.bf16.mxu0 %v2034_v24  ;;  %1867 = vmatpush3.bf16.msra.mxu1 %v2033_v22  ;;  %v2083_v22 = vld [vmem:[%s2618_s1 + $0x3e8] sm:$0xff]  }
  0x46   :  { %1868 = vmatprep.subr.bf16.mxu1 %v2035_v25  ;;  %1363 = vmatprep.mubr.bf16.mxu0 %v375_v56  ;;  %v2084_v23 = vld [vmem:[%s2618_s1 + $0x328] sm:$0xff]   ;;  %v2086_v25 = vld [vmem:[%s2618_s1 + $0x370] sm:$0xff]  }
  0x47   :  { %1403 = vmatprep.mubr.bf16.mxu1 %v385_v60  ;;  %v2085_v24 = vld [vmem:[%s2618_s1 + $0x3a8] sm:$0xff]  }
  0x48   :  { %1847 = vmatpush3.bf16.msra.mxu0 %v2036_v26  ;;  %v2087_v26 = vld [vmem:[%s2618_s1 + $0x3f0] sm:$0xff]  }
  0x49   :  { %1848 = vmatprep.subr.bf16.mxu0 %v2038_v28  ;;  %1869 = vmatpush3.bf16.msra.mxu1 %v2037_v27  ;;  %v2088_v27 = vld [vmem:[%s2618_s1 + $0x330] sm:$0xff]  }
  0x4a   :  { %1870 = vmatprep.subr.bf16.mxu1 %v2039_v29  ;;  %v2089_v28 = vld [vmem:[%s2618_s1 + $0x3b0] sm:$0xff]   ;;  %v2090_v29 = vld [vmem:[%s2618_s1 + $0x378] sm:$0xff]  }
  0x4c   :  { %1849 = vmatpush3.bf16.msra.mxu0 %v2040_v30  ;;  %v2091_v30 = vld [vmem:[%s2618_s1 + $0x3f8] sm:$0xff]  }
  0x4d   :  { %1850 = vmatprep.subr.bf16.mxu0 %v2042_v32  ;;  %1871 = vmatpush3.bf16.msra.mxu1 %v2041_v31 }
  0x4e   :  { %1872 = vmatprep.subr.bf16.mxu1 %v2043_v33 }
  0x50   :  { %1851 = vmatpush3.bf16.msra.mxu0 %v2044_v34 }
  0x51   :  { %1852 = vmatprep.subr.bf16.mxu0 %v2046_v36  ;;  %1873 = vmatpush3.bf16.msra.mxu1 %v2045_v35 }
  0x52   :  { %1874 = vmatprep.subr.bf16.mxu1 %v2047_v37 }
  0x54   :  { %1853 = vmatpush3.bf16.msra.mxu0 %v2048_v38 }
  0x55   :  { %1854 = vmatprep.subr.bf16.mxu0 %v2050_v40  ;;  %1875 = vmatpush3.bf16.msra.mxu1 %v2049_v39 }
  0x56   :  { %1876 = vmatprep.subr.bf16.mxu1 %v2051_v42 }
  0x58   :  { %1855 = vmatpush3.bf16.msra.mxu0 %v2052_v43 }
  0x59   :  { %1856 = vmatprep.subr.bf16.mxu0 %v2054_v45  ;;  %1877 = vmatpush3.bf16.msra.mxu1 %v2053_v44 }
  0x5a   :  { %1878 = vmatprep.subr.bf16.mxu1 %v2055_v47 }
  0x5c   :  { %1857 = vmatpush3.bf16.msra.mxu0 %v2056_v50 }
  0x5d   :  { %1858 = vmatprep.subr.bf16.mxu0 %v2058_v54  ;;  %1879 = vmatpush3.bf16.msra.mxu1 %v2057_v51 }
  0x5e   :  { %1880 = vmatprep.subr.bf16.mxu1 %v2059_v55 }
  0x60   :  { %1859 = vmatpush3.bf16.msra.mxu0 %v2060_v58 }
  0x61   :  { %1888 = vmatprep.subr.bf16.mxu0 %v2062_v62  ;;  %1881 = vmatpush3.bf16.msra.mxu1 %v2061_v59 }
  0x62   :  { %1910 = vmatprep.subr.bf16.mxu1 %v2063_v63 }
  0x63   :  { %1364 = vmatmul.mubr.bf16.vlgmr.msra.gmra.mrb[8].mxu0 %v361_v61 }
  0x64   :  { %1889 = vmatpush3.bf16.msra.mxu0 %v2064_v1  ;;  %1443 = vmatprep.mubr.bf16.mxu0 %v382_v0 }
  0x65   :  { %1404 = vmatmul.mubr.bf16.vlgmr.msra.gmra.mrb[8].mxu1 %v383_v3  ;;  %1890 = vmatprep.subr.bf16.mxu0 %v2066_v4 }
  0x66   :  { %1911 = vmatpush3.bf16.msra.mxu1 %v2065_v2  ;;  %1483 = vmatprep.mubr.bf16.mxu1 %v386_v6 }
  0x67   :  { %1912 = vmatprep.subr.bf16.mxu1 %v2067_v5 }
  0x68   :  { %1891 = vmatpush3.bf16.msra.mxu0 %v2068_v7 }
  0x69   :  { %1892 = vmatprep.subr.bf16.mxu0 %v2070_v9 }
  0x6a   :  { %1913 = vmatpush3.bf16.msra.mxu1 %v2069_v8 }
  0x6b   :  { %1914 = vmatprep.subr.bf16.mxu1 %v2071_v10 }
  0x6c   :  { %1893 = vmatpush3.bf16.msra.mxu0 %v2072_v11 }
  0x6d   :  { %1894 = vmatprep.subr.bf16.mxu0 %v2074_v13 }
  0x6e   :  { %1915 = vmatpush3.bf16.msra.mxu1 %v2073_v12 }
  0x6f   :  { %1916 = vmatprep.subr.bf16.mxu1 %v2075_v14 }
  0x70   :  { %1895 = vmatpush3.bf16.msra.mxu0 %v2076_v15 }
  0x71   :  { %1896 = vmatprep.subr.bf16.mxu0 %v2078_v17 }
  0x72   :  { %1917 = vmatpush3.bf16.msra.mxu1 %v2077_v16 }
  0x73   :  { %1918 = vmatprep.subr.bf16.mxu1 %v2079_v18 }
  0x74   :  { %1897 = vmatpush3.bf16.msra.mxu0 %v2080_v19 }
  0x75   :  { %1898 = vmatprep.subr.bf16.mxu0 %v2082_v21 }
  0x76   :  { %1919 = vmatpush3.bf16.msra.mxu1 %v2081_v20 }
  0x77   :  { %1920 = vmatprep.subr.bf16.mxu1 %v2083_v22 }
  0x78   :  { %1899 = vmatpush3.bf16.msra.mxu0 %v2084_v23 }
  0x79   :  { %1900 = vmatprep.subr.bf16.mxu0 %v2086_v25 }
  0x7a   :  { %1921 = vmatpush3.bf16.msra.mxu1 %v2085_v24 }
  0x7b   :  { %1922 = vmatprep.subr.bf16.mxu1 %v2087_v26 }
  0x7c   :  { %10 = vsyncpa [#allocation3], 0  ;;  %1901 = vmatpush3.bf16.msra.mxu0 %v2088_v27  ;;  %v2092_v31 = vld [vmem:[%s2618_s1 + $0x338] sm:$0xff]   ;;  %v368_v32 = vrot.slane %v2458_v53, %v2266_v41  ;;  %v2095_v35 = vld [vmem:[%s2620_s3] sm:$0xff]   ;;  %v2128_v36 = vmov 0.0   ;;  %vm2129_vm0 = vmmov 0  }
  0x7d   :  { %1902 = vmatprep.subr.bf16.mxu0 %v2090_v29  ;;  %v2093_v33 = vld [vmem:[%s2618_s1 + $0x3b8] sm:$0xff]   ;;  %v2096_v41 = vld [vmem:[%s2620_s3 + $0x8] sm:$0xff]   ;;  %v2097_v37 = vld [vmem:[%s2620_s3 + $0x10] sm:$0xff]   ;;  %s2130_s16 = smov [#allocation2]  }
  0x7e   :  { %1923 = vmatpush3.bf16.msra.mxu1 %v2089_v28  ;;  %v384_v34 = vcombine.high %v368_v32, %v368_v32  ;;  %v2098_v38 = vld [vmem:[%s2620_s3 + $0x18] sm:$0xff]   ;;  %v2099_v39 = vld [vmem:[%s2620_s3 + $0x20] sm:$0xff]   ;;  %v2100_v40 = vld [vmem:[%s2620_s3 + $0x28] sm:$0xff]   ;;  %s1610_s17 = sshll.u32 %s2130_s16, 4  ;;  %s1611_s17 = int_to_ptr.vmem [resolvable:$true] %s1610_s17 }
  0x7f   :  { %1924 = vmatprep.subr.bf16.mxu1 %v2091_v30  ;;  %v2101_v42 = vld [vmem:[%s2620_s3 + $0x30] sm:$0xff]   ;;  %v2102_v43 = vld [vmem:[%s2620_s3 + $0x38] sm:$0xff]   ;;  %v1618_v45 = vld [vmem:[%s2619_s2] ss:$0 sm:$0xff]  ;;  %s2103_s18 = scalar_lea.vmem %s1611_s17, 32  ;;  %p2108_p1 = scmp.lt.s32.totalorder %s1611_s17, %s1611_s17 }
  0x80   :  { %1903 = vmatpush3.bf16.msra.mxu0 %v2092_v31  ;;  %v1747_v30 = vld [vmem:[%s2621_s4] ss:$0 sm:$0xff]  ;;  %p2104_p0 = scmp.ne.s32.totalorder %s1611_s17, %s2103_s18  ;;  %p2109_p2 = scmp.lt.s32.totalorder %s2103_s18, %s2103_s18 }
  0x81   :  { %1941 = vmatprep.subr.bf16.mxu0 %v2128_v36 }
  0x82   :  { %1925 = vmatpush3.bf16.msra.mxu1 %v2093_v33  ;;  %p2110_p3 = por %p2109_p2, %p2108_p1 }
  0x83   :  { %1444 = vmatmul.mubr.bf16.vlgmr.msra.gmra.mrb[12].mxu0 %v368_v32 }
  0x84   :  { %1942 = vmatpush3.bf16.msra.mxu0 %v2095_v35  ;;  %1957 = vmatprep.mubr.msk.bf16.mxu0 %vm2129_vm0, %v2128_v36  ;;  %p2111_p4 = pnand %p2110_p3, %p2104_p0 }
  0x85   :  { %1484 = vmatmul.mubr.bf16.vlgmr.msra.gmra.mrb[12].mxu1 %v384_v34  ;;  %1943 = vmatprep.subr.bf16.mxu0 %v2128_v36 }
  0x88   :  { %1944 = vmatpush3.bf16.msra.mxu0 %v2096_v41 }
  0x89   :  { %1945 = vmatprep.subr.bf16.mxu0 %v2128_v36 }
  0x8c   :  { %1946 = vmatpush3.bf16.msra.mxu0 %v2097_v37 }
  0x8d   :  { %1947 = vmatprep.subr.bf16.mxu0 %v2128_v36 }
  0x90   :  { %1948 = vmatpush3.bf16.msra.mxu0 %v2098_v38 }
  0x91   :  { %1949 = vmatprep.subr.bf16.mxu0 %v2128_v36 }
  0x94   :  { %1950 = vmatpush3.bf16.msra.mxu0 %v2099_v39 }
  0x95   :  { %1951 = vmatprep.subr.bf16.mxu0 %v2128_v36 }
  0x98   :  { %1952 = vmatpush3.bf16.msra.mxu0 %v2100_v40 }
  0x99   :  { %1953 = vmatprep.subr.bf16.mxu0 %v2128_v36 }
  0x9c   :  { %1954 = vmatpush3.bf16.msra.mxu0 %v2101_v42 }
  0x9d   :  { %1955 = vmatprep.subr.bf16.mxu0 %v2128_v36 }
  0xa0   :  { %1956 = vmatpush3.bf16.msra.mxu0 %v2102_v43 }
  0xf6   :  { %v1772_v44 = vpop.f32.mrb[0].mxu0 }
  0xf7   :  { %v1773_v46 = vpop.f32.mrb[1].mxu0  ;;  %v1794_v47 = vpop.f32.mrb[0].mxu1 }
  0xf8   :  { %v1774_v48 = vadd.f32 %v1773_v46, %v1772_v44  ;;  %v1775_v49 = vpop.f32.mrb[2].mxu0  ;;  %v1795_v50 = vpop.f32.mrb[1].mxu1 }
  0xf9   :  { %v1776_v51 = vpop.f32.mrb[3].mxu0  ;;  %v1796_v53 = vadd.f32 %v1795_v50, %v1794_v47  ;;  %v1797_v54 = vpop.f32.mrb[2].mxu1 }
  0xfa   :  { %v1206_v52 = vadd.f32 %v1774_v48, %v1618_v45  ;;  %v1798_v55 = vpop.f32.mrb[3].mxu1 }
  0xfc   :  { %v1246_v56 = vadd.f32 %v1796_v53, %v1206_v52 }
 0x116   :  { %v1816_v57 = vpop.f32.mrb[4].mxu0 }
 0x117   :  { %v1817_v58 = vpop.f32.mrb[5].mxu0  ;;  %v1838_v59 = vpop.f32.mrb[4].mxu1 }
 0x118   :  { %v1818_v60 = vadd.f32 %v1817_v58, %v1816_v57  ;;  %v1819_v61 = vpop.f32.mrb[6].mxu0  ;;  %v1839_v62 = vpop.f32.mrb[5].mxu1 }
 0x119   :  { %v1820_v63 = vpop.f32.mrb[7].mxu0  ;;  %v1840_v1 = vadd.f32 %v1839_v62, %v1838_v59  ;;  %v1841_v2 = vpop.f32.mrb[6].mxu1 }
 0x11a   :  { %v1286_v0 = vadd.f32 %v1818_v60, %v1246_v56  ;;  %v1842_v3 = vpop.f32.mrb[7].mxu1 }
 0x11c   :  { %v1326_v4 = vadd.f32 %v1840_v1, %v1286_v0 }
 0x136   :  { %v1860_v5 = vpop.f32.mrb[8].mxu0 }
 0x137   :  { %v1861_v6 = vpop.f32.mrb[9].mxu0 }
 0x138   :  { %v1882_v7 = vpop.f32.mrb[8].mxu1  ;;  %v1862_v8 = vadd.f32 %v1861_v6, %v1860_v5  ;;  %v1863_v9 = vpop.f32.mrb[10].mxu0 }
 0x139   :  { %v1883_v10 = vpop.f32.mrb[9].mxu1  ;;  %v1864_v11 = vpop.f32.mrb[11].mxu0 }
 0x13a   :  { %v1366_v12 = vadd.f32 %v1862_v8, %v1326_v4  ;;  %v1884_v13 = vadd.f32 %v1883_v10, %v1882_v7  ;;  %v1885_v14 = vpop.f32.mrb[10].mxu1 }
 0x13b   :  { %v1886_v15 = vpop.f32.mrb[11].mxu1 }
 0x13c   :  { %v1406_v16 = vadd.f32 %v1884_v13, %v1366_v12 }
 0x156   :  { %v1904_v17 = vpop.f32.mrb[12].mxu0 }
 0x157   :  { %v1905_v18 = vpop.f32.mrb[13].mxu0 }
 0x158   :  { %v1926_v19 = vpop.f32.mrb[12].mxu1  ;;  %v1906_v20 = vadd.f32 %v1905_v18, %v1904_v17  ;;  %v1907_v21 = vpop.f32.mrb[14].mxu0 }
 0x159   :  { %v1927_v22 = vpop.f32.mrb[13].mxu1  ;;  %v1908_v23 = vpop.f32.mrb[15].mxu0 }
 0x15a   :  { %v1446_v24 = vadd.f32 %v1906_v20, %v1406_v16  ;;  %v1928_v25 = vadd.f32 %v1927_v22, %v1926_v19  ;;  %v1929_v26 = vpop.f32.mrb[14].mxu1 }
 0x15b   :  { %v1930_v27 = vpop.f32.mrb[15].mxu1 }
 0x15c   :  { %v1486_v28 = vadd.f32 %v1928_v25, %v1446_v24 }
 0x15e   :  { %v1491_v29 = vpack.c.bf16 %v1486_v28, %v1486_v28 }
 0x160   :  { %1958 = vmatmul.mubr.bf16.vlgmr.msra.gmra.mrb[16].mxu0 %v1491_v29 }
 0x233   :  { %v1597_v31 = vpop.f32.mrb[16].mxu0 }
 0x234   :  { %v1598_v32 = vadd.f32 %v1747_v30, %v1597_v31  ;;  %v1959_v33 = vpop.f32.mrb[17].mxu0 }
 0x235   :  { %v1600_v34 = vpop.f32.mrb[18].mxu0 }
 0x236   :  { %1603 = vst [vmem:[#allocation2] sm:$0x3] %v1598_v32  ;;  %v1960_v35 = vpop.f32.mrb[19].mxu0 }
 0x237   :  { %2114 = shalt.err (!%p2111_p4)
}
 0x238   :  { %s2115_s4 = scalar_lea.hbm %s2622_s5, 32 }
 0x239   :  { %p2116_p5 = scmp.ne.s32.totalorder %s2622_s5, %s2115_s4  ;;  %p2119_p6 = scmp.lt.u32.totalorder %s2115_s4, %s2622_s5 }
 0x23b   :  { %p2121_p7 = pnand %p2119_p6, %p2116_p5 }
 0x23d   :  { %2124 = shalt.err (!%p2121_p7)
}
 0x23e   :  { %1613 = dma.vmem_to_hbm [thread:$0]  %s1611_s17, 32, %s2622_s5, [#allocation3]  }
 0x23f   :  { %2125 = dma.done.wait [#allocation3], 32  }
 0x240   :  { %2126 = vsyncadd [#allocation3], 4294967264 }
 0x241   :  { %1617 = vsyncpa [#allocation3], 1 }

</bundles_post_ra>
